<compile_context>
chip_gen: v6e
topology: v6e:2x2x1
jax: 0.10.0
libtpu: 0.0.40
codegen_flags: <defaults>
</compile_context>

<pallas_src>
import math
from functools import partial

import jax
import jax.numpy as jnp
from jax.experimental import pallas as pl
from jax.experimental.pallas import tpu as pltpu

X_DIMS = 28 * 28
Z_DIMS = 8
LANE = 128
HIDDEN = [128, 64, 36, 18]

ENC_DIMS = [X_DIMS] + HIDDEN                               # 784,128,64,36,18
DEC_DIMS = [Z_DIMS] + HIDDEN[::-1] + [X_DIMS, X_DIMS]      # 8,18,36,64,128,784,784
N_ENC = len(ENC_DIMS) - 1
N_DEC = len(DEC_DIMS) - 1


def _pad_dim(d: int) -> int:
    """Lane-pad narrow dims up to 128; 784 is left as-is (mostly lane-dense)."""
    return d if d >= LANE else LANE


def _vae_kernel(x_ref, eps_ref, *refs, valid_batch: int):
    """One batch tile of the VAE forward.

    refs = enc (W,b)*N_ENC, fused head (W,b), dec (W,b)*N_DEC, out_ref, kl_ref.
    Weights are bf16 (lane-padded), biases f32; all MXU accumulation is f32.
    """
    idx = 0
    enc = []
    for _ in range(N_ENC):
        enc.append((refs[idx], refs[idx + 1]))
        idx += 2
    mvw, mvb = refs[idx], refs[idx + 1]
    idx += 2
    dec = []
    for _ in range(N_DEC):
        dec.append((refs[idx], refs[idx + 1]))
        idx += 2
    out_ref, kl_ref = refs[idx], refs[idx + 1]

    tm = x_ref.shape[0]

    # ---- encoder: (bf16 @ bf16 -> f32) + bias + ReLU chain -------------------
    h = x_ref[...].astype(jnp.bfloat16)                 # in-kernel cast (cheap VPU)
    for w_ref, b_ref in enc:
        a = jnp.dot(h, w_ref[...], preferred_element_type=jnp.float32) + b_ref[...]
        h = jnp.maximum(a, 0.0).astype(jnp.bfloat16)

    # ---- fused, lane-padded [means | log_vars] head: (tm,128) @ (128,256) ----
    mv = jnp.dot(h, mvw[...], preferred_element_type=jnp.float32) + mvb[...]
    means = mv[:, :LANE]          # lanes >= Z_DIMS are exactly 0
    log_vars = mv[:, LANE:]       # lanes >= Z_DIMS are exactly 0

    # ---- reparameterize + per-tile KL partial ---------------------------------
    std = jnp.exp(0.5 * log_vars)          # one EUP exp (instead of exp + sqrt)
    vars_ = std * std
    # padded lanes contribute exactly 0 (log_var=0 -> 0 - 1 - 0 + 1 = 0);
    # padded batch rows masked out of the reduction.
    row = pl.program_id(0) * tm + jax.lax.broadcasted_iota(jnp.int32, (tm, 1), 0)
    kl_terms = jnp.where(row < valid_batch,
                         log_vars - vars_ - means * means + 1.0,
                         0.0)
    kl_ref[...] = jnp.sum(kl_terms, axis=0, keepdims=True).reshape(1, 1, LANE)

    # eps lanes >= Z_DIMS are 0, so z stays exactly lane-padded
    z = (means + std * eps_ref[...]).astype(jnp.bfloat16)

    # ---- decoder: Linear + ReLU chain, then Sigmoid ---------------------------
    h = z
    for li, (w_ref, b_ref) in enumerate(dec):
        a = jnp.dot(h, w_ref[...], preferred_element_type=jnp.float32) + b_ref[...]
        a = jnp.maximum(a, 0.0)
        h = a.astype(jnp.bfloat16) if li < N_DEC - 1 else a   # keep f32 for sigmoid

    # sigmoid(h) == 0.5*(tanh(0.5*h)+1): single EUP issue per element
    out_ref[...] = 0.5 * (jnp.tanh(0.5 * h) + 1.0)


def _zero_pad(a, rows, cols):
    out = jnp.zeros((rows, cols), a.dtype)
    return out.at[: a.shape[0], : a.shape[1]].set(a)


def init_params(key):
    """PyTorch-Linear-style init U(-1/sqrt(fan_in), 1/sqrt(fan_in)), stored in
    the kernel layout: (in, out) weights lane-padded to 128 with zeros (bf16),
    biases f32 lane-padded.  The mean/log-var head is pre-fused into a single
    (128, 256) weight: means in lanes [0:Z), log-vars in lanes [128:128+Z)."""

    def linear(k, din, dout):
        k1, k2 = jax.random.split(k)
        bound = 1.0 / math.sqrt(din)
        w = jax.random.uniform(k1, (din, dout), jnp.float32, -bound, bound)
        b = jax.random.uniform(k2, (1, dout), jnp.float32, -bound, bound)
        return w, b

    keys = list(jax.random.split(key, N_ENC + 2 + N_DEC))
    ki = 0
    enc, dec = [], []
    for i in range(N_ENC):
        w, b = linear(keys[ki], ENC_DIMS[i], ENC_DIMS[i + 1]); ki += 1
        pin, pout = _pad_dim(ENC_DIMS[i]), _pad_dim(ENC_DIMS[i + 1])
        enc.append((_zero_pad(w, pin, pout).astype(jnp.bfloat16),
                    _zero_pad(b, 1, pout)))
    mw, mb = linear(keys[ki], ENC_DIMS[-1], Z_DIMS); ki += 1
    vw, vb = linear(keys[ki], ENC_DIMS[-1], Z_DIMS); ki += 1
    pin = _pad_dim(ENC_DIMS[-1])
    mvw = jnp.zeros((pin, 2 * LANE), jnp.float32)
    mvw = mvw.at[:ENC_DIMS[-1], :Z_DIMS].set(mw)
    mvw = mvw.at[:ENC_DIMS[-1], LANE:LANE + Z_DIMS].set(vw)
    mvb = jnp.zeros((1, 2 * LANE), jnp.float32)
    mvb = mvb.at[:, :Z_DIMS].set(mb)
    mvb = mvb.at[:, LANE:LANE + Z_DIMS].set(vb)
    for i in range(N_DEC):
        w, b = linear(keys[ki], DEC_DIMS[i], DEC_DIMS[i + 1]); ki += 1
        pin, pout = _pad_dim(DEC_DIMS[i]), _pad_dim(DEC_DIMS[i + 1])
        dec.append((_zero_pad(w, pin, pout).astype(jnp.bfloat16),
                    _zero_pad(b, 1, pout)))
    return {"enc": enc, "mvw": mvw.astype(jnp.bfloat16), "mvb": mvb, "dec": dec}


def _choose_tm(b: int) -> int:
    """Batch tile: multiple of 16 (bf16 sublane pack), as large as possible
    (<=512) to amortize per-grid-step overhead, but split into >=2 tiles for
    larger batches so the 'parallel' axis can shard across v7x's two cores
    (on 1-TC chips extra grid steps just cost a little overhead)."""
    b16 = ((b + 15) // 16) * 16
    if b16 <= 256:
        return b16
    half = (b16 // 2 + 15) // 16 * 16
    return min(512, half)


def vae_forward(x_nchw, eps, params):
    b = x_nchw.shape[0]
    x = x_nchw.reshape(b, -1)                      # stays f32; cast in-kernel

    tm = _choose_tm(b)
    b_pad = ((b + tm - 1) // tm) * tm
    grid_n = b_pad // tm
    if b_pad != b:                                 # pad only when required
        x = jnp.pad(x, ((0, b_pad - b), (0, 0)))
    # eps: zero-padded to 128 lanes (keeps z lane-dense and KL exact)
    eps_p = jnp.pad(eps.astype(jnp.float32),
                    ((0, b_pad - b), (0, LANE - Z_DIMS)))

    weights = []
    for w, bi in params["enc"]:
        weights += [w, bi]
    weights += [params["mvw"], params["mvb"]]
    for w, bi in params["dec"]:
        weights += [w, bi]

    in_specs = [
        pl.BlockSpec((tm, X_DIMS), lambda i: (i, 0)),     # x tile (f32)
        pl.BlockSpec((tm, LANE), lambda i: (i, 0)),       # eps tile (f32, lane-padded)
    ] + [
        # whole-array blocks with constant index_map -> VMEM-resident params
        pl.BlockSpec(w.shape, lambda i: (0, 0))
        for w in weights
    ]
    out_specs = (
        pl.BlockSpec((tm, X_DIMS), lambda i: (i, 0)),     # decoder output tile
        pl.BlockSpec((1, 1, LANE), lambda i: (i, 0, 0)),  # per-tile KL lane partials
    )

    # Advisory cost estimate so XLA can schedule around the custom call.
    mm_weights = ([w for w, _ in params["enc"]] + [params["mvw"]]
                  + [w for w, _ in params["dec"]])
    flops = 2 * b_pad * sum(int(w.shape[0]) * int(w.shape[1]) for w in mm_weights)
    param_bytes = sum(int(a.size) * a.dtype.itemsize for a in weights)
    bytes_accessed = (param_bytes
                      + b_pad * X_DIMS * 4          # x in (f32)
                      + b_pad * LANE * 4            # eps in
                      + b_pad * X_DIMS * 4          # out
                      + grid_n * LANE * 4)          # kl partials
    transcendentals = b_pad * (LANE + X_DIMS)       # exp(std) + tanh(sigmoid)

    out_flat, kl_parts = pl.pallas_call(
        partial(_vae_kernel, valid_batch=b),
        grid=(grid_n,),
        out_shape=(
            jax.ShapeDtypeStruct((b_pad, X_DIMS), jnp.float32),
            jax.ShapeDtypeStruct((grid_n, 1, LANE), jnp.float32),
        ),
        in_specs=in_specs,
        out_specs=out_specs,
        compiler_params=pltpu.CompilerParams(
            dimension_semantics=("parallel",),       # v7x: both TCs usable
            vmem_limit_bytes=32 * 1024 * 1024,       # safe on v7x's 64 MiB
        ),
        cost_estimate=pl.CostEstimate(
            flops=int(flops),
            transcendentals=int(transcendentals),
            bytes_accessed=int(bytes_accessed),
        ),
    )(x, eps_p, *weights)

    kl = -0.5 * jnp.sum(kl_parts)
    return out_flat[:b].reshape(b, 1, 28, 28), kl


def vae_reference(x_nchw, eps, params):
    """Plain-JAX reference with the same (lane-padded, bf16-matmul, f32-acc)
    math as the kernel; padded lanes/rows contribute exactly zero, so this
    matches the module's unpadded forward semantics."""
    b = x_nchw.shape[0]
    h = x_nchw.reshape(b, -1).astype(jnp.bfloat16)
    for w, bi in params["enc"]:
        a = jnp.dot(h, w, preferred_element_type=jnp.float32) + bi
        h = jnp.maximum(a, 0.0).astype(jnp.bfloat16)
    mv = jnp.dot(h, params["mvw"], preferred_element_type=jnp.float32) + params["mvb"]
    means, log_vars = mv[:, :LANE], mv[:, LANE:]
    std = jnp.exp(0.5 * log_vars)
    vars_ = std * std
    kl = -0.5 * jnp.sum(log_vars - vars_ - means * means + 1.0)
    eps_p = jnp.pad(eps.astype(jnp.float32), ((0, 0), (0, LANE - Z_DIMS)))
    h = (means + std * eps_p).astype(jnp.bfloat16)
    for li, (w, bi) in enumerate(params["dec"]):
        a = jnp.maximum(jnp.dot(h, w, preferred_element_type=jnp.float32) + bi, 0.0)
        h = a.astype(jnp.bfloat16) if li < N_DEC - 1 else a
    out = jax.nn.sigmoid(h)   # NB: module applies ReLU before Sigmoid (upstream quirk)
    return out.reshape(b, 1, 28, 28), kl


if __name__ == "__main__":
    key = jax.random.PRNGKey(0)
    k_x, k_eps, k_p = jax.random.split(key, 3)

    batch = 2
    x = jax.random.uniform(k_x, (batch, 1, 28, 28), jnp.float32)   # NCHW input
    eps = jax.random.normal(k_eps, (batch, Z_DIMS), jnp.float32)   # reparam noise
    params = init_params(k_p)

    out, kl = vae_forward(x, eps, params)
    out = jax.block_until_ready(out)
    kl = jax.block_until_ready(kl)

    ref_out, ref_kl = vae_reference(x, eps, params)
    assert out.shape == (batch, 1, 28, 28)
    assert jnp.allclose(out, ref_out, rtol=2e-3, atol=2e-3), "decoder output mismatch"
    assert jnp.allclose(kl, ref_kl, rtol=2e-3, atol=2e-3), "kl mismatch"

    print("KERNEL_OK")
</pallas_src>

<mosaic_0001>
module attributes {stable_mosaic.version = 11 : i64} {
  func.func @_vae_kernel(%arg0: i32, %arg1: memref<16x784xf32, #tpu.memory_space<vmem>>, %arg2: memref<16x128xf32, #tpu.memory_space<vmem>>, %arg3: memref<784x128xbf16, #tpu.memory_space<vmem>>, %arg4: memref<1x128xf32, #tpu.memory_space<vmem>>, %arg5: memref<128x128xbf16, #tpu.memory_space<vmem>>, %arg6: memref<1x128xf32, #tpu.memory_space<vmem>>, %arg7: memref<128x128xbf16, #tpu.memory_space<vmem>>, %arg8: memref<1x128xf32, #tpu.memory_space<vmem>>, %arg9: memref<128x128xbf16, #tpu.memory_space<vmem>>, %arg10: memref<1x128xf32, #tpu.memory_space<vmem>>, %arg11: memref<128x256xbf16, #tpu.memory_space<vmem>>, %arg12: memref<1x256xf32, #tpu.memory_space<vmem>>, %arg13: memref<128x128xbf16, #tpu.memory_space<vmem>>, %arg14: memref<1x128xf32, #tpu.memory_space<vmem>>, %arg15: memref<128x128xbf16, #tpu.memory_space<vmem>>, %arg16: memref<1x128xf32, #tpu.memory_space<vmem>>, %arg17: memref<128x128xbf16, #tpu.memory_space<vmem>>, %arg18: memref<1x128xf32, #tpu.memory_space<vmem>>, %arg19: memref<128x128xbf16, #tpu.memory_space<vmem>>, %arg20: memref<1x128xf32, #tpu.memory_space<vmem>>, %arg21: memref<128x784xbf16, #tpu.memory_space<vmem>>, %arg22: memref<1x784xf32, #tpu.memory_space<vmem>>, %arg23: memref<784x784xbf16, #tpu.memory_space<vmem>>, %arg24: memref<1x784xf32, #tpu.memory_space<vmem>>, %arg25: memref<16x784xf32, #tpu.memory_space<vmem>>, %arg26: memref<1x1x128xf32, #tpu.memory_space<vmem>>) attributes {dimension_semantics = [#tpu.dimension_semantics<parallel>], iteration_bounds = array<i64: 1>, scalar_prefetch = 0 : i64, scratch_operands = 0 : i64, tpu.core_type = #tpu.core_type<tc>, window_params = [{transform_indices = @transform_0, window_bounds = array<i64: 16, 784>}, {transform_indices = @transform_1, window_bounds = array<i64: 16, 128>}, {pipeline_mode = #tpu.pipeline_mode<synchronous>, transform_indices = @transform_2, window_bounds = array<i64: 784, 128>}, {pipeline_mode = #tpu.pipeline_mode<synchronous>, transform_indices = @transform_3, window_bounds = array<i64: 1, 128>}, {pipeline_mode = #tpu.pipeline_mode<synchronous>, transform_indices = @transform_4, window_bounds = array<i64: 128, 128>}, {pipeline_mode = #tpu.pipeline_mode<synchronous>, transform_indices = @transform_5, window_bounds = array<i64: 1, 128>}, {pipeline_mode = #tpu.pipeline_mode<synchronous>, transform_indices = @transform_6, window_bounds = array<i64: 128, 128>}, {pipeline_mode = #tpu.pipeline_mode<synchronous>, transform_indices = @transform_7, window_bounds = array<i64: 1, 128>}, {pipeline_mode = #tpu.pipeline_mode<synchronous>, transform_indices = @transform_8, window_bounds = array<i64: 128, 128>}, {pipeline_mode = #tpu.pipeline_mode<synchronous>, transform_indices = @transform_9, window_bounds = array<i64: 1, 128>}, {pipeline_mode = #tpu.pipeline_mode<synchronous>, transform_indices = @transform_10, window_bounds = array<i64: 128, 256>}, {pipeline_mode = #tpu.pipeline_mode<synchronous>, transform_indices = @transform_11, window_bounds = array<i64: 1, 256>}, {pipeline_mode = #tpu.pipeline_mode<synchronous>, transform_indices = @transform_12, window_bounds = array<i64: 128, 128>}, {pipeline_mode = #tpu.pipeline_mode<synchronous>, transform_indices = @transform_13, window_bounds = array<i64: 1, 128>}, {pipeline_mode = #tpu.pipeline_mode<synchronous>, transform_indices = @transform_14, window_bounds = array<i64: 128, 128>}, {pipeline_mode = #tpu.pipeline_mode<synchronous>, transform_indices = @transform_15, window_bounds = array<i64: 1, 128>}, {pipeline_mode = #tpu.pipeline_mode<synchronous>, transform_indices = @transform_16, window_bounds = array<i64: 128, 128>}, {pipeline_mode = #tpu.pipeline_mode<synchronous>, transform_indices = @transform_17, window_bounds = array<i64: 1, 128>}, {pipeline_mode = #tpu.pipeline_mode<synchronous>, transform_indices = @transform_18, window_bounds = array<i64: 128, 128>}, {pipeline_mode = #tpu.pipeline_mode<synchronous>, transform_indices = @transform_19, window_bounds = array<i64: 1, 128>}, {pipeline_mode = #tpu.pipeline_mode<synchronous>, transform_indices = @transform_20, window_bounds = array<i64: 128, 784>}, {pipeline_mode = #tpu.pipeline_mode<synchronous>, transform_indices = @transform_21, window_bounds = array<i64: 1, 784>}, {pipeline_mode = #tpu.pipeline_mode<synchronous>, transform_indices = @transform_22, window_bounds = array<i64: 784, 784>}, {pipeline_mode = #tpu.pipeline_mode<synchronous>, transform_indices = @transform_23, window_bounds = array<i64: 1, 784>}, {transform_indices = @transform_24, window_bounds = array<i64: 16, 784>}, {transform_indices = @transform_25, window_bounds = array<i64: 1, 1, 128>}]} {
    %c0 = arith.constant 0 : index
    %c0_0 = arith.constant 0 : index
    %0 = vector.load %arg1[%c0, %c0_0] : memref<16x784xf32, #tpu.memory_space<vmem>>, vector<16x784xf32>
    %1 = arith.truncf %0 : vector<16x784xf32> to vector<16x784xbf16>
    %c0_1 = arith.constant 0 : index
    %c0_2 = arith.constant 0 : index
    %2 = vector.load %arg3[%c0_1, %c0_2] : memref<784x128xbf16, #tpu.memory_space<vmem>>, vector<784x128xbf16>
    %cst = arith.constant dense<0.000000e+00> : vector<16x128xf32>
    %3 = tpu.matmul %1, %2, %cst {dimension_numbers = #tpu.dot_dimension_numbers<[1], [0], [0], [1], [0, 0, 1, 1], [], []>} : vector<16x784xbf16>, vector<784x128xbf16>, vector<16x128xf32> -> vector<16x128xf32>
    %c0_3 = arith.constant 0 : index
    %c0_4 = arith.constant 0 : index
    %4 = vector.load %arg4[%c0_3, %c0_4] : memref<1x128xf32, #tpu.memory_space<vmem>>, vector<1x128xf32>
    %5 = vector.broadcast %4 : vector<1x128xf32> to vector<16x128xf32>
    %6 = arith.addf %3, %5 : vector<16x128xf32>
    %cst_5 = arith.constant 0.000000e+00 : f32
    %7 = vector.broadcast %cst_5 : f32 to vector<16x128xf32>
    %8 = arith.maximumf %6, %7 : vector<16x128xf32>
    %9 = arith.truncf %8 : vector<16x128xf32> to vector<16x128xbf16>
    %c0_6 = arith.constant 0 : index
    %c0_7 = arith.constant 0 : index
    %10 = vector.load %arg5[%c0_6, %c0_7] : memref<128x128xbf16, #tpu.memory_space<vmem>>, vector<128x128xbf16>
    %cst_8 = arith.constant dense<0.000000e+00> : vector<16x128xf32>
    %11 = tpu.matmul %9, %10, %cst_8 {dimension_numbers = #tpu.dot_dimension_numbers<[1], [0], [0], [1], [0, 0, 1, 1], [], []>} : vector<16x128xbf16>, vector<128x128xbf16>, vector<16x128xf32> -> vector<16x128xf32>
    %c0_9 = arith.constant 0 : index
    %c0_10 = arith.constant 0 : index
    %12 = vector.load %arg6[%c0_9, %c0_10] : memref<1x128xf32, #tpu.memory_space<vmem>>, vector<1x128xf32>
    %13 = vector.broadcast %12 : vector<1x128xf32> to vector<16x128xf32>
    %14 = arith.addf %11, %13 : vector<16x128xf32>
    %cst_11 = arith.constant 0.000000e+00 : f32
    %15 = vector.broadcast %cst_11 : f32 to vector<16x128xf32>
    %16 = arith.maximumf %14, %15 : vector<16x128xf32>
    %17 = arith.truncf %16 : vector<16x128xf32> to vector<16x128xbf16>
    %c0_12 = arith.constant 0 : index
    %c0_13 = arith.constant 0 : index
    %18 = vector.load %arg7[%c0_12, %c0_13] : memref<128x128xbf16, #tpu.memory_space<vmem>>, vector<128x128xbf16>
    %cst_14 = arith.constant dense<0.000000e+00> : vector<16x128xf32>
    %19 = tpu.matmul %17, %18, %cst_14 {dimension_numbers = #tpu.dot_dimension_numbers<[1], [0], [0], [1], [0, 0, 1, 1], [], []>} : vector<16x128xbf16>, vector<128x128xbf16>, vector<16x128xf32> -> vector<16x128xf32>
    %c0_15 = arith.constant 0 : index
    %c0_16 = arith.constant 0 : index
    %20 = vector.load %arg8[%c0_15, %c0_16] : memref<1x128xf32, #tpu.memory_space<vmem>>, vector<1x128xf32>
    %21 = vector.broadcast %20 : vector<1x128xf32> to vector<16x128xf32>
    %22 = arith.addf %19, %21 : vector<16x128xf32>
    %cst_17 = arith.constant 0.000000e+00 : f32
    %23 = vector.broadcast %cst_17 : f32 to vector<16x128xf32>
    %24 = arith.maximumf %22, %23 : vector<16x128xf32>
    %25 = arith.truncf %24 : vector<16x128xf32> to vector<16x128xbf16>
    %c0_18 = arith.constant 0 : index
    %c0_19 = arith.constant 0 : index
    %26 = vector.load %arg9[%c0_18, %c0_19] : memref<128x128xbf16, #tpu.memory_space<vmem>>, vector<128x128xbf16>
    %cst_20 = arith.constant dense<0.000000e+00> : vector<16x128xf32>
    %27 = tpu.matmul %25, %26, %cst_20 {dimension_numbers = #tpu.dot_dimension_numbers<[1], [0], [0], [1], [0, 0, 1, 1], [], []>} : vector<16x128xbf16>, vector<128x128xbf16>, vector<16x128xf32> -> vector<16x128xf32>
    %c0_21 = arith.constant 0 : index
    %c0_22 = arith.constant 0 : index
    %28 = vector.load %arg10[%c0_21, %c0_22] : memref<1x128xf32, #tpu.memory_space<vmem>>, vector<1x128xf32>
    %29 = vector.broadcast %28 : vector<1x128xf32> to vector<16x128xf32>
    %30 = arith.addf %27, %29 : vector<16x128xf32>
    %cst_23 = arith.constant 0.000000e+00 : f32
    %31 = vector.broadcast %cst_23 : f32 to vector<16x128xf32>
    %32 = arith.maximumf %30, %31 : vector<16x128xf32>
    %33 = arith.truncf %32 : vector<16x128xf32> to vector<16x128xbf16>
    %c0_24 = arith.constant 0 : index
    %c0_25 = arith.constant 0 : index
    %34 = vector.load %arg11[%c0_24, %c0_25] : memref<128x256xbf16, #tpu.memory_space<vmem>>, vector<128x256xbf16>
    %cst_26 = arith.constant dense<0.000000e+00> : vector<16x256xf32>
    %35 = tpu.matmul %33, %34, %cst_26 {dimension_numbers = #tpu.dot_dimension_numbers<[1], [0], [0], [1], [0, 0, 1, 1], [], []>} : vector<16x128xbf16>, vector<128x256xbf16>, vector<16x256xf32> -> vector<16x256xf32>
    %c0_27 = arith.constant 0 : index
    %c0_28 = arith.constant 0 : index
    %36 = vector.load %arg12[%c0_27, %c0_28] : memref<1x256xf32, #tpu.memory_space<vmem>>, vector<1x256xf32>
    %37 = vector.broadcast %36 : vector<1x256xf32> to vector<16x256xf32>
    %38 = arith.addf %35, %37 : vector<16x256xf32>
    %39 = vector.extract_strided_slice %38 {offsets = [0, 0], sizes = [16, 128], strides = [1, 1]} : vector<16x256xf32> to vector<16x128xf32>
    %40 = vector.extract_strided_slice %38 {offsets = [0, 128], sizes = [16, 128], strides = [1, 1]} : vector<16x256xf32> to vector<16x128xf32>
    %cst_29 = arith.constant 5.000000e-01 : f32
    %41 = vector.broadcast %cst_29 : f32 to vector<16x128xf32>
    %42 = arith.mulf %41, %40 : vector<16x128xf32>
    %43 = math.exp %42 : vector<16x128xf32>
    %44 = arith.mulf %43, %43 : vector<16x128xf32>
    %c16_i32 = arith.constant 16 : i32
    %45 = arith.muli %arg0, %c16_i32 : i32
    %46 = tpu.iota {dimensions = array<i32: 0>} : vector<16x1xi32>
    %47 = vector.broadcast %45 : i32 to vector<16x1xi32>
    %48 = arith.addi %47, %46 : vector<16x1xi32>
    %c2_i32 = arith.constant 2 : i32
    %49 = vector.broadcast %c2_i32 : i32 to vector<16x1xi32>
    %50 = arith.cmpi slt, %48, %49 : vector<16x1xi32>
    %51 = arith.subf %40, %44 : vector<16x128xf32>
    %52 = arith.mulf %39, %39 : vector<16x128xf32>
    %53 = arith.subf %51, %52 : vector<16x128xf32>
    %cst_30 = arith.constant 1.000000e+00 : f32
    %54 = vector.broadcast %cst_30 : f32 to vector<16x128xf32>
    %55 = arith.addf %53, %54 : vector<16x128xf32>
    %cst_31 = arith.constant 0.000000e+00 : f32
    %56 = vector.shape_cast %50 : vector<16x1xi1> to vector<16x1xi1>
    %57 = vector.broadcast %56 : vector<16x1xi1> to vector<16x128xi1>
    %58 = vector.broadcast %cst_31 : f32 to vector<16x128xf32>
    %59 = arith.select %57, %55, %58 : vector<16x128xi1>, vector<16x128xf32>
    %cst_32 = arith.constant dense<0.000000e+00> : vector<128xf32>
    %60 = vector.multi_reduction <add>, %59, %cst_32 [0] : vector<16x128xf32> to vector<128xf32>
    %61 = vector.shape_cast %60 : vector<128xf32> to vector<1x128xf32>
    %62 = vector.shape_cast %61 : vector<1x128xf32> to vector<1x1x128xf32>
    %c0_33 = arith.constant 0 : index
    %c0_34 = arith.constant 0 : index
    %c0_35 = arith.constant 0 : index
    %63 = vector.load %arg26[%c0_33, %c0_34, %c0_35] : memref<1x1x128xf32, #tpu.memory_space<vmem>>, vector<1x1x128xf32>
    tpu.vector_store %arg26[%c0_33, %c0_34, %c0_35], %62 {strides = array<i32>} : memref<1x1x128xf32, #tpu.memory_space<vmem>>, vector<1x1x128xf32>,
    %c0_36 = arith.constant 0 : index
    %c0_37 = arith.constant 0 : index
    %64 = vector.load %arg2[%c0_36, %c0_37] : memref<16x128xf32, #tpu.memory_space<vmem>>, vector<16x128xf32>
    %65 = arith.mulf %43, %64 : vector<16x128xf32>
    %66 = arith.addf %39, %65 : vector<16x128xf32>
    %67 = arith.truncf %66 : vector<16x128xf32> to vector<16x128xbf16>
    %c0_38 = arith.constant 0 : index
    %c0_39 = arith.constant 0 : index
    %68 = vector.load %arg13[%c0_38, %c0_39] : memref<128x128xbf16, #tpu.memory_space<vmem>>, vector<128x128xbf16>
    %cst_40 = arith.constant dense<0.000000e+00> : vector<16x128xf32>
    %69 = tpu.matmul %67, %68, %cst_40 {dimension_numbers = #tpu.dot_dimension_numbers<[1], [0], [0], [1], [0, 0, 1, 1], [], []>} : vector<16x128xbf16>, vector<128x128xbf16>, vector<16x128xf32> -> vector<16x128xf32>
    %c0_41 = arith.constant 0 : index
    %c0_42 = arith.constant 0 : index
    %70 = vector.load %arg14[%c0_41, %c0_42] : memref<1x128xf32, #tpu.memory_space<vmem>>, vector<1x128xf32>
    %71 = vector.broadcast %70 : vector<1x128xf32> to vector<16x128xf32>
    %72 = arith.addf %69, %71 : vector<16x128xf32>
    %cst_43 = arith.constant 0.000000e+00 : f32
    %73 = vector.broadcast %cst_43 : f32 to vector<16x128xf32>
    %74 = arith.maximumf %72, %73 : vector<16x128xf32>
    %75 = arith.truncf %74 : vector<16x128xf32> to vector<16x128xbf16>
    %c0_44 = arith.constant 0 : index
    %c0_45 = arith.constant 0 : index
    %76 = vector.load %arg15[%c0_44, %c0_45] : memref<128x128xbf16, #tpu.memory_space<vmem>>, vector<128x128xbf16>
    %cst_46 = arith.constant dense<0.000000e+00> : vector<16x128xf32>
    %77 = tpu.matmul %75, %76, %cst_46 {dimension_numbers = #tpu.dot_dimension_numbers<[1], [0], [0], [1], [0, 0, 1, 1], [], []>} : vector<16x128xbf16>, vector<128x128xbf16>, vector<16x128xf32> -> vector<16x128xf32>
    %c0_47 = arith.constant 0 : index
    %c0_48 = arith.constant 0 : index
    %78 = vector.load %arg16[%c0_47, %c0_48] : memref<1x128xf32, #tpu.memory_space<vmem>>, vector<1x128xf32>
    %79 = vector.broadcast %78 : vector<1x128xf32> to vector<16x128xf32>
    %80 = arith.addf %77, %79 : vector<16x128xf32>
    %cst_49 = arith.constant 0.000000e+00 : f32
    %81 = vector.broadcast %cst_49 : f32 to vector<16x128xf32>
    %82 = arith.maximumf %80, %81 : vector<16x128xf32>
    %83 = arith.truncf %82 : vector<16x128xf32> to vector<16x128xbf16>
    %c0_50 = arith.constant 0 : index
    %c0_51 = arith.constant 0 : index
    %84 = vector.load %arg17[%c0_50, %c0_51] : memref<128x128xbf16, #tpu.memory_space<vmem>>, vector<128x128xbf16>
    %cst_52 = arith.constant dense<0.000000e+00> : vector<16x128xf32>
    %85 = tpu.matmul %83, %84, %cst_52 {dimension_numbers = #tpu.dot_dimension_numbers<[1], [0], [0], [1], [0, 0, 1, 1], [], []>} : vector<16x128xbf16>, vector<128x128xbf16>, vector<16x128xf32> -> vector<16x128xf32>
    %c0_53 = arith.constant 0 : index
    %c0_54 = arith.constant 0 : index
    %86 = vector.load %arg18[%c0_53, %c0_54] : memref<1x128xf32, #tpu.memory_space<vmem>>, vector<1x128xf32>
    %87 = vector.broadcast %86 : vector<1x128xf32> to vector<16x128xf32>
    %88 = arith.addf %85, %87 : vector<16x128xf32>
    %cst_55 = arith.constant 0.000000e+00 : f32
    %89 = vector.broadcast %cst_55 : f32 to vector<16x128xf32>
    %90 = arith.maximumf %88, %89 : vector<16x128xf32>
    %91 = arith.truncf %90 : vector<16x128xf32> to vector<16x128xbf16>
    %c0_56 = arith.constant 0 : index
    %c0_57 = arith.constant 0 : index
    %92 = vector.load %arg19[%c0_56, %c0_57] : memref<128x128xbf16, #tpu.memory_space<vmem>>, vector<128x128xbf16>
    %cst_58 = arith.constant dense<0.000000e+00> : vector<16x128xf32>
    %93 = tpu.matmul %91, %92, %cst_58 {dimension_numbers = #tpu.dot_dimension_numbers<[1], [0], [0], [1], [0, 0, 1, 1], [], []>} : vector<16x128xbf16>, vector<128x128xbf16>, vector<16x128xf32> -> vector<16x128xf32>
    %c0_59 = arith.constant 0 : index
    %c0_60 = arith.constant 0 : index
    %94 = vector.load %arg20[%c0_59, %c0_60] : memref<1x128xf32, #tpu.memory_space<vmem>>, vector<1x128xf32>
    %95 = vector.broadcast %94 : vector<1x128xf32> to vector<16x128xf32>
    %96 = arith.addf %93, %95 : vector<16x128xf32>
    %cst_61 = arith.constant 0.000000e+00 : f32
    %97 = vector.broadcast %cst_61 : f32 to vector<16x128xf32>
    %98 = arith.maximumf %96, %97 : vector<16x128xf32>
    %99 = arith.truncf %98 : vector<16x128xf32> to vector<16x128xbf16>
    %c0_62 = arith.constant 0 : index
    %c0_63 = arith.constant 0 : index
    %100 = vector.load %arg21[%c0_62, %c0_63] : memref<128x784xbf16, #tpu.memory_space<vmem>>, vector<128x784xbf16>
    %cst_64 = arith.constant dense<0.000000e+00> : vector<16x784xf32>
    %101 = tpu.matmul %99, %100, %cst_64 {dimension_numbers = #tpu.dot_dimension_numbers<[1], [0], [0], [1], [0, 0, 1, 1], [], []>} : vector<16x128xbf16>, vector<128x784xbf16>, vector<16x784xf32> -> vector<16x784xf32>
    %c0_65 = arith.constant 0 : index
    %c0_66 = arith.constant 0 : index
    %102 = vector.load %arg22[%c0_65, %c0_66] : memref<1x784xf32, #tpu.memory_space<vmem>>, vector<1x784xf32>
    %103 = vector.broadcast %102 : vector<1x784xf32> to vector<16x784xf32>
    %104 = arith.addf %101, %103 : vector<16x784xf32>
    %cst_67 = arith.constant 0.000000e+00 : f32
    %105 = vector.broadcast %cst_67 : f32 to vector<16x784xf32>
    %106 = arith.maximumf %104, %105 : vector<16x784xf32>
    %107 = arith.truncf %106 : vector<16x784xf32> to vector<16x784xbf16>
    %c0_68 = arith.constant 0 : index
    %c0_69 = arith.constant 0 : index
    %108 = vector.load %arg23[%c0_68, %c0_69] : memref<784x784xbf16, #tpu.memory_space<vmem>>, vector<784x784xbf16>
    %cst_70 = arith.constant dense<0.000000e+00> : vector<16x784xf32>
    %109 = tpu.matmul %107, %108, %cst_70 {dimension_numbers = #tpu.dot_dimension_numbers<[1], [0], [0], [1], [0, 0, 1, 1], [], []>} : vector<16x784xbf16>, vector<784x784xbf16>, vector<16x784xf32> -> vector<16x784xf32>
    %c0_71 = arith.constant 0 : index
    %c0_72 = arith.constant 0 : index
    %110 = vector.load %arg24[%c0_71, %c0_72] : memref<1x784xf32, #tpu.memory_space<vmem>>, vector<1x784xf32>
    %111 = vector.broadcast %110 : vector<1x784xf32> to vector<16x784xf32>
    %112 = arith.addf %109, %111 : vector<16x784xf32>
    %cst_73 = arith.constant 0.000000e+00 : f32
    %113 = vector.broadcast %cst_73 : f32 to vector<16x784xf32>
    %114 = arith.maximumf %112, %113 : vector<16x784xf32>
    %cst_74 = arith.constant 5.000000e-01 : f32
    %115 = vector.broadcast %cst_74 : f32 to vector<16x784xf32>
    %116 = arith.mulf %115, %114 : vector<16x784xf32>
    %117 = math.tanh %116 : vector<16x784xf32>
    %cst_75 = arith.constant 1.000000e+00 : f32
    %118 = vector.broadcast %cst_75 : f32 to vector<16x784xf32>
    %119 = arith.addf %117, %118 : vector<16x784xf32>
    %cst_76 = arith.constant 5.000000e-01 : f32
    %120 = vector.broadcast %cst_76 : f32 to vector<16x784xf32>
    %121 = arith.mulf %120, %119 : vector<16x784xf32>
    %c0_77 = arith.constant 0 : index
    %c0_78 = arith.constant 0 : index
    %122 = vector.load %arg25[%c0_77, %c0_78] : memref<16x784xf32, #tpu.memory_space<vmem>>, vector<16x784xf32>
    tpu.vector_store %arg25[%c0_77, %c0_78], %121 {strides = array<i32>} : memref<16x784xf32, #tpu.memory_space<vmem>>, vector<16x784xf32>,
    return
  }
  func.func @transform_0(%arg0: i32) -> (i32, i32) {
    %c0_i32 = arith.constant 0 : i32
    %c0_i32_0 = arith.constant 0 : i32
    return %arg0, %c0_i32 : i32, i32
  }
  func.func @transform_1(%arg0: i32) -> (i32, i32) {
    %c0_i32 = arith.constant 0 : i32
    %c0_i32_0 = arith.constant 0 : i32
    return %arg0, %c0_i32 : i32, i32
  }
  func.func @transform_2(%arg0: i32) -> (i32, i32) {
    %c0_i32 = arith.constant 0 : i32
    %c0_i32_0 = arith.constant 0 : i32
    %c0_i32_1 = arith.constant 0 : i32
    return %c0_i32, %c0_i32_0 : i32, i32
  }
  func.func @transform_3(%arg0: i32) -> (i32, i32) {
    %c0_i32 = arith.constant 0 : i32
    %c0_i32_0 = arith.constant 0 : i32
    %c0_i32_1 = arith.constant 0 : i32
    return %c0_i32, %c0_i32_0 : i32, i32
  }
  func.func @transform_4(%arg0: i32) -> (i32, i32) {
    %c0_i32 = arith.constant 0 : i32
    %c0_i32_0 = arith.constant 0 : i32
    %c0_i32_1 = arith.constant 0 : i32
    return %c0_i32, %c0_i32_0 : i32, i32
  }
  func.func @transform_5(%arg0: i32) -> (i32, i32) {
    %c0_i32 = arith.constant 0 : i32
    %c0_i32_0 = arith.constant 0 : i32
    %c0_i32_1 = arith.constant 0 : i32
    return %c0_i32, %c0_i32_0 : i32, i32
  }
  func.func @transform_6(%arg0: i32) -> (i32, i32) {
    %c0_i32 = arith.constant 0 : i32
    %c0_i32_0 = arith.constant 0 : i32
    %c0_i32_1 = arith.constant 0 : i32
    return %c0_i32, %c0_i32_0 : i32, i32
  }
  func.func @transform_7(%arg0: i32) -> (i32, i32) {
    %c0_i32 = arith.constant 0 : i32
    %c0_i32_0 = arith.constant 0 : i32
    %c0_i32_1 = arith.constant 0 : i32
    return %c0_i32, %c0_i32_0 : i32, i32
  }
  func.func @transform_8(%arg0: i32) -> (i32, i32) {
    %c0_i32 = arith.constant 0 : i32
    %c0_i32_0 = arith.constant 0 : i32
    %c0_i32_1 = arith.constant 0 : i32
    return %c0_i32, %c0_i32_0 : i32, i32
  }
  func.func @transform_9(%arg0: i32) -> (i32, i32) {
    %c0_i32 = arith.constant 0 : i32
    %c0_i32_0 = arith.constant 0 : i32
    %c0_i32_1 = arith.constant 0 : i32
    return %c0_i32, %c0_i32_0 : i32, i32
  }
  func.func @transform_10(%arg0: i32) -> (i32, i32) {
    %c0_i32 = arith.constant 0 : i32
    %c0_i32_0 = arith.constant 0 : i32
    %c0_i32_1 = arith.constant 0 : i32
    return %c0_i32, %c0_i32_0 : i32, i32
  }
  func.func @transform_11(%arg0: i32) -> (i32, i32) {
    %c0_i32 = arith.constant 0 : i32
    %c0_i32_0 = arith.constant 0 : i32
    %c0_i32_1 = arith.constant 0 : i32
    return %c0_i32, %c0_i32_0 : i32, i32
  }
  func.func @transform_12(%arg0: i32) -> (i32, i32) {
    %c0_i32 = arith.constant 0 : i32
    %c0_i32_0 = arith.constant 0 : i32
    %c0_i32_1 = arith.constant 0 : i32
    return %c0_i32, %c0_i32_0 : i32, i32
  }
  func.func @transform_13(%arg0: i32) -> (i32, i32) {
    %c0_i32 = arith.constant 0 : i32
    %c0_i32_0 = arith.constant 0 : i32
    %c0_i32_1 = arith.constant 0 : i32
    return %c0_i32, %c0_i32_0 : i32, i32
  }
  func.func @transform_14(%arg0: i32) -> (i32, i32) {
    %c0_i32 = arith.constant 0 : i32
    %c0_i32_0 = arith.constant 0 : i32
    %c0_i32_1 = arith.constant 0 : i32
    return %c0_i32, %c0_i32_0 : i32, i32
  }
  func.func @transform_15(%arg0: i32) -> (i32, i32) {
    %c0_i32 = arith.constant 0 : i32
    %c0_i32_0 = arith.constant 0 : i32
    %c0_i32_1 = arith.constant 0 : i32
    return %c0_i32, %c0_i32_0 : i32, i32
  }
  func.func @transform_16(%arg0: i32) -> (i32, i32) {
    %c0_i32 = arith.constant 0 : i32
    %c0_i32_0 = arith.constant 0 : i32
    %c0_i32_1 = arith.constant 0 : i32
    return %c0_i32, %c0_i32_0 : i32, i32
  }
  func.func @transform_17(%arg0: i32) -> (i32, i32) {
    %c0_i32 = arith.constant 0 : i32
    %c0_i32_0 = arith.constant 0 : i32
    %c0_i32_1 = arith.constant 0 : i32
    return %c0_i32, %c0_i32_0 : i32, i32
  }
  func.func @transform_18(%arg0: i32) -> (i32, i32) {
    %c0_i32 = arith.constant 0 : i32
    %c0_i32_0 = arith.constant 0 : i32
    %c0_i32_1 = arith.constant 0 : i32
    return %c0_i32, %c0_i32_0 : i32, i32
  }
  func.func @transform_19(%arg0: i32) -> (i32, i32) {
    %c0_i32 = arith.constant 0 : i32
    %c0_i32_0 = arith.constant 0 : i32
    %c0_i32_1 = arith.constant 0 : i32
    return %c0_i32, %c0_i32_0 : i32, i32
  }
  func.func @transform_20(%arg0: i32) -> (i32, i32) {
    %c0_i32 = arith.constant 0 : i32
    %c0_i32_0 = arith.constant 0 : i32
    %c0_i32_1 = arith.constant 0 : i32
    return %c0_i32, %c0_i32_0 : i32, i32
  }
  func.func @transform_21(%arg0: i32) -> (i32, i32) {
    %c0_i32 = arith.constant 0 : i32
    %c0_i32_0 = arith.constant 0 : i32
    %c0_i32_1 = arith.constant 0 : i32
    return %c0_i32, %c0_i32_0 : i32, i32
  }
  func.func @transform_22(%arg0: i32) -> (i32, i32) {
    %c0_i32 = arith.constant 0 : i32
    %c0_i32_0 = arith.constant 0 : i32
    %c0_i32_1 = arith.constant 0 : i32
    return %c0_i32, %c0_i32_0 : i32, i32
  }
  func.func @transform_23(%arg0: i32) -> (i32, i32) {
    %c0_i32 = arith.constant 0 : i32
    %c0_i32_0 = arith.constant 0 : i32
    %c0_i32_1 = arith.constant 0 : i32
    return %c0_i32, %c0_i32_0 : i32, i32
  }
  func.func @transform_24(%arg0: i32) -> (i32, i32) {
    %c0_i32 = arith.constant 0 : i32
    %c0_i32_0 = arith.constant 0 : i32
    return %arg0, %c0_i32 : i32, i32
  }
  func.func @transform_25(%arg0: i32) -> (i32, i32, i32) {
    %c0_i32 = arith.constant 0 : i32
    %c0_i32_0 = arith.constant 0 : i32
    %c0_i32_1 = arith.constant 0 : i32
    return %arg0, %c0_i32, %c0_i32_0 : i32, i32, i32
  }
}

</mosaic_0001>

<bundles_post_ra>
// kernel: tpu_custom_call.1
= control target key start
LH: loop header
LB: loop body
LE: loop exit
PB: predicated region body
PF: predicated region fallthrough
CT: control target
= control target key end

     0   :  { %s8411_s0 = inlined_call_operand.hbm [shape: f32[16,784], index: 0, kind: input, shape index: {}]   ;;  %s8412_s1 = inlined_call_operand.hbm [shape: f32[16,128], index: 1, kind: input, shape index: {}]   ;;  %s8413_s2 = inlined_call_operand.hbm [shape: bf16[784,128], index: 2, kind: input, shape index: {}]   ;;  %s8414_s3 = inlined_call_operand.hbm [shape: f32[1,128], index: 3, kind: input, shape index: {}]   ;;  %s8415_s4 = inlined_call_operand.hbm [shape: bf16[128,128], index: 4, kind: input, shape index: {}]   ;;  %s8416_s5 = inlined_call_operand.hbm [shape: f32[1,128], index: 5, kind: input, shape index: {}]   ;;  %s8417_s6 = inlined_call_operand.hbm [shape: bf16[128,128], index: 6, kind: input, shape index: {}]   ;;  %s8418_s7 = inlined_call_operand.hbm [shape: f32[1,128], index: 7, kind: input, shape index: {}]   ;;  %s8419_s8 = inlined_call_operand.hbm [shape: bf16[128,128], index: 8, kind: input, shape index: {}]   ;;  %s8420_s9 = inlined_call_operand.hbm [shape: f32[1,128], index: 9, kind: input, shape index: {}]   ;;  %s8421_s10 = inlined_call_operand.hbm [shape: bf16[128,256], index: 10, kind: input, shape index: {}]   ;;  %s8422_s11 = inlined_call_operand.hbm [shape: f32[1,256], index: 11, kind: input, shape index: {}]   ;;  %s8423_s12 = inlined_call_operand.hbm [shape: bf16[128,128], index: 12, kind: input, shape index: {}]   ;;  %s8424_s13 = inlined_call_operand.hbm [shape: f32[1,128], index: 13, kind: input, shape index: {}]   ;;  %s8425_s14 = inlined_call_operand.hbm [shape: bf16[128,128], index: 14, kind: input, shape index: {}]   ;;  %s8426_s15 = inlined_call_operand.hbm [shape: f32[1,128], index: 15, kind: input, shape index: {}]   ;;  %s8427_s16 = inlined_call_operand.hbm [shape: bf16[128,128], index: 16, kind: input, shape index: {}]   ;;  %s8428_s17 = inlined_call_operand.hbm [shape: f32[1,128], index: 17, kind: input, shape index: {}]   ;;  %s8429_s18 = inlined_call_operand.hbm [shape: bf16[128,128], index: 18, kind: input, shape index: {}]   ;;  %s8430_s19 = inlined_call_operand.hbm [shape: f32[1,128], index: 19, kind: input, shape index: {}]   ;;  %s8431_s20 = inlined_call_operand.vmem [shape: bf16[128,784], index: 20, kind: input, shape index: {}]   ;;  %s8432_s21 = inlined_call_operand.hbm [shape: f32[1,784], index: 21, kind: input, shape index: {}]   ;;  %s8433_s22 = inlined_call_operand.hbm [shape: bf16[784,784], index: 22, kind: input, shape index: {}]   ;;  %s8434_s23 = inlined_call_operand.hbm [shape: f32[1,784], index: 23, kind: input, shape index: {}]   ;;  %s8435_s24 = inlined_call_operand.hbm [shape: f32[16,784], index: 24, kind: output, shape index: {0}]   ;;  %s8436_s25 = inlined_call_operand.hbm [shape: f32[1,1,128], index: 25, kind: output, shape index: {1}]  }
   0x1   :  { %8438 = sst [smem:[#allocation55_spill]] %s8411_s0 }
   0x2   :  { %8439 = sst [smem:[#allocation56_spill]] %s8412_s1 }
   0x3   :  { %8440 = sst [smem:[#allocation57_spill]] %s8413_s2 }
   0x4   :  { %8441 = sst [smem:[#allocation58_spill]] %s8414_s3 }
   0x5   :  { %8442 = sst [smem:[#allocation59_spill]] %s8415_s4 }
   0x6   :  { %8443 = sst [smem:[#allocation60_spill]] %s8416_s5 }
   0x7   :  { %8444 = sst [smem:[#allocation61_spill]] %s8417_s6 }
   0x8   :  { %8445 = sst [smem:[#allocation62_spill]] %s8418_s7 }
   0x9   :  { %8446 = sst [smem:[#allocation63_spill]] %s8419_s8 }
   0xa   :  { %8447 = sst [smem:[#allocation64_spill]] %s8420_s9 }
   0xb   :  { %31 = vsyncpa [#allocation3], 0 }
   0xc   :  { %32 = vsyncpa [#allocation6], 0 }
   0xd   :  { %33 = vsyncpa [#allocation9], 0 }
   0xe   :  { %34 = vsyncpa [#allocation12], 0 }
   0xf   :  { %35 = vsyncpa [#allocation15], 0 }
  0x10   :  { %36 = vsyncpa [#allocation18], 0 }
  0x11   :  { %37 = vsyncpa [#allocation21], 0 }
  0x12   :  { %38 = vsyncpa [#allocation24], 0 }
  0x13   :  { %39 = vsyncpa [#allocation27], 0 }
  0x14   :  { %40 = vsyncpa [#allocation30], 0 }
  0x15   :  { %41 = vsyncpa [#allocation33], 0 }
  0x16   :  { %42 = vsyncpa [#allocation36], 0 }
  0x17   :  { %43 = vsyncpa [#allocation4], 0 }
  0x18   :  { %44 = vsyncpa [#allocation40], 0  ;;  %s7754_s29 = smov [#allocation5]  }
  0x19   :  { %s62_s2 = sshll.u32 %s7754_s29, 4  ;;  %s63_s2 = int_to_ptr.vmem [resolvable:$true] %s62_s2 }
  0x1a   :  { %s7234_s6 = scalar_lea.vmem %s63_s2, 256  ;;  %p7239_p1 = scmp.lt.s32.totalorder %s63_s2, %s63_s2 }
  0x1b   :  { %p7235_p0 = scmp.ne.s32.totalorder %s63_s2, %s7234_s6  ;;  %p7240_p2 = scmp.lt.s32.totalorder %s7234_s6, %s7234_s6 }
  0x1d   :  { %p7241_p3 = por %p7240_p2, %p7239_p1 }
  0x1f   :  { %p7242_p4 = pnand %p7241_p3, %p7235_p0 }
  0x21   :  { %7245 = shalt.err (!%p7242_p4)
}
  0x22   :  { %s8437_s30 = smov 128   ;;  %s7756_s7 = smov 8  }
  0x23   :  { %s8448_s1 = sld [smem:[#allocation56_spill]]  ;;  %s7757_s8 = smov [#allocation8]  }
  0x24   :  { %s87_s27 = sshll.u32 %s7757_s8, 4  ;;  %s7758_s4 = smov [#allocation11]   ;;  %s88_s27 = int_to_ptr.vmem [resolvable:$true] %s87_s27 }
  0x25   :  { %s109_s28 = sshll.u32 %s7758_s4, 4  ;;  %s7254_s9 = scalar_lea.vmem %s88_s27, 16  ;;  %s110_s28 = int_to_ptr.vmem [resolvable:$true] %s109_s28 }
  0x26   :  { %p7255_p5 = scmp.ne.s32.totalorder %s88_s27, %s7254_s9  ;;  %s7258_s5 = scalar_lea.vmem %s88_s27, 32 }
  0x27   :  { %p7259_p6 = scmp.lt.s32.totalorder %s88_s27, %s88_s27  ;;  %p7260_p7 = scmp.lt.s32.totalorder %s7258_s5, %s7254_s9 }
  0x29   :  { %68 = dma.hbm_to_vmem [thread:$0]  %s8448_s1, 256, %s63_s2, [#allocation6], %s8437_s30, %s8437_s30, %s7756_s7  }
  0x2a   :  { %p7261_p8 = por %p7260_p7, %p7259_p6 }
  0x2c   :  { %p7262_p9 = pnand %p7261_p8, %p7255_p5 }
  0x2e   :  { %7265 = shalt.err (!%p7262_p9)
}
  0x2f   :  { %s8449_s6 = sld [smem:[#allocation58_spill]]  ;;  %s7274_s3 = scalar_lea.vmem %s110_s28, 16 }
  0x30   :  { %p7275_p10 = scmp.ne.s32.totalorder %s110_s28, %s7274_s3  ;;  %s7278_s2 = scalar_lea.vmem %s110_s28, 32 }
  0x31   :  { %p7279_p11 = scmp.lt.s32.totalorder %s110_s28, %s110_s28  ;;  %p7280_p12 = scmp.lt.s32.totalorder %s7278_s2, %s7274_s3 }
  0x33   :  { %p7281_p13 = por %p7280_p12, %p7279_p11 }
  0x35   :  { %90 = dma.hbm_to_vmem [thread:$0]  %s8449_s6, 16, %s88_s27, [#allocation9]  }
  0x36   :  { %p7282_p0 = pnand %p7281_p13, %p7275_p10 }
  0x38   :  { %7285 = shalt.err (!%p7282_p0)
}
  0x39   :  { %s8450_s8 = sld [smem:[#allocation60_spill]]  ;;  %s7759_s4 = smov [#allocation14]  }
  0x3a   :  { %s131_s9 = sshll.u32 %s7759_s4, 4  ;;  %s7760_s5 = smov [#allocation17]   ;;  %s132_s9 = int_to_ptr.vmem [resolvable:$true] %s131_s9 }
  0x3b   :  { %s153_s30 = sshll.u32 %s7760_s5, 4  ;;  %s7294_s0 = scalar_lea.vmem %s132_s9, 16  ;;  %s154_s30 = int_to_ptr.vmem [resolvable:$true] %s153_s30 }
  0x3c   :  { %p7295_p1 = scmp.ne.s32.totalorder %s132_s9, %s7294_s0  ;;  %s7298_s27 = scalar_lea.vmem %s132_s9, 32 }
  0x3d   :  { %p7299_p2 = scmp.lt.s32.totalorder %s132_s9, %s132_s9  ;;  %p7300_p3 = scmp.lt.s32.totalorder %s7298_s27, %s7294_s0 }
  0x3f   :  { %112 = dma.hbm_to_vmem [thread:$0]  %s8450_s8, 16, %s110_s28, [#allocation12]  }
  0x40   :  { %p7301_p4 = por %p7300_p3, %p7299_p2 }
  0x42   :  { %p7302_p5 = pnand %p7301_p4, %p7295_p1 }
  0x44   :  { %7305 = shalt.err (!%p7302_p5)
}
  0x45   :  { %s8451_s3 = sld [smem:[#allocation62_spill]]  ;;  %s7314_s2 = scalar_lea.vmem %s154_s30, 16 }
  0x46   :  { %p7315_p6 = scmp.ne.s32.totalorder %s154_s30, %s7314_s2  ;;  %s7318_s28 = scalar_lea.vmem %s154_s30, 32 }
  0x47   :  { %p7319_p7 = scmp.lt.s32.totalorder %s154_s30, %s154_s30  ;;  %p7320_p8 = scmp.lt.s32.totalorder %s7318_s28, %s7314_s2 }
  0x49   :  { %p7321_p9 = por %p7320_p8, %p7319_p7 }
  0x4b   :  { %134 = dma.hbm_to_vmem [thread:$0]  %s8451_s3, 16, %s132_s9, [#allocation15]  }
  0x4c   :  { %p7322_p10 = pnand %p7321_p9, %p7315_p6 }
  0x4e   :  { %7325 = shalt.err (!%p7322_p10)
}
  0x4f   :  { %s8452_s8 = sld [smem:[#allocation64_spill]]  ;;  %s7761_s4 = smov [#allocation20]  }
  0x50   :  { %s175_s5 = sshll.u32 %s7761_s4, 4  ;;  %s7762_s0 = smov [#allocation23]   ;;  %s176_s5 = int_to_ptr.vmem [resolvable:$true] %s175_s5 }
  0x51   :  { %s197_s27 = sshll.u32 %s7762_s0, 4  ;;  %s7334_s29 = scalar_lea.vmem %s176_s5, 32  ;;  %s198_s27 = int_to_ptr.vmem [resolvable:$true] %s197_s27 }
  0x52   :  { %p7335_p11 = scmp.ne.s32.totalorder %s176_s5, %s7334_s29  ;;  %p7339_p12 = scmp.lt.s32.totalorder %s176_s5, %s176_s5 }
  0x53   :  { %p7340_p13 = scmp.lt.s32.totalorder %s7334_s29, %s7334_s29 }
  0x55   :  { %156 = dma.hbm_to_vmem [thread:$0]  %s8452_s8, 16, %s154_s30, [#allocation18]  }
  0x56   :  { %p7341_p0 = por %p7340_p13, %p7339_p12 }
  0x58   :  { %p7342_p1 = pnand %p7341_p0, %p7335_p11 }
  0x5a   :  { %7345 = shalt.err (!%p7342_p1)
}
  0x5b   :  { %178 = dma.hbm_to_vmem [thread:$0]  %s8422_s11, 32, %s176_s5, [#allocation21]  }
  0x5c   :  { %s7354_s3 = scalar_lea.vmem %s198_s27, 16  ;;  %s7358_s30 = scalar_lea.vmem %s198_s27, 32 }
  0x5d   :  { %p7355_p2 = scmp.ne.s32.totalorder %s198_s27, %s7354_s3  ;;  %p7359_p3 = scmp.lt.s32.totalorder %s198_s27, %s198_s27 }
  0x5e   :  { %p7360_p4 = scmp.lt.s32.totalorder %s7358_s30, %s7354_s3 }
  0x60   :  { %p7361_p5 = por %p7360_p4, %p7359_p3 }
  0x62   :  { %p7362_p6 = pnand %p7361_p5, %p7355_p2 }
  0x64   :  { %7365 = shalt.err (!%p7362_p6)
}
  0x65   :  { %200 = dma.hbm_to_vmem [thread:$0]  %s8424_s13, 16, %s198_s27, [#allocation24]  }
  0x66   :  { %s7763_s26 = smov [#allocation26]   ;;  %s7764_s8 = smov [#allocation29]  }
  0x67   :  { %s219_s1 = sshll.u32 %s7763_s26, 4  ;;  %s241_s4 = sshll.u32 %s7764_s8, 4  ;;  %s220_s1 = int_to_ptr.vmem [resolvable:$true] %s219_s1  ;;  %s242_s4 = int_to_ptr.vmem [resolvable:$true] %s241_s4 }
  0x68   :  { %s7374_s0 = scalar_lea.vmem %s220_s1, 16  ;;  %s7378_s11 = scalar_lea.vmem %s220_s1, 32 }
  0x69   :  { %p7375_p7 = scmp.ne.s32.totalorder %s220_s1, %s7374_s0  ;;  %p7379_p8 = scmp.lt.s32.totalorder %s220_s1, %s220_s1 }
  0x6a   :  { %p7380_p9 = scmp.lt.s32.totalorder %s7378_s11, %s7374_s0 }
  0x6c   :  { %p7381_p10 = por %p7380_p9, %p7379_p8 }
  0x6e   :  { %p7382_p11 = pnand %p7381_p10, %p7375_p7 }
  0x70   :  { %7385 = shalt.err (!%p7382_p11)
}
  0x71   :  { %222 = dma.hbm_to_vmem [thread:$0]  %s8426_s15, 16, %s220_s1, [#allocation27]  }
  0x72   :  { %s7394_s9 = scalar_lea.vmem %s242_s4, 16  ;;  %s7398_s13 = scalar_lea.vmem %s242_s4, 32 }
  0x73   :  { %p7395_p12 = scmp.ne.s32.totalorder %s242_s4, %s7394_s9  ;;  %p7399_p13 = scmp.lt.s32.totalorder %s242_s4, %s242_s4 }
  0x74   :  { %p7400_p0 = scmp.lt.s32.totalorder %s7398_s13, %s7394_s9 }
  0x76   :  { %p7401_p1 = por %p7400_p0, %p7399_p13 }
  0x78   :  { %p7402_p2 = pnand %p7401_p1, %p7395_p12 }
  0x7a   :  { %7405 = shalt.err (!%p7402_p2)
}
  0x7b   :  { %244 = dma.hbm_to_vmem [thread:$0]  %s8428_s17, 16, %s242_s4, [#allocation30]  }
  0x7c   :  { %s7765_s3 = smov [#allocation32]   ;;  %s7766_s2 = smov [#allocation35]  }
  0x7d   :  { %s263_s30 = sshll.u32 %s7765_s3, 4  ;;  %s284_s28 = sshll.u32 %s7766_s2, 4  ;;  %s264_s30 = int_to_ptr.vmem [resolvable:$true] %s263_s30  ;;  %s285_s28 = int_to_ptr.vmem [resolvable:$true] %s284_s28 }
  0x7e   :  { %s7414_s26 = scalar_lea.vmem %s264_s30, 16  ;;  %s7418_s15 = scalar_lea.vmem %s264_s30, 32 }
  0x7f   :  { %p7415_p3 = scmp.ne.s32.totalorder %s264_s30, %s7414_s26  ;;  %p7419_p4 = scmp.lt.s32.totalorder %s264_s30, %s264_s30 }
  0x80   :  { %p7420_p5 = scmp.lt.s32.totalorder %s7418_s15, %s7414_s26 }
  0x82   :  { %p7421_p6 = por %p7420_p5, %p7419_p4 }
  0x84   :  { %p7422_p7 = pnand %p7421_p6, %p7415_p3 }
  0x86   :  { %7425 = shalt.err (!%p7422_p7)
}
  0x87   :  { %266 = dma.hbm_to_vmem [thread:$0]  %s8430_s19, 16, %s264_s30, [#allocation33]  }
  0x88   :  { %s7434_s0 = scalar_lea.vmem %s285_s28, 43904  ;;  %p7439_p9 = scmp.lt.s32.totalorder %s285_s28, %s285_s28 }
  0x89   :  { %p7435_p8 = scmp.ne.s32.totalorder %s285_s28, %s7434_s0  ;;  %p7440_p10 = scmp.lt.s32.totalorder %s7434_s0, %s7434_s0 }
  0x8b   :  { %p7441_p11 = por %p7440_p10, %p7439_p9 }
  0x8d   :  { %p7442_p12 = pnand %p7441_p11, %p7435_p8 }
  0x8f   :  { %7445 = shalt.err (!%p7442_p12)
}
  0x90   :  { %s7767_s17 = smov 448   ;;  %s7768_s4 = smov 28  }
  0x91   :  { %290 = dma.hbm_to_vmem [thread:$0]  %s8433_s22, 43904, %s285_s28, [#allocation36], %s7767_s17, %s7767_s17, %s7768_s4  }
  0x92   :  { %s7769_s29 = smov [#allocation2]  }
  0x93   :  { %s50_s9 = sshll.u32 %s7769_s29, 4  ;;  %s51_s9 = int_to_ptr.vmem [resolvable:$true] %s50_s9 }
  0x94   :  { %s7454_s13 = scalar_lea.vmem %s51_s9, 1792  ;;  %p7459_p0 = scmp.lt.s32.totalorder %s51_s9, %s51_s9 }
  0x95   :  { %p7455_p13 = scmp.ne.s32.totalorder %s51_s9, %s7454_s13  ;;  %p7460_p1 = scmp.lt.s32.totalorder %s7454_s13, %s7454_s13 }
  0x97   :  { %p7461_p2 = por %p7460_p1, %p7459_p0 }
  0x99   :  { %p7462_p3 = pnand %p7461_p2, %p7455_p13 }
  0x9b   :  { %7465 = shalt.err (!%p7462_p3)
}
  0x9c   :  { %s7770_s19 = smov 896   ;;  %s7771_s27 = smov 56  }
  0x9d   :  { %s8453_s30 = sld [smem:[#allocation55_spill]]  ;;  %s7772_s22 = smov [#allocation7]  }
  0x9e   :  { %s74_s2 = sshll.u32 %s7772_s22, 4  ;;  %s75_s2 = int_to_ptr.vmem [resolvable:$true] %s74_s2 }
  0x9f   :  { %s7474_s28 = scalar_lea.vmem %s75_s2, 6272  ;;  %p7479_p5 = scmp.lt.s32.totalorder %s75_s2, %s75_s2 }
  0xa0   :  { %p7475_p4 = scmp.ne.s32.totalorder %s75_s2, %s7474_s28  ;;  %p7480_p6 = scmp.lt.s32.totalorder %s7474_s28, %s7474_s28 }
  0xa2   :  { %p7481_p7 = por %p7480_p6, %p7479_p5 }
  0xa3   :  { %56 = dma.hbm_to_vmem [thread:$0]  %s8453_s30, 1792, %s51_s9, [#allocation3], %s7770_s19, %s7770_s19, %s7771_s27  }
  0xa4   :  { %p7482_p8 = pnand %p7481_p7, %p7475_p4 }
  0xa6   :  { %7485 = shalt.err (!%p7482_p8)
}
  0xa7   :  { %s7773_s26 = smov 64   ;;  %s7774_s15 = smov 4  }
  0xa8   :  { %s8454_s0 = sld [smem:[#allocation57_spill]]  ;;  %s7775_s17 = smov [#allocation10]  }
  0xa9   :  { %s96_s4 = sshll.u32 %s7775_s17, 4  ;;  %s7776_s11 = smov [#allocation13]   ;;  %s97_s4 = int_to_ptr.vmem [resolvable:$true] %s96_s4 }
  0xaa   :  { %s118_s5 = sshll.u32 %s7776_s11, 4  ;;  %s7494_s29 = scalar_lea.vmem %s97_s4, 1024  ;;  %s119_s5 = int_to_ptr.vmem [resolvable:$true] %s118_s5 }
  0xab   :  { %p7495_p9 = scmp.ne.s32.totalorder %s97_s4, %s7494_s29  ;;  %p7499_p10 = scmp.lt.s32.totalorder %s97_s4, %s97_s4 }
  0xac   :  { %p7500_p11 = scmp.lt.s32.totalorder %s7494_s29, %s7494_s29 }
  0xae   :  { %80 = dma.hbm_to_vmem [thread:$0]  %s8454_s0, 6272, %s75_s2, [#allocation6], %s7773_s26, %s7773_s26, %s7774_s15  }
  0xaf   :  { %p7501_p12 = por %p7500_p11, %p7499_p10 }
  0xb1   :  { %p7502_p13 = pnand %p7501_p12, %p7495_p9 }
  0xb3   :  { %7505 = shalt.err (!%p7502_p13)
}
  0xb4   :  { %s8455_s6 = sld [smem:[#allocation59_spill]]  ;;  %s7514_s3 = scalar_lea.vmem %s119_s5, 1024 }
  0xb5   :  { %p7515_p0 = scmp.ne.s32.totalorder %s119_s5, %s7514_s3  ;;  %p7519_p1 = scmp.lt.s32.totalorder %s119_s5, %s119_s5 }
  0xb6   :  { %p7520_p2 = scmp.lt.s32.totalorder %s7514_s3, %s7514_s3 }
  0xb8   :  { %p7521_p3 = por %p7520_p2, %p7519_p1 }
  0xba   :  { %102 = dma.hbm_to_vmem [thread:$0]  %s8455_s6, 1024, %s97_s4, [#allocation9], %s7773_s26, %s7773_s26, %s7774_s15  }
  0xbb   :  { %p7522_p4 = pnand %p7521_p3, %p7515_p0 }
  0xbd   :  { %7525 = shalt.err (!%p7522_p4)
}
  0xbe   :  { %s8456_s2 = sld [smem:[#allocation61_spill]]  ;;  %s7777_s28 = smov [#allocation16]  }
  0xbf   :  { %s140_s1 = sshll.u32 %s7777_s28, 4  ;;  %s7778_s8 = smov [#allocation19]   ;;  %s141_s1 = int_to_ptr.vmem [resolvable:$true] %s140_s1 }
  0xc0   :  { %s162_s0 = sshll.u32 %s7778_s8, 4  ;;  %s7534_s17 = scalar_lea.vmem %s141_s1, 1024  ;;  %s163_s0 = int_to_ptr.vmem [resolvable:$true] %s162_s0 }
  0xc1   :  { %p7535_p5 = scmp.ne.s32.totalorder %s141_s1, %s7534_s17  ;;  %p7539_p6 = scmp.lt.s32.totalorder %s141_s1, %s141_s1 }
  0xc2   :  { %p7540_p7 = scmp.lt.s32.totalorder %s7534_s17, %s7534_s17 }
  0xc4   :  { %124 = dma.hbm_to_vmem [thread:$0]  %s8456_s2, 1024, %s119_s5, [#allocation12], %s7773_s26, %s7773_s26, %s7774_s15  }
  0xc5   :  { %p7541_p8 = por %p7540_p7, %p7539_p6 }
  0xc7   :  { %p7542_p9 = pnand %p7541_p8, %p7535_p5 }
  0xc9   :  { %7545 = shalt.err (!%p7542_p9)
}
  0xca   :  { %s8457_s29 = sld [smem:[#allocation63_spill]]  ;;  %s7554_s5 = scalar_lea.vmem %s163_s0, 2048 }
  0xcb   :  { %p7555_p10 = scmp.ne.s32.totalorder %s163_s0, %s7554_s5  ;;  %p7559_p11 = scmp.lt.s32.totalorder %s163_s0, %s163_s0 }
  0xcc   :  { %p7560_p12 = scmp.lt.s32.totalorder %s7554_s5, %s7554_s5 }
  0xce   :  { %p7561_p13 = por %p7560_p12, %p7559_p11 }
  0xd0   :  { %146 = dma.hbm_to_vmem [thread:$0]  %s8457_s29, 1024, %s141_s1, [#allocation15], %s7773_s26, %s7773_s26, %s7774_s15  }
  0xd1   :  { %p7562_p0 = pnand %p7561_p13, %p7555_p10 }
  0xd3   :  { %7565 = shalt.err (!%p7562_p0)
}
  0xd4   :  { %s8458_s9 = smov 128   ;;  %s7779_s3 = smov [#allocation22]  }
  0xd5   :  { %168 = dma.hbm_to_vmem [thread:$0]  %s8421_s10, 2048, %s163_s0, [#allocation18], %s8458_s9, %s8458_s9, %s7756_s7  }
  0xd6   :  { %s184_s30 = sshll.u32 %s7779_s3, 4  ;;  %s7780_s22 = smov [#allocation25]   ;;  %s185_s30 = int_to_ptr.vmem [resolvable:$true] %s184_s30 }
  0xd7   :  { %s206_s2 = sshll.u32 %s7780_s22, 4  ;;  %s7574_s28 = scalar_lea.vmem %s185_s30, 1024  ;;  %s207_s2 = int_to_ptr.vmem [resolvable:$true] %s206_s2 }
  0xd8   :  { %p7575_p1 = scmp.ne.s32.totalorder %s185_s30, %s7574_s28  ;;  %p7579_p2 = scmp.lt.s32.totalorder %s185_s30, %s185_s30 }
  0xd9   :  { %p7580_p3 = scmp.lt.s32.totalorder %s7574_s28, %s7574_s28 }
  0xdb   :  { %p7581_p4 = por %p7580_p3, %p7579_p2 }
  0xdd   :  { %p7582_p5 = pnand %p7581_p4, %p7575_p1 }
  0xdf   :  { %7585 = shalt.err (!%p7582_p5)
}
  0xe0   :  { %190 = dma.hbm_to_vmem [thread:$0]  %s8423_s12, 1024, %s185_s30, [#allocation21], %s7773_s26, %s7773_s26, %s7774_s15  }
  0xe1   :  { %s7594_s10 = scalar_lea.vmem %s207_s2, 1024  ;;  %p7599_p7 = scmp.lt.s32.totalorder %s207_s2, %s207_s2 }
  0xe2   :  { %p7595_p6 = scmp.ne.s32.totalorder %s207_s2, %s7594_s10  ;;  %p7600_p8 = scmp.lt.s32.totalorder %s7594_s10, %s7594_s10 }
  0xe4   :  { %p7601_p9 = por %p7600_p8, %p7599_p7 }
  0xe6   :  { %p7602_p10 = pnand %p7601_p9, %p7595_p6 }
  0xe8   :  { %7605 = shalt.err (!%p7602_p10)
}
  0xe9   :  { %212 = dma.hbm_to_vmem [thread:$0]  %s8425_s14, 1024, %s207_s2, [#allocation24], %s7773_s26, %s7773_s26, %s7774_s15  }
  0xea   :  { %s7781_s17 = smov [#allocation28]   ;;  %s7782_s11 = smov [#allocation31]  }
  0xeb   :  { %s228_s4 = sshll.u32 %s7781_s17, 4  ;;  %s250_s12 = sshll.u32 %s7782_s11, 4  ;;  %s229_s4 = int_to_ptr.vmem [resolvable:$true] %s228_s4  ;;  %s251_s12 = int_to_ptr.vmem [resolvable:$true] %s250_s12 }
  0xec   :  { %s7614_s29 = scalar_lea.vmem %s229_s4, 1024  ;;  %p7619_p12 = scmp.lt.s32.totalorder %s229_s4, %s229_s4 }
  0xed   :  { %p7615_p11 = scmp.ne.s32.totalorder %s229_s4, %s7614_s29  ;;  %p7620_p13 = scmp.lt.s32.totalorder %s7614_s29, %s7614_s29 }
  0xef   :  { %p7621_p0 = por %p7620_p13, %p7619_p12 }
  0xf1   :  { %p7622_p1 = pnand %p7621_p0, %p7615_p11 }
  0xf3   :  { %7625 = shalt.err (!%p7622_p1)
}
  0xf4   :  { %234 = dma.hbm_to_vmem [thread:$0]  %s8427_s16, 1024, %s229_s4, [#allocation27], %s7773_s26, %s7773_s26, %s7774_s15  }
  0xf5   :  { %s7634_s14 = scalar_lea.vmem %s251_s12, 1024  ;;  %p7639_p3 = scmp.lt.s32.totalorder %s251_s12, %s251_s12 }
  0xf6   :  { %p7635_p2 = scmp.ne.s32.totalorder %s251_s12, %s7634_s14  ;;  %p7640_p4 = scmp.lt.s32.totalorder %s7634_s14, %s7634_s14 }
  0xf8   :  { %p7641_p5 = por %p7640_p4, %p7639_p3 }
  0xfa   :  { %p7642_p6 = pnand %p7641_p5, %p7635_p2 }
  0xfc   :  { %7645 = shalt.err (!%p7642_p6)
}
  0xfd   :  { %256 = dma.hbm_to_vmem [thread:$0]  %s8429_s18, 1024, %s251_s12, [#allocation30], %s7773_s26, %s7773_s26, %s7774_s15  }
  0xfe   :  { %s7783_s3 = smov [#allocation34]   ;;  %s7784_s22 = smov [#allocation37]  }
  0xff   :  { %s275_s30 = sshll.u32 %s7783_s3, 4  ;;  %s297_s16 = sshll.u32 %s7784_s22, 4  ;;  %s276_s30 = int_to_ptr.vmem [resolvable:$true] %s275_s30  ;;  %s298_s16 = int_to_ptr.vmem [resolvable:$true] %s297_s16 }
 0x100   :  { %s7654_s2 = scalar_lea.vmem %s276_s30, 112  ;;  %s7658_s28 = scalar_lea.vmem %s276_s30, 128 }
 0x101   :  { %p7655_p7 = scmp.ne.s32.totalorder %s276_s30, %s7654_s2  ;;  %p7659_p8 = scmp.lt.s32.totalorder %s276_s30, %s276_s30 }
 0x102   :  { %p7660_p9 = scmp.lt.s32.totalorder %s7658_s28, %s7654_s2 }
 0x104   :  { %p7661_p10 = por %p7660_p9, %p7659_p8 }
 0x106   :  { %p7662_p11 = pnand %p7661_p10, %p7655_p7 }
 0x108   :  { %7665 = shalt.err (!%p7662_p11)
}
 0x109   :  { %278 = dma.hbm_to_vmem [thread:$0]  %s8432_s21, 112, %s276_s30, [#allocation33]  }
 0x10a   :  { %s7674_s10 = scalar_lea.vmem %s298_s16, 112  ;;  %s7678_s18 = scalar_lea.vmem %s298_s16, 128 }
 0x10b   :  { %p7675_p12 = scmp.ne.s32.totalorder %s298_s16, %s7674_s10  ;;  %p7679_p13 = scmp.lt.s32.totalorder %s298_s16, %s298_s16 }
 0x10c   :  { %p7680_p0 = scmp.lt.s32.totalorder %s7678_s18, %s7674_s10 }
 0x10e   :  { %p7681_p1 = por %p7680_p0, %p7679_p13 }
 0x110   :  { %p7682_p2 = pnand %p7681_p1, %p7675_p12 }
 0x112   :  { %7685 = shalt.err (!%p7682_p2)
}
 0x113   :  { %300 = dma.hbm_to_vmem [thread:$0]  %s8434_s23, 112, %s298_s16, [#allocation36]  }
 0x114   :  { %7726 = dma.done.wait [#allocation3], 1792  }
 0x115   :  { %7727 = vsyncadd [#allocation3], 4294965504 }
 0x116   :  { %7728 = dma.done.wait [#allocation6], 6528  }
 0x117   :  { %7729 = vsyncadd [#allocation6], 4294960768 }
 0x118   :  { %7730 = dma.done.wait [#allocation9], 1040  }
 0x119   :  { %7731 = vsyncadd [#allocation9], 4294966256 }
 0x11a   :  { %7732 = dma.done.wait [#allocation12], 1040  }
 0x11b   :  { %7733 = vsyncadd [#allocation12], 4294966256 }
 0x11c   :  { %7734 = dma.done.wait [#allocation15], 1040  }
 0x11d   :  { %7735 = vsyncadd [#allocation15], 4294966256 }
 0x11e   :  { %7736 = dma.done.wait [#allocation18], 2064  }
 0x11f   :  { %7737 = vsyncadd [#allocation18], 4294965232 }
 0x120   :  { %7738 = dma.done.wait [#allocation21], 1056  }
 0x121   :  { %7739 = vsyncadd [#allocation21], 4294966240 }
 0x122   :  { %7740 = dma.done.wait [#allocation24], 1040  }
 0x123   :  { %7741 = vsyncadd [#allocation24], 4294966256 }
 0x124   :  { %7742 = dma.done.wait [#allocation27], 1040  }
 0x125   :  { %7743 = vsyncadd [#allocation27], 4294966256 }
 0x126   :  { %7744 = dma.done.wait [#allocation30], 1040  }
 0x127   :  { %7745 = vsyncadd [#allocation30], 4294966256 }
 0x128   :  { %7746 = dma.done.wait [#allocation33], 128  }
 0x129   :  { %7747 = vsyncadd [#allocation33], 4294967168 }
 0x12a   :  { %7748 = dma.done.wait [#allocation36], 44016  }
 0x12b   :  { %7749 = vsyncadd [#allocation36], 4294923280  ;;  %v6495_v0 = vld [vmem:[#allocation7 + $0x78] sm:$0xff]   ;;  %v6499_v4 = vld [vmem:[#allocation7 + $0x70] sm:$0xff]   ;;  %v7785_v43 = vmov 0.0   ;;  %vm7786_vm0 = vmmov 0  }
 0x12c   :  { %v6496_v1 = vld [vmem:[#allocation7 + $0x38] sm:$0xff]   ;;  %6079 = vmatprep.subr.bf16.mxu0 %v6495_v0  ;;  %v6500_v5 = vld [vmem:[#allocation7 + $0x30] sm:$0xff]   ;;  %v6503_v8 = vld [vmem:[#allocation7 + $0x68] sm:$0xff]   ;;  %vm791_vm1 = vcmask 130048  }
 0x12d   :  { %v6497_v2 = vld [vmem:[#allocation7 + $0xf8] sm:$0xff]   ;;  %6080 = vmatpush3.bf16.msra.mxu0 %v6496_v1  ;;  %v6501_v6 = vld [vmem:[#allocation7 + $0xf0] sm:$0xff]   ;;  %v6504_v9 = vld [vmem:[#allocation7 + $0x28] sm:$0xff]  }
 0x12e   :  { %v6498_v3 = vld [vmem:[#allocation7 + $0xb8] sm:$0xff]   ;;  %6101 = vmatprep.subr.bf16.mxu1 %v6497_v2  ;;  %6081 = vmatprep.subr.bf16.mxu0 %v6499_v4  ;;  %v6502_v7 = vld [vmem:[#allocation7 + $0xb0] sm:$0xff]   ;;  %v6505_v10 = vld [vmem:[#allocation7 + $0xe8] sm:$0xff]  }
 0x12f   :  { %6102 = vmatpush3.bf16.msra.mxu1 %v6498_v3  ;;  %v6506_v11 = vld [vmem:[#allocation7 + $0xa8] sm:$0xff]   ;;  %v6507_v12 = vld [vmem:[#allocation7 + $0x60] sm:$0xff]   ;;  %v6511_v16 = vld [vmem:[#allocation7 + $0x58] sm:$0xff]  }
 0x130   :  { %6103 = vmatprep.subr.bf16.mxu1 %v6501_v6  ;;  %v6508_v13 = vld [vmem:[#allocation7 + $0x20] sm:$0xff]   ;;  %v6512_v17 = vld [vmem:[#allocation7 + $0x18] sm:$0xff]   ;;  %v6515_v20 = vld [vmem:[#allocation7 + $0x50] sm:$0xff]  }
 0x131   :  { %6082 = vmatpush3.bf16.msra.mxu0 %v6500_v5  ;;  %v6509_v14 = vld [vmem:[#allocation7 + $0xe0] sm:$0xff]   ;;  %v6513_v18 = vld [vmem:[#allocation7 + $0xd8] sm:$0xff]   ;;  %v6516_v21 = vld [vmem:[#allocation7 + $0x10] sm:$0xff]  }
 0x132   :  { %6083 = vmatprep.subr.bf16.mxu0 %v6503_v8  ;;  %v6510_v15 = vld [vmem:[#allocation7 + $0xa0] sm:$0xff]   ;;  %v6514_v19 = vld [vmem:[#allocation7 + $0x98] sm:$0xff]   ;;  %v6517_v22 = vld [vmem:[#allocation7 + $0xd0] sm:$0xff]  }
 0x133   :  { %6104 = vmatpush3.bf16.msra.mxu1 %v6502_v7  ;;  %v6518_v23 = vld [vmem:[#allocation7 + $0x90] sm:$0xff]   ;;  %v6519_v24 = vld [vmem:[#allocation7 + $0x48] sm:$0xff]   ;;  %v6523_v28 = vld [vmem:[#allocation7 + $0x40] sm:$0xff]  }
 0x134   :  { %6105 = vmatprep.subr.bf16.mxu1 %v6505_v10  ;;  %v6520_v25 = vld [vmem:[#allocation7 + $0x8] sm:$0xff]   ;;  %v6524_v29 = vld [vmem:[#allocation7] sm:$0xff]   ;;  %v378_v36 = vld [vmem:[#allocation2 + $0x38] sm:$0xff] }
 0x135   :  { %6084 = vmatpush3.bf16.msra.mxu0 %v6504_v9  ;;  %v6521_v26 = vld [vmem:[#allocation7 + $0xc8] sm:$0xff]   ;;  %v6525_v30 = vld [vmem:[#allocation7 + $0xc0] sm:$0xff]   ;;  %v6527_v38 = vld [vmem:[#allocation7 + $0x178] sm:$0xff]  }
 0x136   :  { %6085 = vmatprep.subr.bf16.mxu0 %v6507_v12  ;;  %v6522_v27 = vld [vmem:[#allocation7 + $0x88] sm:$0xff]   ;;  %v379_v32 = vld [vmem:[#allocation2 + $0x40] sm:$0xff]  ;;  %v374_v39 = vld [vmem:[#allocation2 + $0x18] sm:$0xff] }
 0x137   :  { %6106 = vmatpush3.bf16.msra.mxu1 %v6506_v11  ;;  %v372_v31 = vld [vmem:[#allocation2 + $0x8] sm:$0xff]  ;;  %v6526_v34 = vld [vmem:[#allocation7 + $0x80] sm:$0xff]   ;;  %v381_v40 = vld [vmem:[#allocation2 + $0x50] sm:$0xff] }
 0x138   :  { %6107 = vmatprep.subr.bf16.mxu1 %v6509_v14  ;;  %v386_v33 = vpack.c.bf16 %v379_v32, %v372_v31  ;;  %v371_v35 = vld [vmem:[#allocation2] sm:$0xff]  ;;  %v388_v41 = vpack.c.bf16 %v381_v40, %v374_v39  ;;  %v6528_v42 = vld [vmem:[#allocation7 + $0x138] sm:$0xff]   ;;  %v373_v44 = vld [vmem:[#allocation2 + $0x10] sm:$0xff] }
 0x139   :  { %6086 = vmatpush3.bf16.msra.mxu0 %v6508_v13  ;;  %v385_v37 = vpack.c.bf16 %v378_v36, %v371_v35  ;;  %v380_v45 = vld [vmem:[#allocation2 + $0x48] sm:$0xff]  ;;  %v6529_v47 = vld [vmem:[#allocation7 + $0x170] sm:$0xff]   ;;  %v6533_v51 = vld [vmem:[#allocation7 + $0x160] sm:$0xff]  }
 0x13a   :  { %6087 = vmatprep.subr.bf16.mxu0 %v6511_v16  ;;  %827 = vmatprep.mubr.bf16.mxu0 %v386_v33  ;;  %v387_v46 = vpack.c.bf16 %v380_v45, %v373_v44  ;;  %v6530_v48 = vld [vmem:[#allocation7 + $0x130] sm:$0xff]   ;;  %v6531_v49 = vld [vmem:[#allocation7 + $0x168] sm:$0xff]   ;;  %v6534_v52 = vld [vmem:[#allocation7 + $0x120] sm:$0xff]  }
 0x13b   :  { %6108 = vmatpush3.bf16.msra.mxu1 %v6510_v15  ;;  %868 = vmatprep.mubr.bf16.mxu1 %v388_v41  ;;  %v6532_v50 = vld [vmem:[#allocation7 + $0x128] sm:$0xff]   ;;  %v6535_v53 = vld [vmem:[#allocation7 + $0x158] sm:$0xff]   ;;  %v6537_v55 = vld [vmem:[#allocation7 + $0x150] sm:$0xff]  }
 0x13c   :  { %6109 = vmatprep.subr.bf16.mxu1 %v6513_v18  ;;  %v6536_v54 = vld [vmem:[#allocation7 + $0x118] sm:$0xff]   ;;  %v6543_v56 = vld [vmem:[#allocation7 + $0x180] sm:$0xff]   ;;  %v376_v57 = vld [vmem:[#allocation2 + $0x28] sm:$0xff] }
 0x13d   :  { %6088 = vmatpush3.bf16.msra.mxu0 %v6512_v17  ;;  %v6538_v58 = vld [vmem:[#allocation7 + $0x110] sm:$0xff]   ;;  %v6539_v59 = vld [vmem:[#allocation7 + $0x148] sm:$0xff]   ;;  %v383_v60 = vld [vmem:[#allocation2 + $0x60] sm:$0xff] }
 0x13e   :  { %6089 = vmatprep.subr.bf16.mxu0 %v6515_v20  ;;  %v390_v61 = vpack.c.bf16 %v383_v60, %v376_v57  ;;  %v377_v62 = vld [vmem:[#allocation2 + $0x30] sm:$0xff]  ;;  %v384_v63 = vld [vmem:[#allocation2 + $0x68] sm:$0xff]  ;;  %v6541_v2 = vld [vmem:[#allocation7 + $0x140] sm:$0xff]  }
 0x13f   :  { %6110 = vmatpush3.bf16.msra.mxu1 %v6514_v19  ;;  %v391_v0 = vpack.c.bf16 %v384_v63, %v377_v62  ;;  %v6540_v1 = vld [vmem:[#allocation7 + $0x108] sm:$0xff]   ;;  %v6542_v3 = vld [vmem:[#allocation7 + $0x100] sm:$0xff]   ;;  %v382_v5 = vld [vmem:[#allocation2 + $0x58] sm:$0xff] }
 0x140   :  { %6111 = vmatprep.subr.bf16.mxu1 %v6517_v22  ;;  %v375_v4 = vld [vmem:[#allocation2 + $0x20] sm:$0xff]  ;;  %v6546_v9 = vld [vmem:[#allocation10 + $0x28] sm:$0xff]   ;;  %v6547_v10 = vld [vmem:[#allocation10 + $0x20] sm:$0xff]  }
 0x141   :  { %6090 = vmatpush3.bf16.msra.mxu0 %v6516_v21  ;;  %v389_v6 = vpack.c.bf16 %v382_v5, %v375_v4  ;;  %v6544_v7 = vld [vmem:[#allocation10 + $0x38] sm:$0xff]   ;;  %v6545_v8 = vld [vmem:[#allocation10 + $0x30] sm:$0xff]   ;;  %v6550_v13 = vld [vmem:[#allocation10 + $0x8] sm:$0xff]  }
 0x142   :  { %6091 = vmatprep.subr.bf16.mxu0 %v6519_v24  ;;  %v6548_v11 = vld [vmem:[#allocation10 + $0x18] sm:$0xff]   ;;  %v6549_v12 = vld [vmem:[#allocation10 + $0x10] sm:$0xff]   ;;  %v6551_v14 = vld [vmem:[#allocation10] sm:$0xff]  }
 0x143   :  { %6112 = vmatpush3.bf16.msra.mxu1 %v6518_v23  ;;  %v6552_v15 = vld [vmem:[#allocation13 + $0x38] sm:$0xff]   ;;  %v6553_v16 = vld [vmem:[#allocation13 + $0x30] sm:$0xff]   ;;  %v6554_v17 = vld [vmem:[#allocation13 + $0x28] sm:$0xff]  }
 0x144   :  { %6113 = vmatprep.subr.bf16.mxu1 %v6521_v26  ;;  %v6555_v18 = vld [vmem:[#allocation13 + $0x20] sm:$0xff]   ;;  %v6556_v19 = vld [vmem:[#allocation13 + $0x18] sm:$0xff]   ;;  %v6562_v60 = vld [vmem:[#allocation16 + $0x28] sm:$0xff]  }
 0x145   :  { %6092 = vmatpush3.bf16.msra.mxu0 %v6520_v25  ;;  %v5546_v32 = vld [vmem:[#allocation8] ss:$0 sm:$0xff]  ;;  %v6559_v57 = vld [vmem:[#allocation13] sm:$0xff]   ;;  %v5597_v63 = vld [vmem:[#allocation11] ss:$0 sm:$0xff] }
 0x146   :  { %6093 = vmatprep.subr.bf16.mxu0 %v6523_v28  ;;  %v6564_v62 = vld [vmem:[#allocation16 + $0x18] sm:$0xff]  }
 0x147   :  { %6114 = vmatpush3.bf16.msra.mxu1 %v6522_v27 }
 0x148   :  { %6115 = vmatprep.subr.bf16.mxu1 %v6525_v30 }
 0x149   :  { %6094 = vmatpush3.bf16.msra.mxu0 %v6524_v29 }
 0x14a   :  { %6123 = vmatprep.subr.bf16.mxu0 %v6527_v38 }
 0x14b   :  { %6116 = vmatpush3.bf16.msra.mxu1 %v6526_v34 }
 0x14c   :  { %6287 = vmatprep.subr.bf16.mxu1 %v7785_v43  ;;  %828 = vmatmul.mubr.bf16.vlgmr.msra.gmra.mxu0 %v385_v37 }
 0x14d   :  { %6124 = vmatpush3.bf16.msra.mxu0 %v6528_v42  ;;  %909 = vmatprep.mubr.bf16.mxu0 %v390_v61  ;;  %v6563_v61 = vld [vmem:[#allocation16 + $0x20] sm:$0xff]  }
 0x14e   :  { %869 = vmatmul.mubr.bf16.vlgmr.msra.gmra.mxu1 %v387_v46  ;;  %6125 = vmatprep.subr.bf16.mxu0 %v6529_v47 }
 0x14f   :  { %6289 = vmatprep.mubr.msk.bf16.mxu1 %vm7786_vm0, %v7785_v43  ;;  %6288 = vmatpush3.bf16.msra.mxu1 %v6543_v56  ;;  %v6558_v56 = vld [vmem:[#allocation13 + $0x8] sm:$0xff]  }
 0x150   :  { %6293 = vmatprep.subr.bf16.mxu1 %v7785_v43 }
 0x151   :  { %6126 = vmatpush3.bf16.msra.mxu0 %v6530_v48 }
 0x152   :  { %6127 = vmatprep.subr.bf16.mxu0 %v6531_v49 }
 0x155   :  { %6128 = vmatpush3.bf16.msra.mxu0 %v6532_v50 }
 0x156   :  { %6129 = vmatprep.subr.bf16.mxu0 %v6533_v51  ;;  %6290 = vmatmul.mubr.msk.bf16.vlgmr.msra.gmra.mxu1 %vm791_vm1, %v391_v0 }
 0x157   :  { %6309 = vmatprep.mubr.msk.bf16.mxu1 %vm7786_vm0, %v7785_v43  ;;  %6294 = vmatpush3.bf16.msra.mxu1 %v6544_v7 }
 0x158   :  { %6295 = vmatprep.subr.bf16.mxu1 %v7785_v43 }
 0x159   :  { %6130 = vmatpush3.bf16.msra.mxu0 %v6534_v52 }
 0x15a   :  { %6131 = vmatprep.subr.bf16.mxu0 %v6535_v53 }
 0x15b   :  { %6296 = vmatpush3.bf16.msra.mxu1 %v6545_v8 }
 0x15c   :  { %6297 = vmatprep.subr.bf16.mxu1 %v7785_v43 }
 0x15d   :  { %6132 = vmatpush3.bf16.msra.mxu0 %v6536_v54 }
 0x15e   :  { %6133 = vmatprep.subr.bf16.mxu0 %v6537_v55  ;;  %v6557_v55 = vld [vmem:[#allocation13 + $0x10] sm:$0xff]  }
 0x15f   :  { %6298 = vmatpush3.bf16.msra.mxu1 %v6546_v9  ;;  %v6565_v9 = vld [vmem:[#allocation16 + $0x10] sm:$0xff]  }
 0x160   :  { %6299 = vmatprep.subr.bf16.mxu1 %v7785_v43 }
 0x161   :  { %6134 = vmatpush3.bf16.msra.mxu0 %v6538_v58  ;;  %v6560_v58 = vld [vmem:[#allocation16 + $0x38] sm:$0xff]  }
 0x162   :  { %6135 = vmatprep.subr.bf16.mxu0 %v6539_v59  ;;  %v6561_v59 = vld [vmem:[#allocation16 + $0x30] sm:$0xff]  }
 0x163   :  { %6300 = vmatpush3.bf16.msra.mxu1 %v6547_v10  ;;  %v6566_v10 = vld [vmem:[#allocation16 + $0x8] sm:$0xff]  }
 0x164   :  { %6301 = vmatprep.subr.bf16.mxu1 %v7785_v43 }
 0x165   :  { %6136 = vmatpush3.bf16.msra.mxu0 %v6540_v1 }
 0x166   :  { %6137 = vmatprep.subr.bf16.mxu0 %v6541_v2 }
 0x167   :  { %6302 = vmatpush3.bf16.msra.mxu1 %v6548_v11  ;;  %v6567_v11 = vld [vmem:[#allocation16] sm:$0xff]  }
 0x168   :  { %6303 = vmatprep.subr.bf16.mxu1 %v7785_v43 }
 0x169   :  { %6138 = vmatpush3.bf16.msra.mxu0 %v6542_v3 }
 0x16a   :  { %6313 = vmatprep.subr.bf16.mxu0 %v7785_v43 }
 0x16b   :  { %6304 = vmatpush3.bf16.msra.mxu1 %v6549_v12  ;;  %v6568_v12 = vld [vmem:[#allocation19 + $0x70] ss:$8 sps:$4 sm:$0xff]  }
 0x16c   :  { %910 = vmatmul.mubr.bf16.vlgmr.msra.gmra.mxu0 %v389_v6  ;;  %6305 = vmatprep.subr.bf16.mxu1 %v7785_v43 }
 0x16d   :  { %6329 = vmatprep.mubr.msk.bf16.mxu0 %vm7786_vm0, %v7785_v43  ;;  %6314 = vmatpush3.bf16.msra.mxu0 %v6552_v15  ;;  %v6571_v15 = vld [vmem:[#allocation19 + $0x60] ss:$8 sps:$4 sm:$0xff]  }
 0x16e   :  { %6315 = vmatprep.subr.bf16.mxu0 %v7785_v43 }
 0x16f   :  { %6306 = vmatpush3.bf16.msra.mxu1 %v6550_v13  ;;  %v6570_v13 = vld [vmem:[#allocation19 + $0x74] ss:$8 sps:$4 sm:$0xff]  }
 0x170   :  { %6307 = vmatprep.subr.bf16.mxu1 %v7785_v43 }
 0x171   :  { %6316 = vmatpush3.bf16.msra.mxu0 %v6553_v16  ;;  %v6576_v16 = vld [vmem:[#allocation19 + $0x54] ss:$8 sps:$4 sm:$0xff]  }
 0x172   :  { %6317 = vmatprep.subr.bf16.mxu0 %v7785_v43 }
 0x173   :  { %6308 = vmatpush3.bf16.msra.mxu1 %v6551_v14  ;;  %v6573_v14 = vld [vmem:[#allocation19 + $0x64] ss:$8 sps:$4 sm:$0xff]  }
 0x174   :  { %6333 = vmatprep.subr.bf16.mxu1 %v7785_v43 }
 0x175   :  { %6318 = vmatpush3.bf16.msra.mxu0 %v6554_v17  ;;  %v6574_v17 = vld [vmem:[#allocation19 + $0x50] ss:$8 sps:$4 sm:$0xff]  }
 0x176   :  { %6319 = vmatprep.subr.bf16.mxu0 %v7785_v43 }
 0x179   :  { %6320 = vmatpush3.bf16.msra.mxu0 %v6555_v18  ;;  %v6579_v18 = vld [vmem:[#allocation19 + $0x44] ss:$8 sps:$4 sm:$0xff]  }
 0x17a   :  { %6321 = vmatprep.subr.bf16.mxu0 %v7785_v43 }
 0x17d   :  { %6322 = vmatpush3.bf16.msra.mxu0 %v6556_v19  ;;  %v6577_v19 = vld [vmem:[#allocation19 + $0x40] ss:$8 sps:$4 sm:$0xff]  }
 0x17e   :  { %6323 = vmatprep.subr.bf16.mxu0 %v7785_v43 }
 0x181   :  { %6324 = vmatpush3.bf16.msra.mxu0 %v6557_v55  ;;  %v6597_v55 = vld [vmem:[#allocation22 + $0x10] sm:$0xff]  }
 0x182   :  { %6325 = vmatprep.subr.bf16.mxu0 %v7785_v43 }
 0x185   :  { %6326 = vmatpush3.bf16.msra.mxu0 %v6558_v56  ;;  %v6598_v56 = vld [vmem:[#allocation22 + $0x8] sm:$0xff]  }
 0x186   :  { %6327 = vmatprep.subr.bf16.mxu0 %v7785_v43 }
 0x189   :  { %6328 = vmatpush3.bf16.msra.mxu0 %v6559_v57  ;;  %v6599_v57 = vld [vmem:[#allocation22] sm:$0xff]  }
 0x18a   :  { %1415 = vmatprep.subr.bf16.mxu0 %v6570_v13 }
 0x20c   :  { %v6095_v23 = vpop.f32.mrf.mxu0 }
 0x20e   :  { %v6117_v20 = vpop.f32.mrf.mxu1  ;;  %v6096_v25 = vpop.f32.mrf.mxu0 }
 0x20f   :  { %v6097_v31 = vadd.f32 %v6096_v25, %v6095_v23  ;;  %v6583_v23 = vld [vmem:[#allocation19 + $0x20] ss:$8 sps:$4 sm:$0xff]  }
 0x210   :  { %v6118_v21 = vpop.f32.mrf.mxu1  ;;  %v6098_v28 = vpop.f32.mrf.mxu0 }
 0x211   :  { %v830_v34 = vadd.f32 %v6097_v31, %v5546_v32  ;;  %v6119_v35 = vadd.f32 %v6118_v21, %v6117_v20  ;;  %v6582_v20 = vld [vmem:[#allocation19 + $0x34] ss:$8 sps:$4 sm:$0xff]   ;;  %v6580_v21 = vld [vmem:[#allocation19 + $0x30] ss:$8 sps:$4 sm:$0xff]  }
 0x212   :  { %v6120_v22 = vpop.f32.mrf.mxu1  ;;  %v6099_v33 = vpop.f32.mrf.mxu0 }
 0x213   :  { %v6100_v36 = vadd.f32 %v6099_v33, %v6098_v28  ;;  %v871_v39 = vadd.f32 %v6119_v35, %v830_v34  ;;  %v6588_v34 = vld [vmem:[#allocation19 + $0x14] ss:$8 sps:$4 sm:$0xff]   ;;  %v6586_v35 = vld [vmem:[#allocation19 + $0x10] ss:$8 sps:$4 sm:$0xff]  }
 0x214   :  { %v6121_v24 = vpop.f32.mrf.mxu1 }
 0x215   :  { %v833_v40 = vadd.f32 %v6100_v36, %v5546_v32  ;;  %v6122_v41 = vadd.f32 %v6121_v24, %v6120_v22  ;;  %v6585_v22 = vld [vmem:[#allocation19 + $0x24] ss:$8 sps:$4 sm:$0xff]   ;;  %v5606_v24 = vld [vmem:[#allocation14] ss:$0 sm:$0xff] }
 0x216   :  { %v952_v26 = vpop.f32.mrf.mxu1  ;;  %v6591_v36 = vld [vmem:[#allocation19 + $0x4] ss:$8 sps:$4 sm:$0xff]  }
 0x217   :  { %v874_v47 = vadd.f32 %v6122_v41, %v833_v40 }
 0x218   :  { %v6291_v27 = vpop.f32.mrf.mxu1 }
 0x21a   :  { %v955_v29 = vpop.f32.mrf.mxu1 }
 0x21c   :  { %v6292_v30 = vpop.f32.mrf.mxu1 }
 0x22c   :  { %v6139_v37 = vpop.f32.mrf.mxu0 }
 0x22e   :  { %v6140_v38 = vpop.f32.mrf.mxu0 }
 0x22f   :  { %v6141_v42 = vadd.f32 %v6140_v38, %v6139_v37  ;;  %v6589_v37 = vld [vmem:[#allocation19] ss:$8 sps:$4 sm:$0xff]   ;;  %v7787_v38 = vmov 0  }
 0x230   :  { %v6142_v44 = vpop.f32.mrf.mxu0 }
 0x231   :  { %v912_v45 = vadd.f32 %v6141_v42, %v871_v39  ;;  %v5615_v39 = vld [vmem:[#allocation17] ss:$0 sm:$0xff] }
 0x232   :  { %v6143_v46 = vpop.f32.mrf.mxu0 }
 0x233   :  { %v6144_v48 = vadd.f32 %v6143_v46, %v6142_v44  ;;  %v953_v49 = vadd.f32 %v952_v26, %v912_v45 }
 0x235   :  { %v915_v50 = vadd.f32 %v6144_v48, %v874_v47  ;;  %v959_v52 = vmax.f32 %v953_v49, 0.0 }
 0x237   :  { %v956_v51 = vadd.f32 %v955_v29, %v915_v50  ;;  %v6592_v50 = vld [vmem:[#allocation22 + $0x38] sm:$0xff]  }
 0x239   :  { %v960_v53 = vmax.f32 %v956_v51, 0.0  ;;  %v6593_v51 = vld [vmem:[#allocation22 + $0x30] sm:$0xff]  }
 0x23b   :  { %v961_v54 = vpack.c.bf16 %v960_v53, %v959_v52  ;;  %v6594_v52 = vld [vmem:[#allocation22 + $0x28] sm:$0xff]   ;;  %v6595_v53 = vld [vmem:[#allocation22 + $0x20] sm:$0xff]  }
 0x23d   :  { %6310 = vmatmul.mubr.bf16.vlgmr.msra.gmra.mxu1 %v961_v54  ;;  %v6596_v54 = vld [vmem:[#allocation22 + $0x18] sm:$0xff]  }
 0x23e   :  { %6349 = vmatprep.mubr.msk.bf16.mxu1 %vm7786_vm0, %v7785_v43  ;;  %6334 = vmatpush3.bf16.msra.mxu1 %v6560_v58  ;;  %v6600_v58 = vld [vmem:[#allocation25 + $0x38] sm:$0xff]  }
 0x23f   :  { %6335 = vmatprep.subr.bf16.mxu1 %v7785_v43 }
 0x242   :  { %6336 = vmatpush3.bf16.msra.mxu1 %v6561_v59  ;;  %v6601_v59 = vld [vmem:[#allocation25 + $0x30] sm:$0xff]  }
 0x243   :  { %6337 = vmatprep.subr.bf16.mxu1 %v7785_v43 }
 0x246   :  { %6338 = vmatpush3.bf16.msra.mxu1 %v6562_v60  ;;  %v6602_v60 = vld [vmem:[#allocation25 + $0x28] sm:$0xff]  }
 0x247   :  { %6339 = vmatprep.subr.bf16.mxu1 %v7785_v43 }
 0x24a   :  { %6340 = vmatpush3.bf16.msra.mxu1 %v6563_v61  ;;  %v6603_v61 = vld [vmem:[#allocation25 + $0x20] sm:$0xff]  }
 0x24b   :  { %6341 = vmatprep.subr.bf16.mxu1 %v7785_v43 }
 0x24e   :  { %6342 = vmatpush3.bf16.msra.mxu1 %v6564_v62  ;;  %v6604_v62 = vld [vmem:[#allocation25 + $0x18] sm:$0xff]  }
 0x24f   :  { %6343 = vmatprep.subr.bf16.mxu1 %v7785_v43 }
 0x252   :  { %6344 = vmatpush3.bf16.msra.mxu1 %v6565_v9 }
 0x253   :  { %6345 = vmatprep.subr.bf16.mxu1 %v7785_v43 }
 0x256   :  { %6346 = vmatpush3.bf16.msra.mxu1 %v6566_v10 }
 0x257   :  { %6347 = vmatprep.subr.bf16.mxu1 %v7785_v43 }
 0x25a   :  { %6348 = vmatpush3.bf16.msra.mxu1 %v6567_v11 }
 0x25b   :  { %6353 = vmatprep.subr.bf16.mxu1 %v7785_v43 }
 0x2fd   :  { %v1067_v0 = vpop.f32.mrf.mxu1 }
 0x2fe   :  { %v1068_v2 = vadd.f32 %v5597_v63, %v1067_v0 }
 0x2ff   :  { %v6311_v1 = vpop.f32.mrf.mxu1 }
 0x300   :  { %v1074_v6 = vmax.f32 %v1068_v2, 0.0  ;;  %v1323_v2 = vld [vmem:[#allocation20] sm:$0x3] }
 0x301   :  { %v1070_v3 = vpop.f32.mrf.mxu1 }
 0x302   :  { %v1071_v4 = vadd.f32 %v5597_v63, %v1070_v3  ;;  %v1325_v63 = vlaneseq }
 0x303   :  { %v6312_v5 = vpop.f32.mrf.mxu1 }
 0x304   :  { %v1075_v7 = vmax.f32 %v1071_v4, 0.0  ;;  %v8076_v0 = vshrl.u32 %v1325_v63, 7  ;;  %v6617_v63 = vld [vmem:[#allocation31 + $0x30] sm:$0xff]  }
 0x306   :  { %v1076_v8 = vpack.c.bf16 %v1075_v7, %v1074_v6  ;;  %v8079_v1 = vsub.s32 1, %v8076_v0  ;;  %vm1473_vm2 = vcmp.lt.s32.totalorder %v8076_v0, 2 }
 0x308   :  { %6330 = vmatmul.mubr.bf16.vlgmr.msra.gmra.mxu0 %v1076_v8  ;;  %v1332_v3 = vrot.slane %v1323_v2, %v8079_v1 }
 0x309   :  { %1416 = vmatpush1.bf16.msra.mxu0 %v6568_v12  ;;  %1447 = vmatprep.mubr.bf16.mxu0 %v7787_v38 }
 0x30a   :  { %1417 = vmatprep.subr.bf16.mxu0 %v6573_v14  ;;  %v8083_v14 = vsub.s32 0, %v8076_v0 }
 0x30d   :  { %1418 = vmatpush1.bf16.msra.mxu0 %v6571_v15  ;;  %v1328_v15 = vrot.slane %v1323_v2, %v8083_v14  ;;  %v6618_v2 = vld [vmem:[#allocation31 + $0x28] sm:$0xff]  }
 0x30e   :  { %1419 = vmatprep.subr.bf16.mxu0 %v6576_v16 }
 0x311   :  { %1420 = vmatpush1.bf16.msra.mxu0 %v6574_v17 }
 0x312   :  { %1421 = vmatprep.subr.bf16.mxu0 %v6579_v18  ;;  %v1497_v18 = vld [vmem:[#allocation5] sm:$0xff] }
 0x315   :  { %1422 = vmatpush1.bf16.msra.mxu0 %v6577_v19 }
 0x316   :  { %1423 = vmatprep.subr.bf16.mxu0 %v6582_v20  ;;  %v1498_v20 = vld [vmem:[#allocation5 + $0x8] sm:$0xff] }
 0x319   :  { %1424 = vmatpush1.bf16.msra.mxu0 %v6580_v21 }
 0x31a   :  { %1425 = vmatprep.subr.bf16.mxu0 %v6585_v22 }
 0x31d   :  { %1426 = vmatpush1.bf16.msra.mxu0 %v6583_v23 }
 0x31e   :  { %1427 = vmatprep.subr.bf16.mxu0 %v6588_v34 }
 0x321   :  { %1428 = vmatpush1.bf16.msra.mxu0 %v6586_v35 }
 0x322   :  { %1429 = vmatprep.subr.bf16.mxu0 %v6591_v36 }
 0x325   :  { %1430 = vmatpush1.bf16.msra.mxu0 %v6589_v37 }
 0x326   :  { %6373 = vmatprep.subr.bf16.mxu0 %v7785_v43 }
 0x3c8   :  { %v1182_v25 = vpop.f32.mrf.mxu0 }
 0x3c9   :  { %v1183_v27 = vadd.f32 %v5606_v24, %v1182_v25 }
 0x3ca   :  { %v6331_v26 = vpop.f32.mrf.mxu0 }
 0x3cb   :  { %v1189_v31 = vmax.f32 %v1183_v27, 0.0 }
 0x3cc   :  { %v1185_v28 = vpop.f32.mrf.mxu0 }
 0x3cd   :  { %v1186_v29 = vadd.f32 %v5606_v24, %v1185_v28 }
 0x3ce   :  { %v6332_v30 = vpop.f32.mrf.mxu0 }
 0x3cf   :  { %v1190_v32 = vmax.f32 %v1186_v29, 0.0 }
 0x3d1   :  { %v1191_v33 = vpack.c.bf16 %v1190_v32, %v1189_v31 }
 0x3d3   :  { %6350 = vmatmul.mubr.bf16.vlgmr.msra.gmra.mxu1 %v1191_v33 }
 0x3d4   :  { %6369 = vmatprep.mubr.msk.bf16.mxu1 %vm7786_vm0, %v7785_v43  ;;  %6354 = vmatpush3.bf16.msra.mxu1 %v6592_v50 }
 0x3d5   :  { %6355 = vmatprep.subr.bf16.mxu1 %v7785_v43 }
 0x3d8   :  { %6356 = vmatpush3.bf16.msra.mxu1 %v6593_v51 }
 0x3d9   :  { %6357 = vmatprep.subr.bf16.mxu1 %v7785_v43 }
 0x3dc   :  { %6358 = vmatpush3.bf16.msra.mxu1 %v6594_v52 }
 0x3dd   :  { %6359 = vmatprep.subr.bf16.mxu1 %v7785_v43 }
 0x3e0   :  { %6360 = vmatpush3.bf16.msra.mxu1 %v6595_v53 }
 0x3e1   :  { %6361 = vmatprep.subr.bf16.mxu1 %v7785_v43 }
 0x3e4   :  { %6362 = vmatpush3.bf16.msra.mxu1 %v6596_v54 }
 0x3e5   :  { %6363 = vmatprep.subr.bf16.mxu1 %v7785_v43 }
 0x3e8   :  { %6364 = vmatpush3.bf16.msra.mxu1 %v6597_v55 }
 0x3e9   :  { %6365 = vmatprep.subr.bf16.mxu1 %v7785_v43 }
 0x3ec   :  { %6366 = vmatpush3.bf16.msra.mxu1 %v6598_v56 }
 0x3ed   :  { %6367 = vmatprep.subr.bf16.mxu1 %v7785_v43 }
 0x3f0   :  { %6368 = vmatpush3.bf16.msra.mxu1 %v6599_v57 }
 0x3f1   :  { %6393 = vmatprep.subr.bf16.mxu1 %v7785_v43 }
 0x493   :  { %v1297_v40 = vpop.f32.mrf.mxu1 }
 0x494   :  { %v1298_v42 = vadd.f32 %v5615_v39, %v1297_v40  ;;  %v6605_v40 = vld [vmem:[#allocation25 + $0x10] sm:$0xff]  }
 0x495   :  { %v6351_v41 = vpop.f32.mrf.mxu1 }
 0x496   :  { %v1304_v47 = vmax.f32 %v1298_v42, 0.0  ;;  %v6606_v41 = vld [vmem:[#allocation25 + $0x8] sm:$0xff]   ;;  %v6607_v42 = vld [vmem:[#allocation25] sm:$0xff]  }
 0x497   :  { %v1300_v44 = vpop.f32.mrf.mxu1 }
 0x498   :  { %v1301_v45 = vadd.f32 %v5615_v39, %v1300_v44  ;;  %v6608_v44 = vld [vmem:[#allocation28 + $0x38] sm:$0xff]  }
 0x499   :  { %v6352_v46 = vpop.f32.mrf.mxu1 }
 0x49a   :  { %v1305_v48 = vmax.f32 %v1301_v45, 0.0  ;;  %v6609_v45 = vld [vmem:[#allocation28 + $0x30] sm:$0xff]   ;;  %v6610_v46 = vld [vmem:[#allocation28 + $0x28] sm:$0xff]  }
 0x49c   :  { %v1306_v49 = vpack.c.bf16 %v1305_v48, %v1304_v47  ;;  %v6611_v47 = vld [vmem:[#allocation28 + $0x20] sm:$0xff]   ;;  %v6612_v48 = vld [vmem:[#allocation28 + $0x18] sm:$0xff]  }
 0x49e   :  { %1448 = vmatmul.mubr.bf16.vlgmr.msra.gmra.mxu0 %v1306_v49  ;;  %v5640_v49 = vld [vmem:[#allocation23] ss:$0 sm:$0xff] }
 0x49f   :  { %6389 = vmatprep.mubr.msk.bf16.mxu0 %vm7786_vm0, %v7785_v43  ;;  %6374 = vmatpush3.bf16.msra.mxu0 %v6600_v58 }
 0x4a0   :  { %6375 = vmatprep.subr.bf16.mxu0 %v7785_v43 }
 0x4a3   :  { %6376 = vmatpush3.bf16.msra.mxu0 %v6601_v59  ;;  %v6613_v59 = vld [vmem:[#allocation28 + $0x10] sm:$0xff]  }
 0x4a4   :  { %6377 = vmatprep.subr.bf16.mxu0 %v7785_v43 }
 0x4a7   :  { %6378 = vmatpush3.bf16.msra.mxu0 %v6602_v60  ;;  %v6614_v60 = vld [vmem:[#allocation28 + $0x8] sm:$0xff]  }
 0x4a8   :  { %6379 = vmatprep.subr.bf16.mxu0 %v7785_v43 }
 0x4ab   :  { %6380 = vmatpush3.bf16.msra.mxu0 %v6603_v61  ;;  %v6615_v61 = vld [vmem:[#allocation28] sm:$0xff]  }
 0x4ac   :  { %6381 = vmatprep.subr.bf16.mxu0 %v7785_v43 }
 0x4af   :  { %6382 = vmatpush3.bf16.msra.mxu0 %v6604_v62  ;;  %v6616_v62 = vld [vmem:[#allocation31 + $0x38] sm:$0xff]  }
 0x4b0   :  { %6383 = vmatprep.subr.bf16.mxu0 %v7785_v43 }
 0x4b3   :  { %6384 = vmatpush3.bf16.msra.mxu0 %v6605_v40 }
 0x4b4   :  { %6385 = vmatprep.subr.bf16.mxu0 %v7785_v43 }
 0x4b7   :  { %6386 = vmatpush3.bf16.msra.mxu0 %v6606_v41 }
 0x4b8   :  { %6387 = vmatprep.subr.bf16.mxu0 %v7785_v43 }
 0x4bb   :  { %6388 = vmatpush3.bf16.msra.mxu0 %v6607_v42  ;;  %v6627_v42 = vld [vmem:[%s8431_s20 + $0x190] ss:$28 sps:$4 sm:$0xff]  }
 0x4bc   :  { %6413 = vmatprep.subr.bf16.mxu0 %v7785_v43 }
 0x55e   :  { %v1449_v4 = vpop.f32.mrf.mxu0 }
 0x55f   :  { %v1450_v16 = vadd.f32 %v1449_v4, %v1328_v15  ;;  %v6620_v4 = vld [vmem:[#allocation31 + $0x18] sm:$0xff]  }
 0x560   :  { %v1451_v5 = vpop.f32.mrf.mxu0 }
 0x561   :  { %v1452_v6 = vadd.f32 %v1451_v5, %v1332_v3  ;;  %v1477_v21 = vmul.f32 %v1450_v16, %v1450_v16  ;;  %v5649_v5 = vld [vmem:[#allocation26] ss:$0 sm:$0xff] }
 0x562   :  { %v1453_v7 = vpop.f32.mrf.mxu0 }
 0x563   :  { %v1458_v8 = vmul.f32 0.5, %v1452_v6  ;;  %v1454_v26 = vadd.f32 %v1453_v7, %v1328_v15 }
 0x564   :  { %v1455_v9 = vpop.f32.mrf.mxu0 }
 0x565   :  { %v1460_v10 = vmul.f32 1.442695, %v1458_v8  ;;  %v1456_v11 = vadd.f32 %v1455_v9, %v1332_v3  ;;  %v6619_v3 = vld [vmem:[#allocation31 + $0x20] sm:$0xff]  }
 0x567   :  { %7194 = vpow2.f32 %v1460_v10  ;;  %v1459_v12 = vmul.f32 0.5, %v1456_v11 }
 0x569   :  { %v1462_v13 = vmul.f32 1.442695, %v1459_v12 }
 0x56b   :  { %7196 = vpow2.f32 %v1462_v13 }
 0x574   :  { %v7195_v17 = vpop.eup %7194 }
 0x575   :  { %v1464_v19 = vmul.f32 %v7195_v17, %v7195_v17  ;;  %v1499_v23 = vmul.f32 %v7195_v17, %v1497_v18  ;;  %v6622_v17 = vld [vmem:[#allocation31 + $0x8] sm:$0xff]   ;;  %v6623_v18 = vld [vmem:[#allocation31] sm:$0xff]  }
 0x577   :  { %v1475_v22 = vsub.f32 %v1452_v6, %v1464_v19  ;;  %v1501_v29 = vadd.f32 %v1499_v23, %v1450_v16  ;;  %v6621_v16 = vld [vmem:[#allocation31 + $0x10] sm:$0xff]  }
 0x578   :  { %v7197_v24 = vpop.eup %7196  ;;  %v6624_v19 = vld [vmem:[%s8431_s20 + $0x188] ss:$28 sps:$4 sm:$0xff]   ;;  %v6630_v23 = vld [vmem:[%s8431_s20 + $0x150] ss:$28 sps:$4 sm:$0xff]  }
 0x579   :  { %v1479_v25 = vsub.f32 %v1475_v22, %v1477_v21  ;;  %v1500_v27 = vmul.f32 %v7197_v24, %v1498_v20  ;;  %v6626_v20 = vld [vmem:[%s8431_s20 + $0x18c] ss:$28 sps:$4 sm:$0xff]   ;;  %v6629_v21 = vld [vmem:[%s8431_s20 + $0x194] ss:$28 sps:$4 sm:$0xff]   ;;  %v6638_v24 = vld [vmem:[%s8431_s20 + $0x11c] ss:$28 sps:$4 sm:$0xff]  }
 0x57a   :  { %v6632_v22 = vld [vmem:[%s8431_s20 + $0x154] ss:$28 sps:$4 sm:$0xff]  }
 0x57b   :  { %v1481_v28 = vadd.f32 1.0, %v1479_v25  ;;  %v1502_v30 = vadd.f32 %v1500_v27, %v1454_v26  ;;  %v6636_v25 = vld [vmem:[%s8431_s20 + $0x118] ss:$28 sps:$4 sm:$0xff]   ;;  %v6644_v26 = vld [vmem:[%s8431_s20 + $0xe4] ss:$28 sps:$4 sm:$0xff]  }
 0x57c   :  { %v6642_v27 = vld [vmem:[%s8431_s20 + $0xe0] ss:$28 sps:$4 sm:$0xff]  }
 0x57d   :  { %v1487_v31 = vsel %vm1473_vm2, %v1481_v28, 0.0  ;;  %v1503_v32 = vpack.c.bf16 %v1502_v30, %v1501_v29  ;;  %v6650_v28 = vld [vmem:[%s8431_s20 + $0xac] ss:$28 sps:$4 sm:$0xff]   ;;  %v6656_v30 = vld [vmem:[%s8431_s20 + $0x74] ss:$28 sps:$4 sm:$0xff]  }
 0x57e   :  { %v1490_v33 = vrot.slane %v1487_v31, 4  ;;  %v6648_v29 = vld [vmem:[%s8431_s20 + $0xa8] ss:$28 sps:$4 sm:$0xff]  }
 0x57f   :  { %6370 = vmatmul.mubr.bf16.vlgmr.msra.gmra.mxu1 %v1503_v32  ;;  %v5658_v32 = vld [vmem:[#allocation29] ss:$0 sm:$0xff] }
 0x580   :  { %6409 = vmatprep.mubr.msk.bf16.mxu1 %vm7786_vm0, %v7785_v43  ;;  %v1491_v34 = vadd.f32 %v1490_v33, %v1487_v31  ;;  %6394 = vmatpush3.bf16.msra.mxu1 %v6608_v44  ;;  %v6654_v31 = vld [vmem:[%s8431_s20 + $0x70] ss:$28 sps:$4 sm:$0xff]  }
 0x581   :  { %6395 = vmatprep.subr.bf16.mxu1 %v7785_v43 }
 0x582   :  { %v1492_v35 = vrot.slane %v1491_v34, 2 }
 0x584   :  { %v1493_v36 = vadd.f32 %v1492_v35, %v1491_v34  ;;  %6396 = vmatpush3.bf16.msra.mxu1 %v6609_v45  ;;  %v6635_v45 = vld [vmem:[%s8431_s20 + $0x15c] ss:$28 sps:$4 sm:$0xff]  }
 0x585   :  { %6397 = vmatprep.subr.bf16.mxu1 %v7785_v43 }
 0x586   :  { %v1494_v37 = vrot.slane %v1493_v36, 1 }
 0x588   :  { %v1495_v39 = vadd.f32 %v1494_v37, %v1493_v36  ;;  %6398 = vmatpush3.bf16.msra.mxu1 %v6610_v46  ;;  %v6633_v46 = vld [vmem:[%s8431_s20 + $0x158] ss:$28 sps:$4 sm:$0xff]  }
 0x589   :  { %6399 = vmatprep.subr.bf16.mxu1 %v7785_v43 }
 0x58a   :  { %1496 = vst [vmem:[#allocation39] sm:$0x1] %v1495_v39 }
 0x58c   :  { %6400 = vmatpush3.bf16.msra.mxu1 %v6611_v47  ;;  %v6641_v47 = vld [vmem:[%s8431_s20 + $0x124] ss:$28 sps:$4 sm:$0xff]  }
 0x58d   :  { %6401 = vmatprep.subr.bf16.mxu1 %v7785_v43 }
 0x590   :  { %6402 = vmatpush3.bf16.msra.mxu1 %v6612_v48  ;;  %v6639_v48 = vld [vmem:[%s8431_s20 + $0x120] ss:$28 sps:$4 sm:$0xff]  }
 0x591   :  { %6403 = vmatprep.subr.bf16.mxu1 %v7785_v43 }
 0x594   :  { %6404 = vmatpush3.bf16.msra.mxu1 %v6613_v59  ;;  %v6668_v59 = vld [vmem:[%s8431_s20 + $0x4] ss:$28 sps:$4 sm:$0xff]  }
 0x595   :  { %6405 = vmatprep.subr.bf16.mxu1 %v7785_v43 }
 0x598   :  { %6406 = vmatpush3.bf16.msra.mxu1 %v6614_v60  ;;  %v6671_v60 = vld [vmem:[%s8431_s20 + $0xc] ss:$28 sps:$4 sm:$0xff]  }
 0x599   :  { %6407 = vmatprep.subr.bf16.mxu1 %v7785_v43 }
 0x59c   :  { %6408 = vmatpush3.bf16.msra.mxu1 %v6615_v61  ;;  %v6666_v61 = vld [vmem:[%s8431_s20] ss:$28 sps:$4 sm:$0xff]  }
 0x59d   :  { %2353 = vmatprep.subr.bf16.mxu1 %v6626_v20  ;;  %v6683_v20 = vld [vmem:[%s8431_s20 + $0x130] ss:$28 sps:$4 sm:$0xff]  }
 0x63f   :  { %v1609_v50 = vpop.f32.mrf.mxu1 }
 0x640   :  { %v1610_v52 = vadd.f32 %v5640_v49, %v1609_v50  ;;  %v6645_v50 = vld [vmem:[%s8431_s20 + $0xe8] ss:$28 sps:$4 sm:$0xff]  }
 0x641   :  { %v6371_v51 = vpop.f32.mrf.mxu1 }
 0x642   :  { %v1616_v56 = vmax.f32 %v1610_v52, 0.0  ;;  %v6653_v51 = vld [vmem:[%s8431_s20 + $0xb4] ss:$28 sps:$4 sm:$0xff]  }
 0x643   :  { %v1612_v53 = vpop.f32.mrf.mxu1  ;;  %v6651_v52 = vld [vmem:[%s8431_s20 + $0xb0] ss:$28 sps:$4 sm:$0xff]  }
 0x644   :  { %v1613_v54 = vadd.f32 %v5640_v49, %v1612_v53  ;;  %v6647_v49 = vld [vmem:[%s8431_s20 + $0xec] ss:$28 sps:$4 sm:$0xff]   ;;  %v6659_v53 = vld [vmem:[%s8431_s20 + $0x7c] ss:$28 sps:$4 sm:$0xff]  }
 0x645   :  { %v6372_v55 = vpop.f32.mrf.mxu1 }
 0x646   :  { %v1617_v57 = vmax.f32 %v1613_v54, 0.0  ;;  %v6657_v54 = vld [vmem:[%s8431_s20 + $0x78] ss:$28 sps:$4 sm:$0xff]  }
 0x647   :  { %v6662_v55 = vld [vmem:[%s8431_s20 + $0x3c] ss:$28 sps:$4 sm:$0xff]  }
 0x648   :  { %v1618_v58 = vpack.c.bf16 %v1617_v57, %v1616_v56  ;;  %v6665_v56 = vld [vmem:[%s8431_s20 + $0x44] ss:$28 sps:$4 sm:$0xff]   ;;  %v6660_v57 = vld [vmem:[%s8431_s20 + $0x38] ss:$28 sps:$4 sm:$0xff]  }
 0x64a   :  { %6390 = vmatmul.mubr.bf16.vlgmr.msra.gmra.mxu0 %v1618_v58  ;;  %v6663_v58 = vld [vmem:[%s8431_s20 + $0x40] ss:$28 sps:$4 sm:$0xff]  }
 0x64b   :  { %6429 = vmatprep.mubr.msk.bf16.mxu0 %vm7786_vm0, %v7785_v43  ;;  %6414 = vmatpush3.bf16.msra.mxu0 %v6616_v62  ;;  %v6669_v62 = vld [vmem:[%s8431_s20 + $0x8] ss:$28 sps:$4 sm:$0xff]  }
 0x64c   :  { %6415 = vmatprep.subr.bf16.mxu0 %v7785_v43 }
 0x64f   :  { %6416 = vmatpush3.bf16.msra.mxu0 %v6617_v63  ;;  %v6674_v63 = vld [vmem:[%s8431_s20 + $0x19c] ss:$28 sps:$4 sm:$0xff]  }
 0x650   :  { %6417 = vmatprep.subr.bf16.mxu0 %v7785_v43 }
 0x653   :  { %6418 = vmatpush3.bf16.msra.mxu0 %v6618_v2  ;;  %v5667_v2 = vld [vmem:[#allocation32] ss:$0 sm:$0xff] }
 0x654   :  { %6419 = vmatprep.subr.bf16.mxu0 %v7785_v43 }
 0x657   :  { %6420 = vmatpush3.bf16.msra.mxu0 %v6619_v3 }
 0x658   :  { %6421 = vmatprep.subr.bf16.mxu0 %v7785_v43 }
 0x65b   :  { %6422 = vmatpush3.bf16.msra.mxu0 %v6620_v4 }
 0x65c   :  { %6423 = vmatprep.subr.bf16.mxu0 %v7785_v43 }
 0x65f   :  { %6424 = vmatpush3.bf16.msra.mxu0 %v6621_v16  ;;  %v6676_v16 = vld [vmem:[%s8431_s20 + $0x160] ss:$28 sps:$4 sm:$0xff]  }
 0x660   :  { %6425 = vmatprep.subr.bf16.mxu0 %v7785_v43 }
 0x663   :  { %6426 = vmatpush3.bf16.msra.mxu0 %v6622_v17  ;;  %v6679_v17 = vld [vmem:[%s8431_s20 + $0x168] ss:$28 sps:$4 sm:$0xff]  }
 0x664   :  { %6427 = vmatprep.subr.bf16.mxu0 %v7785_v43 }
 0x667   :  { %6428 = vmatpush3.bf16.msra.mxu0 %v6623_v18  ;;  %v6682_v18 = vld [vmem:[%s8431_s20 + $0x12c] ss:$28 sps:$4 sm:$0xff]  }
 0x668   :  { %2396 = vmatprep.subr.bf16.mxu0 %v6629_v21  ;;  %v6686_v21 = vld [vmem:[%s8431_s20 + $0xf4] ss:$28 sps:$4 sm:$0xff]  }
 0x70a   :  { %v1724_v6 = vpop.f32.mrf.mxu0 }
 0x70b   :  { %v1725_v8 = vadd.f32 %v5649_v5, %v1724_v6 }
 0x70c   :  { %v6391_v7 = vpop.f32.mrf.mxu0 }
 0x70d   :  { %v1731_v12 = vmax.f32 %v1725_v8, 0.0 }
 0x70e   :  { %v1727_v9 = vpop.f32.mrf.mxu0 }
 0x70f   :  { %v1728_v10 = vadd.f32 %v5649_v5, %v1727_v9 }
 0x710   :  { %v6392_v11 = vpop.f32.mrf.mxu0 }
 0x711   :  { %v1732_v13 = vmax.f32 %v1728_v10, 0.0  ;;  %v6672_v11 = vld [vmem:[%s8431_s20 + $0x198] ss:$28 sps:$4 sm:$0xff]  }
 0x713   :  { %v1733_v15 = vpack.c.bf16 %v1732_v13, %v1731_v12  ;;  %v6675_v12 = vld [vmem:[%s8431_s20 + $0x1a0] ss:$28 sps:$4 sm:$0xff]  }
 0x715   :  { %6410 = vmatmul.mubr.bf16.vlgmr.msra.gmra.mxu1 %v1733_v15  ;;  %v6678_v15 = vld [vmem:[%s8431_s20 + $0x164] ss:$28 sps:$4 sm:$0xff]  }
 0x716   :  { %2385 = vmatprep.mubr.bf16.mxu1 %v7787_v38  ;;  %2354 = vmatpush1.bf16.msra.mxu1 %v6624_v19  ;;  %v6680_v19 = vld [vmem:[%s8431_s20 + $0x128] ss:$28 sps:$4 sm:$0xff]  }
 0x717   :  { %2355 = vmatprep.subr.bf16.mxu1 %v6632_v22  ;;  %v6684_v22 = vld [vmem:[%s8431_s20 + $0xf0] ss:$28 sps:$4 sm:$0xff]  }
 0x71a   :  { %2356 = vmatpush1.bf16.msra.mxu1 %v6630_v23  ;;  %v6687_v23 = vld [vmem:[%s8431_s20 + $0xf8] ss:$28 sps:$4 sm:$0xff]  }
 0x71b   :  { %2357 = vmatprep.subr.bf16.mxu1 %v6638_v24  ;;  %v6690_v24 = vld [vmem:[%s8431_s20 + $0xbc] ss:$28 sps:$4 sm:$0xff]  }
 0x71e   :  { %2358 = vmatpush1.bf16.msra.mxu1 %v6636_v25  ;;  %v6688_v25 = vld [vmem:[%s8431_s20 + $0xb8] ss:$28 sps:$4 sm:$0xff]  }
 0x71f   :  { %2359 = vmatprep.subr.bf16.mxu1 %v6644_v26  ;;  %v6691_v26 = vld [vmem:[%s8431_s20 + $0xc0] ss:$28 sps:$4 sm:$0xff]  }
 0x722   :  { %2360 = vmatpush1.bf16.msra.mxu1 %v6642_v27  ;;  %v6694_v27 = vld [vmem:[%s8431_s20 + $0x84] ss:$28 sps:$4 sm:$0xff]  }
 0x723   :  { %2361 = vmatprep.subr.bf16.mxu1 %v6650_v28  ;;  %v6692_v28 = vld [vmem:[%s8431_s20 + $0x80] ss:$28 sps:$4 sm:$0xff]  }
 0x726   :  { %2362 = vmatpush1.bf16.msra.mxu1 %v6648_v29  ;;  %v6695_v29 = vld [vmem:[%s8431_s20 + $0x88] ss:$28 sps:$4 sm:$0xff]  }
 0x727   :  { %2363 = vmatprep.subr.bf16.mxu1 %v6656_v30  ;;  %v6698_v30 = vld [vmem:[%s8431_s20 + $0x4c] ss:$28 sps:$4 sm:$0xff]  }
 0x72a   :  { %2364 = vmatpush1.bf16.msra.mxu1 %v6654_v31  ;;  %v6696_v31 = vld [vmem:[%s8431_s20 + $0x48] ss:$28 sps:$4 sm:$0xff]  }
 0x72b   :  { %2365 = vmatprep.subr.bf16.mxu1 %v6662_v55  ;;  %v6733_v55 = vld [vmem:[#allocation35 + $0x42c] ss:$28 sps:$4 sm:$0xff]  }
 0x72e   :  { %2366 = vmatpush1.bf16.msra.mxu1 %v6660_v57  ;;  %v6731_v57 = vld [vmem:[#allocation35 + $0x428] ss:$28 sps:$4 sm:$0xff]  }
 0x72f   :  { %2367 = vmatprep.subr.bf16.mxu1 %v6668_v59  ;;  %v6739_v59 = vld [vmem:[#allocation35 + $0x3f4] ss:$28 sps:$4 sm:$0xff]  }
 0x732   :  { %2368 = vmatpush1.bf16.msra.mxu1 %v6666_v61  ;;  %v6737_v61 = vld [vmem:[#allocation35 + $0x3f0] ss:$28 sps:$4 sm:$0xff]  }
 0x733   :  { %2439 = vmatprep.subr.bf16.mxu1 %v6674_v63  ;;  %v6745_v63 = vld [vmem:[#allocation35 + $0x3bc] ss:$28 sps:$4 sm:$0xff]  }
 0x7d5   :  { %v1839_v33 = vpop.f32.mrf.mxu1 }
 0x7d6   :  { %v1840_v35 = vadd.f32 %v5658_v32, %v1839_v33  ;;  %v6702_v33 = vld [vmem:[%s8431_s20 + $0x14] ss:$28 sps:$4 sm:$0xff]  }
 0x7d7   :  { %v6411_v34 = vpop.f32.mrf.mxu1 }
 0x7d8   :  { %v1846_v40 = vmax.f32 %v1840_v35, 0.0  ;;  %v6700_v34 = vld [vmem:[%s8431_s20 + $0x10] ss:$28 sps:$4 sm:$0xff]   ;;  %v6703_v35 = vld [vmem:[%s8431_s20 + $0x18] ss:$28 sps:$4 sm:$0xff]  }
 0x7d9   :  { %v1842_v36 = vpop.f32.mrf.mxu1 }
 0x7da   :  { %v1843_v37 = vadd.f32 %v5658_v32, %v1842_v36  ;;  %v6699_v32 = vld [vmem:[%s8431_s20 + $0x50] ss:$28 sps:$4 sm:$0xff]   ;;  %s7788_s20 = smov [#allocation39]  }
 0x7db   :  { %v6412_v39 = vpop.f32.mrf.mxu1  ;;  %v6706_v36 = vld [vmem:[#allocation35 + $0x18c] ss:$28 sps:$4 sm:$0xff]   ;;  %s5522_s29 = sshll.u32 %s7788_s20, 4  ;;  %s5523_s29 = int_to_ptr.vmem [resolvable:$true] %s5522_s29 }
 0x7dc   :  { %v1847_v41 = vmax.f32 %v1843_v37, 0.0  ;;  %v6709_v37 = vld [vmem:[#allocation35 + $0x50c] ss:$28 sps:$4 sm:$0xff]   ;;  %s7686_s5 = scalar_lea.vmem %s5523_s29, 16  ;;  %s7690_s9 = scalar_lea.vmem %s5523_s29, 32 }
 0x7dd   :  { %v6704_v39 = vld [vmem:[#allocation35 + $0x188] ss:$28 sps:$4 sm:$0xff]   ;;  %p7687_p3 = scmp.ne.s32.totalorder %s5523_s29, %s7686_s5  ;;  %p7691_p4 = scmp.lt.s32.totalorder %s5523_s29, %s5523_s29 }
 0x7de   :  { %v1848_v44 = vpack.c.bf16 %v1847_v41, %v1846_v40  ;;  %v6707_v40 = vld [vmem:[#allocation35 + $0x508] ss:$28 sps:$4 sm:$0xff]   ;;  %v6712_v41 = vld [vmem:[#allocation35 + $0x154] ss:$28 sps:$4 sm:$0xff]   ;;  %p7692_p5 = scmp.lt.s32.totalorder %s7690_s9, %s7686_s5 }
 0x7e0   :  { %6430 = vmatmul.mubr.bf16.vlgmr.msra.gmra.mxu0 %v1848_v44  ;;  %v6710_v44 = vld [vmem:[#allocation35 + $0x150] ss:$28 sps:$4 sm:$0xff]   ;;  %p7693_p6 = por %p7692_p5, %p7691_p4 }
 0x7e1   :  { %2397 = vmatpush1.bf16.msra.mxu0 %v6627_v42  ;;  %2428 = vmatprep.mubr.bf16.mxu0 %v7787_v38  ;;  %v6715_v42 = vld [vmem:[#allocation35 + $0x4d4] ss:$28 sps:$4 sm:$0xff]  }
 0x7e2   :  { %2398 = vmatprep.subr.bf16.mxu0 %v6635_v45  ;;  %v6713_v45 = vld [vmem:[#allocation35 + $0x4d0] ss:$28 sps:$4 sm:$0xff]   ;;  %p7694_p7 = pnand %p7693_p6, %p7687_p3 }
 0x7e5   :  { %2399 = vmatpush1.bf16.msra.mxu0 %v6633_v46  ;;  %v6718_v46 = vld [vmem:[#allocation35 + $0x11c] ss:$28 sps:$4 sm:$0xff]  }
 0x7e6   :  { %2400 = vmatprep.subr.bf16.mxu0 %v6641_v47  ;;  %v6721_v47 = vld [vmem:[#allocation35 + $0x49c] ss:$28 sps:$4 sm:$0xff]  }
 0x7e9   :  { %2401 = vmatpush1.bf16.msra.mxu0 %v6639_v48  ;;  %v6716_v48 = vld [vmem:[#allocation35 + $0x118] ss:$28 sps:$4 sm:$0xff]  }
 0x7ea   :  { %2402 = vmatprep.subr.bf16.mxu0 %v6647_v49  ;;  %v6719_v49 = vld [vmem:[#allocation35 + $0x498] ss:$28 sps:$4 sm:$0xff]  }
 0x7ed   :  { %2403 = vmatpush1.bf16.msra.mxu0 %v6645_v50  ;;  %v6724_v50 = vld [vmem:[#allocation35 + $0xe4] ss:$28 sps:$4 sm:$0xff]  }
 0x7ee   :  { %2404 = vmatprep.subr.bf16.mxu0 %v6653_v51  ;;  %v6727_v51 = vld [vmem:[#allocation35 + $0x464] ss:$28 sps:$4 sm:$0xff]  }
 0x7f1   :  { %2405 = vmatpush1.bf16.msra.mxu0 %v6651_v52  ;;  %v6722_v52 = vld [vmem:[#allocation35 + $0xe0] ss:$28 sps:$4 sm:$0xff]  }
 0x7f2   :  { %2406 = vmatprep.subr.bf16.mxu0 %v6659_v53  ;;  %v6725_v53 = vld [vmem:[#allocation35 + $0x460] ss:$28 sps:$4 sm:$0xff]  }
 0x7f5   :  { %2407 = vmatpush1.bf16.msra.mxu0 %v6657_v54  ;;  %v6730_v54 = vld [vmem:[#allocation35 + $0xac] ss:$28 sps:$4 sm:$0xff]  }
 0x7f6   :  { %2408 = vmatprep.subr.bf16.mxu0 %v6665_v56  ;;  %v6728_v56 = vld [vmem:[#allocation35 + $0xa8] ss:$28 sps:$4 sm:$0xff]  }
 0x7f9   :  { %2409 = vmatpush1.bf16.msra.mxu0 %v6663_v58  ;;  %v6736_v58 = vld [vmem:[#allocation35 + $0x74] ss:$28 sps:$4 sm:$0xff]  }
 0x7fa   :  { %2410 = vmatprep.subr.bf16.mxu0 %v6671_v60  ;;  %v6734_v60 = vld [vmem:[#allocation35 + $0x70] ss:$28 sps:$4 sm:$0xff]  }
 0x7fd   :  { %2411 = vmatpush1.bf16.msra.mxu0 %v6669_v62  ;;  %v6742_v62 = vld [vmem:[#allocation35 + $0x3c] ss:$28 sps:$4 sm:$0xff]  }
 0x7fe   :  { %6433 = vmatprep.subr.bf16.mxu0 %v7785_v43 }
 0x8a0   :  { %v1954_v3 = vpop.f32.mrf.mxu0 }
 0x8a1   :  { %v1955_v5 = vadd.f32 %v5667_v2, %v1954_v3  ;;  %v6743_v3 = vld [vmem:[#allocation35 + $0x3b8] ss:$28 sps:$4 sm:$0xff]  }
 0x8a2   :  { %v6431_v4 = vpop.f32.mrf.mxu0 }
 0x8a3   :  { %v1961_v9 = vmax.f32 %v1955_v5, 0.0  ;;  %v6748_v4 = vld [vmem:[#allocation35 + $0x4] ss:$28 sps:$4 sm:$0xff]  }
 0x8a4   :  { %v1957_v6 = vpop.f32.mrf.mxu0  ;;  %v6751_v5 = vld [vmem:[#allocation35 + $0x384] ss:$28 sps:$4 sm:$0xff]  }
 0x8a5   :  { %v1958_v7 = vadd.f32 %v5667_v2, %v1957_v6  ;;  %v6740_v2 = vld [vmem:[#allocation35 + $0x38] ss:$28 sps:$4 sm:$0xff]   ;;  %v6746_v6 = vld [vmem:[#allocation35] ss:$28 sps:$4 sm:$0xff]  }
 0x8a6   :  { %v6432_v8 = vpop.f32.mrf.mxu0 }
 0x8a7   :  { %v1962_v10 = vmax.f32 %v1958_v7, 0.0  ;;  %v6749_v7 = vld [vmem:[#allocation35 + $0x380] ss:$28 sps:$4 sm:$0xff]   ;;  %v6754_v8 = vld [vmem:[#allocation35 + $0x34c] ss:$28 sps:$4 sm:$0xff]  }
 0x8a9   :  { %v8216_v13 = vpack.c.bf16 %v1962_v10, %v1961_v9  ;;  %v6757_v9 = vld [vmem:[#allocation35 + $0x6cc] ss:$28 sps:$4 sm:$0xff]  }
 0x8aa   :  { %v6752_v10 = vld [vmem:[#allocation35 + $0x348] ss:$28 sps:$4 sm:$0xff]  }
 0x8ab   :  { %2386 = vmatmul.mubr.bf16.vlgmr.msra.gmra.mxu1 %v8216_v13  ;;  %2429 = vmatmul.mubr.bf16.vlgmr.msra.gmra.mxu0 %v8216_v13 }
 0x8ac   :  { %2440 = vmatpush1.bf16.msra.mxu1 %v6672_v11  ;;  %6434 = vmatpush3.bf16.msra.mxu0 %v6675_v12  ;;  %v6755_v11 = vld [vmem:[#allocation35 + $0x6c8] ss:$28 sps:$4 sm:$0xff]   ;;  %v6760_v12 = vld [vmem:[#allocation35 + $0x314] ss:$28 sps:$4 sm:$0xff]  }
 0x8ad   :  { %2441 = vmatprep.subr.bf16.mxu1 %v6678_v15  ;;  %6435 = vmatprep.subr.bf16.mxu0 %v7785_v43  ;;  %v6758_v15 = vld [vmem:[#allocation35 + $0x310] ss:$28 sps:$4 sm:$0xff]  }
 0x8ae   :  { %2471 = vmatprep.mubr.bf16.mxu1 %v7787_v38  ;;  %6449 = vmatprep.mubr.msk.bf16.mxu0 %vm7786_vm0, %v7785_v43 }
 0x8b0   :  { %2442 = vmatpush1.bf16.msra.mxu1 %v6676_v16  ;;  %6436 = vmatpush3.bf16.msra.mxu0 %v6679_v17  ;;  %v6761_v16 = vld [vmem:[#allocation35 + $0x690] ss:$28 sps:$4 sm:$0xff]   ;;  %v6766_v17 = vld [vmem:[#allocation35 + $0x2dc] ss:$28 sps:$4 sm:$0xff]  }
 0x8b1   :  { %2443 = vmatprep.subr.bf16.mxu1 %v6682_v18  ;;  %6437 = vmatprep.subr.bf16.mxu0 %v7785_v43  ;;  %v6769_v18 = vld [vmem:[#allocation35 + $0x65c] ss:$28 sps:$4 sm:$0xff]  }
 0x8b4   :  { %2444 = vmatpush1.bf16.msra.mxu1 %v6680_v19  ;;  %6438 = vmatpush3.bf16.msra.mxu0 %v6683_v20  ;;  %v6764_v19 = vld [vmem:[#allocation35 + $0x2d8] ss:$28 sps:$4 sm:$0xff]  }
 0x8b5   :  { %2445 = vmatprep.subr.bf16.mxu1 %v6686_v21  ;;  %6439 = vmatprep.subr.bf16.mxu0 %v7785_v43  ;;  %v6767_v20 = vld [vmem:[#allocation35 + $0x658] ss:$28 sps:$4 sm:$0xff]   ;;  %v6772_v21 = vld [vmem:[#allocation35 + $0x2a4] ss:$28 sps:$4 sm:$0xff]  }
 0x8b8   :  { %2446 = vmatpush1.bf16.msra.mxu1 %v6684_v22  ;;  %6440 = vmatpush3.bf16.msra.mxu0 %v6687_v23  ;;  %v6775_v22 = vld [vmem:[#allocation35 + $0x624] ss:$28 sps:$4 sm:$0xff]  }
 0x8b9   :  { %2447 = vmatprep.subr.bf16.mxu1 %v6690_v24  ;;  %6441 = vmatprep.subr.bf16.mxu0 %v7785_v43  ;;  %v6770_v23 = vld [vmem:[#allocation35 + $0x2a0] ss:$28 sps:$4 sm:$0xff]  }
 0x8ba   :  { %v6773_v24 = vld [vmem:[#allocation35 + $0x620] ss:$28 sps:$4 sm:$0xff]  }
 0x8bc   :  { %2448 = vmatpush1.bf16.msra.mxu1 %v6688_v25  ;;  %6442 = vmatpush3.bf16.msra.mxu0 %v6691_v26  ;;  %v6778_v25 = vld [vmem:[#allocation35 + $0x26c] ss:$28 sps:$4 sm:$0xff]  }
 0x8bd   :  { %2449 = vmatprep.subr.bf16.mxu1 %v6694_v27  ;;  %6443 = vmatprep.subr.bf16.mxu0 %v7785_v43  ;;  %v6781_v26 = vld [vmem:[#allocation35 + $0x5ec] ss:$28 sps:$4 sm:$0xff]  }
 0x8be   :  { %v6776_v27 = vld [vmem:[#allocation35 + $0x268] ss:$28 sps:$4 sm:$0xff]  }
 0x8c0   :  { %2450 = vmatpush1.bf16.msra.mxu1 %v6692_v28  ;;  %6444 = vmatpush3.bf16.msra.mxu0 %v6695_v29  ;;  %v6779_v28 = vld [vmem:[#allocation35 + $0x5e8] ss:$28 sps:$4 sm:$0xff]   ;;  %v6784_v29 = vld [vmem:[#allocation35 + $0x234] ss:$28 sps:$4 sm:$0xff]  }
 0x8c1   :  { %2451 = vmatprep.subr.bf16.mxu1 %v6698_v30  ;;  %6445 = vmatprep.subr.bf16.mxu0 %v7785_v43  ;;  %v6787_v30 = vld [vmem:[#allocation35 + $0x5b4] ss:$28 sps:$4 sm:$0xff]  }
 0x8c4   :  { %2452 = vmatpush1.bf16.msra.mxu1 %v6696_v31  ;;  %6446 = vmatpush3.bf16.msra.mxu0 %v6699_v32  ;;  %v6782_v31 = vld [vmem:[#allocation35 + $0x230] ss:$28 sps:$4 sm:$0xff]  }
 0x8c5   :  { %2453 = vmatprep.subr.bf16.mxu1 %v6702_v33  ;;  %6447 = vmatprep.subr.bf16.mxu0 %v7785_v43  ;;  %v6785_v32 = vld [vmem:[#allocation35 + $0x5b0] ss:$28 sps:$4 sm:$0xff]   ;;  %v6790_v33 = vld [vmem:[#allocation35 + $0x1fc] ss:$28 sps:$4 sm:$0xff]  }
 0x8c8   :  { %2454 = vmatpush1.bf16.msra.mxu1 %v6700_v34  ;;  %6448 = vmatpush3.bf16.msra.mxu0 %v6703_v35  ;;  %v6793_v34 = vld [vmem:[#allocation35 + $0x57c] ss:$28 sps:$4 sm:$0xff]  }
 0x8c9   :  { %4740 = vmatprep.subr.bf16.mxu1 %v6706_v36  ;;  %4783 = vmatprep.subr.bf16.mxu0 %v6709_v37  ;;  %v6788_v35 = vld [vmem:[#allocation35 + $0x1f8] ss:$28 sps:$4 sm:$0xff]   ;;  %v6796_v37 = vld [vmem:[#allocation35 + $0x1c4] ss:$28 sps:$4 sm:$0xff]  }
 0x8ca   :  { %v6791_v36 = vld [vmem:[#allocation35 + $0x578] ss:$28 sps:$4 sm:$0xff]  }
 0x8cb   :  { %2472 = vmatmul.mubr.bf16.vlgmr.msra.gmra.mxu1 %v8216_v13  ;;  %6450 = vmatmul.mubr.bf16.vlgmr.msra.gmra.mxu0 %v8216_v13  ;;  %v6763_v13 = vld [vmem:[#allocation35 + $0x694] ss:$28 sps:$4 sm:$0xff]  }
 0x8cc   :  { %4741 = vmatpush1.bf16.msra.mxu1 %v6704_v39  ;;  %4784 = vmatpush1.bf16.msra.mxu0 %v6707_v40  ;;  %v6799_v39 = vld [vmem:[#allocation35 + $0x544] ss:$28 sps:$4 sm:$0xff]  }
 0x8cd   :  { %4742 = vmatprep.subr.bf16.mxu1 %v6712_v41  ;;  %4785 = vmatprep.subr.bf16.mxu0 %v6715_v42  ;;  %v6794_v40 = vld [vmem:[#allocation35 + $0x1c0] ss:$28 sps:$4 sm:$0xff]   ;;  %v6802_v42 = vld [vmem:[#allocation35 + $0x88c] ss:$28 sps:$4 sm:$0xff]  }
 0x8ce   :  { %v6797_v41 = vld [vmem:[#allocation35 + $0x540] ss:$28 sps:$4 sm:$0xff]  }
 0x8d0   :  { %4743 = vmatpush1.bf16.msra.mxu1 %v6710_v44  ;;  %4786 = vmatpush1.bf16.msra.mxu0 %v6713_v45  ;;  %v6820_v44 = vld [vmem:[#allocation35 + $0xa84] ss:$28 sps:$4 sm:$0xff]   ;;  %v2044_v45 = vsub.s32 3, %v8076_v0 }
 0x8d1   :  { %4744 = vmatprep.subr.bf16.mxu1 %v6718_v46  ;;  %4787 = vmatprep.subr.bf16.mxu0 %v6721_v47  ;;  %v2040_v46 = vsub.s32 2, %v8076_v0  ;;  %v8297_v47 = vld [vmem:[#allocation34] sm:$0x7f] }
 0x8d4   :  { %4745 = vmatpush1.bf16.msra.mxu1 %v6716_v48  ;;  %4788 = vmatpush1.bf16.msra.mxu0 %v6719_v49 }
 0x8d5   :  { %4746 = vmatprep.subr.bf16.mxu1 %v6724_v50  ;;  %4789 = vmatprep.subr.bf16.mxu0 %v6727_v51  ;;  %v2037_v50 = vrot.slane %v8297_v47, %v8079_v1  ;;  %v2045_v51 = vrot.slane %v8297_v47, %v2044_v45 }
 0x8d8   :  { %4747 = vmatpush1.bf16.msra.mxu1 %v6722_v52  ;;  %4790 = vmatpush1.bf16.msra.mxu0 %v6725_v53  ;;  %v2033_v52 = vrot.slane %v8297_v47, %v8083_v14  ;;  %v2041_v53 = vrot.slane %v8297_v47, %v2040_v46 }
 0x8d9   :  { %4748 = vmatprep.subr.bf16.mxu1 %v6730_v54  ;;  %4791 = vmatprep.subr.bf16.mxu0 %v6733_v55 }
 0x8dc   :  { %4749 = vmatpush1.bf16.msra.mxu1 %v6728_v56  ;;  %4792 = vmatpush1.bf16.msra.mxu0 %v6731_v57 }
 0x8dd   :  { %4750 = vmatprep.subr.bf16.mxu1 %v6736_v58  ;;  %4793 = vmatprep.subr.bf16.mxu0 %v6739_v59 }
 0x8e0   :  { %4751 = vmatpush1.bf16.msra.mxu1 %v6734_v60  ;;  %4794 = vmatpush1.bf16.msra.mxu0 %v6737_v61 }
 0x8e1   :  { %4752 = vmatprep.subr.bf16.mxu1 %v6742_v62  ;;  %4795 = vmatprep.subr.bf16.mxu0 %v6745_v63 }
 0x8e4   :  { %4753 = vmatpush1.bf16.msra.mxu1 %v6740_v2  ;;  %4796 = vmatpush1.bf16.msra.mxu0 %v6743_v3 }
 0x8e5   :  { %4754 = vmatprep.subr.bf16.mxu1 %v6748_v4  ;;  %4797 = vmatprep.subr.bf16.mxu0 %v6751_v5 }
 0x8e8   :  { %4755 = vmatpush1.bf16.msra.mxu1 %v6746_v6  ;;  %4798 = vmatpush1.bf16.msra.mxu0 %v6749_v7 }
 0x8e9   :  { %4756 = vmatprep.subr.bf16.mxu1 %v6754_v8  ;;  %4799 = vmatprep.subr.bf16.mxu0 %v6757_v9 }
 0x8ec   :  { %4757 = vmatpush2.bf16.msra.mxu1 %v6752_v10  ;;  %4800 = vmatpush2.bf16.msra.mxu0 %v6755_v11 }
 0x8ed   :  { %4758 = vmatprep.subr.bf16.mxu1 %v6760_v12  ;;  %4801 = vmatprep.subr.bf16.mxu0 %v6763_v13 }
 0x8f0   :  { %4759 = vmatpush2.bf16.msra.mxu1 %v6758_v15  ;;  %4802 = vmatpush2.bf16.msra.mxu0 %v6761_v16 }
 0x8f1   :  { %4760 = vmatprep.subr.bf16.mxu1 %v6766_v17  ;;  %4803 = vmatprep.subr.bf16.mxu0 %v6769_v18  ;;  %v6800_v17 = vld [vmem:[#allocation35 + $0x888] ss:$28 sps:$4 sm:$0xff]   ;;  %v6818_v18 = vld [vmem:[#allocation35 + $0xa80] ss:$28 sps:$4 sm:$0xff]  }
 0x8f4   :  { %4761 = vmatpush2.bf16.msra.mxu1 %v6764_v19  ;;  %4804 = vmatpush2.bf16.msra.mxu0 %v6767_v20 }
 0x8f5   :  { %4762 = vmatprep.subr.bf16.mxu1 %v6772_v21  ;;  %4805 = vmatprep.subr.bf16.mxu0 %v6775_v22  ;;  %v6805_v21 = vld [vmem:[#allocation35 + $0x854] ss:$28 sps:$4 sm:$0xff]  }
 0x8f6   :  { %v6829_v22 = vld [vmem:[#allocation35 + $0x194] ss:$28 sps:$4 sm:$0xff]  }
 0x8f8   :  { %4763 = vmatpush2.bf16.msra.mxu1 %v6770_v23  ;;  %4806 = vmatpush2.bf16.msra.mxu0 %v6773_v24  ;;  %v6803_v23 = vld [vmem:[#allocation35 + $0x850] ss:$28 sps:$4 sm:$0xff]   ;;  %v6808_v24 = vld [vmem:[#allocation35 + $0x81c] ss:$28 sps:$4 sm:$0xff]  }
 0x8f9   :  { %4764 = vmatprep.subr.bf16.mxu1 %v6778_v25  ;;  %4807 = vmatprep.subr.bf16.mxu0 %v6781_v26  ;;  %v6806_v25 = vld [vmem:[#allocation35 + $0x818] ss:$28 sps:$4 sm:$0xff]   ;;  %v6811_v26 = vld [vmem:[#allocation35 + $0x7e4] ss:$28 sps:$4 sm:$0xff]  }
 0x8fc   :  { %4765 = vmatpush2.bf16.msra.mxu1 %v6776_v27  ;;  %4808 = vmatpush2.bf16.msra.mxu0 %v6779_v28  ;;  %v6809_v27 = vld [vmem:[#allocation35 + $0x7e0] ss:$28 sps:$4 sm:$0xff]   ;;  %v6814_v28 = vld [vmem:[#allocation35 + $0x7ac] ss:$28 sps:$4 sm:$0xff]  }
 0x8fd   :  { %4766 = vmatprep.subr.bf16.mxu1 %v6784_v29  ;;  %4809 = vmatprep.subr.bf16.mxu0 %v6787_v30  ;;  %v6812_v29 = vld [vmem:[#allocation35 + $0x7a8] ss:$28 sps:$4 sm:$0xff]   ;;  %v2056_v30 = vsub.s32 6, %v8076_v0 }
 0x900   :  { %4767 = vmatpush2.bf16.msra.mxu1 %v6782_v31  ;;  %4810 = vmatpush2.bf16.msra.mxu0 %v6785_v32  ;;  %v6817_v31 = vld [vmem:[#allocation35 + $0x774] ss:$28 sps:$4 sm:$0xff]   ;;  %v2052_v32 = vsub.s32 5, %v8076_v0 }
 0x901   :  { %4768 = vmatprep.subr.bf16.mxu1 %v6790_v33  ;;  %4811 = vmatprep.subr.bf16.mxu0 %v6793_v34  ;;  %v2057_v33 = vrot.slane %v8297_v47, %v2056_v30  ;;  %v6815_v34 = vld [vmem:[#allocation35 + $0x770] ss:$28 sps:$4 sm:$0xff]  }
 0x904   :  { %4769 = vmatpush2.bf16.msra.mxu1 %v6788_v35  ;;  %4812 = vmatpush2.bf16.msra.mxu0 %v6791_v36 }
 0x905   :  { %4770 = vmatprep.subr.bf16.mxu1 %v6796_v37  ;;  %4813 = vmatprep.subr.bf16.mxu0 %v6799_v39  ;;  %v6823_v37 = vld [vmem:[#allocation35 + $0x73c] ss:$28 sps:$4 sm:$0xff]   ;;  %v2053_v39 = vrot.slane %v8297_v47, %v2052_v32 }
 0x908   :  { %4771 = vmatpush2.bf16.msra.mxu1 %v6794_v40  ;;  %4814 = vmatpush2.bf16.msra.mxu0 %v6797_v41 }
 0x909   :  { %4826 = vmatprep.subr.bf16.mxu1 %v6802_v42  ;;  %4883 = vmatprep.subr.bf16.mxu0 %v6820_v44  ;;  %v6821_v44 = vld [vmem:[#allocation35 + $0x738] ss:$28 sps:$4 sm:$0xff]  }
 0x96b   :  { %v2387_v48 = vpop.f32.mrf.mxu1  ;;  %v2430_v49 = vpop.f32.mrf.mxu0 }
 0x96c   :  { %v2388_v62 = vadd.f32 %v2387_v48, %v2033_v52  ;;  %v2431_v63 = vadd.f32 %v2430_v49, %v2041_v53 }
 0x96d   :  { %v2389_v54 = vpop.f32.mrf.mxu1  ;;  %v2432_v55 = vpop.f32.mrf.mxu0 }
 0x96e   :  { %v2390_v58 = vadd.f32 %v2389_v54, %v2037_v50  ;;  %v2433_v59 = vadd.f32 %v2432_v55, %v2045_v51  ;;  %v2523_v12 = vmax.f32 %v2388_v62, 0.0  ;;  %v2525_v13 = vmax.f32 %v2431_v63, 0.0  ;;  %v6832_v63 = vld [vmem:[#allocation35 + $0xa4c] ss:$28 sps:$4 sm:$0xff]  }
 0x96f   :  { %v2391_v56 = vpop.f32.mrf.mxu1  ;;  %v2434_v57 = vpop.f32.mrf.mxu0 }
 0x970   :  { %v2392_v60 = vadd.f32 %v2391_v56, %v2033_v52  ;;  %v2435_v61 = vadd.f32 %v2434_v57, %v2041_v53  ;;  %v2524_v8 = vmax.f32 %v2390_v58, 0.0  ;;  %v2526_v9 = vmax.f32 %v2433_v59, 0.0  ;;  %v6824_v58 = vld [vmem:[#allocation35 + $0x700] ss:$28 sps:$4 sm:$0xff]   ;;  %v6827_v59 = vld [vmem:[#allocation35 + $0x190] ss:$28 sps:$4 sm:$0xff]  }
 0x971   :  { %v2393_v2 = vpop.f32.mrf.mxu1  ;;  %v2436_v3 = vpop.f32.mrf.mxu0 }
 0x972   :  { %v2394_v4 = vadd.f32 %v2393_v2, %v2037_v50  ;;  %v2437_v5 = vadd.f32 %v2436_v3, %v2045_v51  ;;  %v2530_v6 = vmax.f32 %v2392_v60, 0.0  ;;  %v2532_v7 = vmax.f32 %v2435_v61, 0.0  ;;  %v6826_v50 = vld [vmem:[#allocation35 + $0x704] ss:$28 sps:$4 sm:$0xff]   ;;  %v6835_v2 = vld [vmem:[#allocation35 + $0x15c] ss:$28 sps:$4 sm:$0xff]  }
 0x974   :  { %v2531_v10 = vmax.f32 %v2394_v4, 0.0  ;;  %v2533_v11 = vmax.f32 %v2437_v5, 0.0  ;;  %v8313_v19 = vpack.c.bf16 %v2530_v6, %v2523_v12  ;;  %v8315_v20 = vpack.c.bf16 %v2532_v7, %v2525_v13  ;;  %v6830_v4 = vld [vmem:[#allocation35 + $0xa48] ss:$28 sps:$4 sm:$0xff]   ;;  %v6833_v5 = vld [vmem:[#allocation35 + $0x158] ss:$28 sps:$4 sm:$0xff]  }
 0x975   :  { %v6838_v6 = vld [vmem:[#allocation35 + $0xa14] ss:$28 sps:$4 sm:$0xff]   ;;  %v6841_v7 = vld [vmem:[#allocation35 + $0x124] ss:$28 sps:$4 sm:$0xff]  }
 0x976   :  { %v8309_v15 = vpack.c.bf16 %v2531_v10, %v2524_v8  ;;  %v8311_v16 = vpack.c.bf16 %v2533_v11, %v2526_v9  ;;  %v6836_v8 = vld [vmem:[#allocation35 + $0xa10] ss:$28 sps:$4 sm:$0xff]   ;;  %v6839_v9 = vld [vmem:[#allocation35 + $0x120] ss:$28 sps:$4 sm:$0xff]   ;;  %v6842_v12 = vld [vmem:[#allocation35 + $0x9d8] ss:$28 sps:$4 sm:$0xff]  }
 0x977   :  { %v6844_v10 = vld [vmem:[#allocation35 + $0x9dc] ss:$28 sps:$4 sm:$0xff]   ;;  %v6847_v11 = vld [vmem:[#allocation35 + $0xec] ss:$28 sps:$4 sm:$0xff]  }
 0x978   :  { %4772 = vmatprep.mubr.bf16.mxu1 %v8309_v15  ;;  %4815 = vmatprep.mubr.bf16.mxu0 %v8311_v16  ;;  %v6845_v13 = vld [vmem:[#allocation35 + $0xe8] ss:$28 sps:$4 sm:$0xff]  }
 0x979   :  { %4773 = vmatmul.mubr.bf16.vlgmr.msra.gmra.mxu1 %v8313_v19  ;;  %4816 = vmatmul.mubr.bf16.vlgmr.msra.gmra.mxu0 %v8315_v20 }
 0x97a   :  { %4827 = vmatpush1.bf16.msra.mxu1 %v6800_v17  ;;  %4884 = vmatpush1.bf16.msra.mxu0 %v6818_v18  ;;  %v6850_v17 = vld [vmem:[#allocation35 + $0x9a4] ss:$28 sps:$4 sm:$0xff]   ;;  %v6853_v18 = vld [vmem:[#allocation35 + $0xb4] ss:$28 sps:$4 sm:$0xff]  }
 0x97b   :  { %4828 = vmatprep.subr.bf16.mxu1 %v6805_v21  ;;  %4901 = vmatprep.mubr.bf16.mxu0 %v7787_v38  ;;  %v6848_v21 = vld [vmem:[#allocation35 + $0x9a0] ss:$28 sps:$4 sm:$0xff]  }
 0x97c   :  { %4912 = vmatprep.subr.bf16.mxu0 %v6829_v22  ;;  %v6851_v22 = vld [vmem:[#allocation35 + $0xb0] ss:$28 sps:$4 sm:$0xff]  }
 0x97e   :  { %4829 = vmatpush1.bf16.msra.mxu1 %v6803_v23  ;;  %v6856_v23 = vld [vmem:[#allocation35 + $0x96c] ss:$28 sps:$4 sm:$0xff]  }
 0x97f   :  { %4830 = vmatprep.subr.bf16.mxu1 %v6808_v24  ;;  %v6859_v24 = vld [vmem:[#allocation35 + $0x7c] ss:$28 sps:$4 sm:$0xff]  }
 0x982   :  { %4831 = vmatpush1.bf16.msra.mxu1 %v6806_v25  ;;  %v6854_v25 = vld [vmem:[#allocation35 + $0x968] ss:$28 sps:$4 sm:$0xff]  }
 0x983   :  { %4832 = vmatprep.subr.bf16.mxu1 %v6811_v26  ;;  %v6857_v26 = vld [vmem:[#allocation35 + $0x78] ss:$28 sps:$4 sm:$0xff]  }
 0x986   :  { %4833 = vmatpush1.bf16.msra.mxu1 %v6809_v27  ;;  %v6862_v27 = vld [vmem:[#allocation35 + $0x934] ss:$28 sps:$4 sm:$0xff]  }
 0x987   :  { %4834 = vmatprep.subr.bf16.mxu1 %v6814_v28  ;;  %v6865_v28 = vld [vmem:[#allocation35 + $0x44] ss:$28 sps:$4 sm:$0xff]  }
 0x98a   :  { %4835 = vmatpush1.bf16.msra.mxu1 %v6812_v29  ;;  %v2048_v29 = vsub.s32 4, %v8076_v0 }
 0x98b   :  { %v8327_v35 = vpop.f32.mrf.mxu1  ;;  %v2516_v36 = vpop.f32.mrf.mxu0  ;;  %4836 = vmatprep.subr.bf16.mxu1 %v6817_v31  ;;  %v6860_v31 = vld [vmem:[#allocation35 + $0x930] ss:$28 sps:$4 sm:$0xff]  }
 0x98c   :  { %v2517_v42 = vadd.f32 %v2516_v36, %v2057_v33  ;;  %v6871_v36 = vld [vmem:[#allocation35 + $0xc] ss:$28 sps:$4 sm:$0xff]  }
 0x98d   :  { %v2475_v40 = vpop.f32.mrf.mxu1  ;;  %v6451_v41 = vpop.f32.mrf.mxu0 }
 0x98e   :  { %4837 = vmatpush1.bf16.msra.mxu1 %v6815_v34  ;;  %v2476_v51 = vadd.f32 %v2475_v40, %v2053_v39  ;;  %v2529_v55 = vmax.f32 %v2517_v42, 0.0  ;;  %v6868_v34 = vld [vmem:[#allocation35 + $0x8fc] ss:$28 sps:$4 sm:$0xff]   ;;  %v6869_v41 = vld [vmem:[#allocation35 + $0x8] ss:$28 sps:$4 sm:$0xff]  }
 0x98f   :  { %v8332_v48 = vpop.f32.mrf.mxu1  ;;  %v2519_v49 = vpop.f32.mrf.mxu0  ;;  %4838 = vmatprep.subr.bf16.mxu1 %v6823_v37  ;;  %v2049_v37 = vrot.slane %v8297_v47, %v2048_v29  ;;  %v6874_v42 = vld [vmem:[#allocation35 + $0x8c4] ss:$28 sps:$4 sm:$0xff]   ;;  %v6880_v47 = vld [vmem:[#allocation35 + $0x31c] ss:$28 sps:$4 sm:$0xff]  }
 0x990   :  { %v2520_v52 = vadd.f32 %v2519_v49, %v2057_v33  ;;  %v2528_v60 = vmax.f32 %v2476_v51, 0.0  ;;  %v6863_v33 = vld [vmem:[#allocation35 + $0x40] ss:$28 sps:$4 sm:$0xff]  }
 0x991   :  { %v2479_v53 = vpop.f32.mrf.mxu1  ;;  %v6452_v54 = vpop.f32.mrf.mxu0  ;;  %v2478_v40 = vadd.f32 %v8332_v48, %v2049_v37  ;;  %v2474_v49 = vadd.f32 %v8327_v35, %v2049_v37  ;;  %v6881_v48 = vld [vmem:[#allocation35 + $0x510] ss:$28 sps:$4 sm:$0xff]   ;;  %v6886_v35 = vld [vmem:[#allocation35 + $0x2e4] ss:$28 sps:$4 sm:$0xff]   ;;  %v6934_v37 = vld [vmem:[#allocation35 + $0x69c] ss:$28 sps:$4 sm:$0xff]  }
 0x992   :  { %v2536_v56 = vmax.f32 %v2520_v52, 0.0  ;;  %v2480_v57 = vadd.f32 %v2479_v53, %v2053_v39  ;;  %4839 = vmatpush1.bf16.msra.mxu1 %v6821_v44  ;;  %v6866_v39 = vld [vmem:[#allocation35 + $0x8f8] ss:$28 sps:$4 sm:$0xff]   ;;  %v6875_v52 = vld [vmem:[#allocation35 + $0x350] ss:$28 sps:$4 sm:$0xff]  }
 0x993   :  { %4840 = vmatprep.subr.bf16.mxu1 %v6826_v50  ;;  %v6877_v44 = vld [vmem:[#allocation35 + $0x354] ss:$28 sps:$4 sm:$0xff]   ;;  %v6872_v50 = vld [vmem:[#allocation35 + $0x8c0] ss:$28 sps:$4 sm:$0xff]   ;;  %v2534_v51 = vmax.f32 %v2478_v40, 0.0  ;;  %v2527_v54 = vmax.f32 %v2474_v49, 0.0 }
 0x994   :  { %v8334_v61 = vpack.c.bf16 %v2536_v56, %v2529_v55  ;;  %v2535_v62 = vmax.f32 %v2480_v57, 0.0  ;;  %v6883_v53 = vld [vmem:[#allocation35 + $0x514] ss:$28 sps:$4 sm:$0xff]   ;;  %v6889_v57 = vld [vmem:[#allocation35 + $0x4dc] ss:$28 sps:$4 sm:$0xff]  }
 0x995   :  { %v8348_v55 = vpack.c.bf16 %v2534_v51, %v2527_v54  ;;  %v6878_v56 = vld [vmem:[#allocation35 + $0x318] ss:$28 sps:$4 sm:$0xff]   ;;  %v6938_v49 = vld [vmem:[#allocation35 + $0x660] ss:$28 sps:$4 sm:$0xff]   ;;  %v6946_v51 = vld [vmem:[#allocation35 + $0x62c] ss:$28 sps:$4 sm:$0xff]  }
 0x996   :  { %v8336_v3 = vpack.c.bf16 %v2535_v62, %v2528_v60  ;;  %4841 = vmatpush1.bf16.msra.mxu1 %v6824_v58  ;;  %6075 = vmatmul.mubr.msk.bf16.vlgmr.msra.gmra.mxu0 %vm791_vm1, %v8334_v61  ;;  %v6887_v58 = vld [vmem:[#allocation35 + $0x4d8] ss:$28 sps:$4 sm:$0xff]   ;;  %v6895_v60 = vld [vmem:[#allocation35 + $0x4a4] ss:$28 sps:$4 sm:$0xff]   ;;  %v6892_v62 = vld [vmem:[#allocation35 + $0x2ac] ss:$28 sps:$4 sm:$0xff]  }
 0x997   :  { %4913 = vmatpush1.bf16.msra.mxu0 %v6827_v59  ;;  %4944 = vmatprep.mubr.bf16.mxu0 %v8309_v15  ;;  %v6884_v59 = vld [vmem:[#allocation35 + $0x2e0] ss:$28 sps:$4 sm:$0xff]   ;;  %v6932_v40 = vld [vmem:[#allocation35 + $0x698] ss:$28 sps:$4 sm:$0xff]  }
 0x998   :  { %4858 = vmatprep.mubr.bf16.mxu1 %v8336_v3  ;;  %4842 = vmatprep.subr.bf16.mxu1 %v6832_v63  ;;  %v6893_v63 = vld [vmem:[#allocation35 + $0x4a0] ss:$28 sps:$4 sm:$0xff]   ;;  %v6952_v54 = vld [vmem:[#allocation35 + $0x5f4] ss:$28 sps:$4 sm:$0xff]  }
 0x999   :  { %4914 = vmatprep.subr.bf16.mxu0 %v6835_v2  ;;  %v6890_v2 = vld [vmem:[#allocation35 + $0x2a8] ss:$28 sps:$4 sm:$0xff]  }
 0x99a   :  { %4843 = vmatpush2.bf16.msra.mxu1 %v6830_v4  ;;  %v6901_v4 = vld [vmem:[#allocation35 + $0x46c] ss:$28 sps:$4 sm:$0xff]  }
 0x99b   :  { %4915 = vmatpush1.bf16.msra.mxu0 %v6833_v5  ;;  %4844 = vmatprep.subr.bf16.mxu1 %v6838_v6  ;;  %v6898_v5 = vld [vmem:[#allocation35 + $0x274] ss:$28 sps:$4 sm:$0xff]   ;;  %v6899_v6 = vld [vmem:[#allocation35 + $0x468] ss:$28 sps:$4 sm:$0xff]  }
 0x99c   :  { %4916 = vmatprep.subr.bf16.mxu0 %v6841_v7  ;;  %v6896_v7 = vld [vmem:[#allocation35 + $0x270] ss:$28 sps:$4 sm:$0xff]  }
 0x99e   :  { %4845 = vmatpush2.bf16.msra.mxu1 %v6836_v8  ;;  %v6907_v8 = vld [vmem:[#allocation35 + $0x434] ss:$28 sps:$4 sm:$0xff]  }
 0x99f   :  { %4917 = vmatpush1.bf16.msra.mxu0 %v6839_v9  ;;  %4846 = vmatprep.subr.bf16.mxu1 %v6844_v10  ;;  %v6904_v9 = vld [vmem:[#allocation35 + $0x23c] ss:$28 sps:$4 sm:$0xff]   ;;  %v6905_v10 = vld [vmem:[#allocation35 + $0x430] ss:$28 sps:$4 sm:$0xff]  }
 0x9a0   :  { %4918 = vmatprep.subr.bf16.mxu0 %v6847_v11  ;;  %v6902_v11 = vld [vmem:[#allocation35 + $0x238] ss:$28 sps:$4 sm:$0xff]  }
 0x9a2   :  { %4847 = vmatpush2.bf16.msra.mxu1 %v6842_v12  ;;  %v6913_v12 = vld [vmem:[#allocation35 + $0x3fc] ss:$28 sps:$4 sm:$0xff]  }
 0x9a3   :  { %4919 = vmatpush1.bf16.msra.mxu0 %v6845_v13  ;;  %4848 = vmatprep.subr.bf16.mxu1 %v6850_v17  ;;  %v6910_v13 = vld [vmem:[#allocation35 + $0x204] ss:$28 sps:$4 sm:$0xff]   ;;  %v6911_v17 = vld [vmem:[#allocation35 + $0x3f8] ss:$28 sps:$4 sm:$0xff]  }
 0x9a4   :  { %4920 = vmatprep.subr.bf16.mxu0 %v6853_v18  ;;  %v6908_v18 = vld [vmem:[#allocation35 + $0x200] ss:$28 sps:$4 sm:$0xff]  }
 0x9a6   :  { %4849 = vmatpush2.bf16.msra.mxu1 %v6848_v21  ;;  %v6919_v21 = vld [vmem:[#allocation35 + $0x3c4] ss:$28 sps:$4 sm:$0xff]  }
 0x9a7   :  { %4921 = vmatpush1.bf16.msra.mxu0 %v6851_v22  ;;  %4850 = vmatprep.subr.bf16.mxu1 %v6856_v23  ;;  %v6916_v22 = vld [vmem:[#allocation35 + $0x1cc] ss:$28 sps:$4 sm:$0xff]   ;;  %v6917_v23 = vld [vmem:[#allocation35 + $0x3c0] ss:$28 sps:$4 sm:$0xff]  }
 0x9a8   :  { %4922 = vmatprep.subr.bf16.mxu0 %v6859_v24  ;;  %v6914_v24 = vld [vmem:[#allocation35 + $0x1c8] ss:$28 sps:$4 sm:$0xff]  }
 0x9aa   :  { %4851 = vmatpush2.bf16.msra.mxu1 %v6854_v25  ;;  %v6922_v25 = vld [vmem:[#allocation35 + $0x38c] ss:$28 sps:$4 sm:$0xff]  }
 0x9ab   :  { %4923 = vmatpush1.bf16.msra.mxu0 %v6857_v26  ;;  %4852 = vmatprep.subr.bf16.mxu1 %v6862_v27  ;;  %v6925_v26 = vld [vmem:[#allocation35 + $0x894] ss:$28 sps:$4 sm:$0xff]   ;;  %v6920_v27 = vld [vmem:[#allocation35 + $0x388] ss:$28 sps:$4 sm:$0xff]  }
 0x9ac   :  { %4924 = vmatprep.subr.bf16.mxu0 %v6865_v28  ;;  %v6923_v28 = vld [vmem:[#allocation35 + $0x890] ss:$28 sps:$4 sm:$0xff]  }
 0x9ae   :  { %4853 = vmatpush2.bf16.msra.mxu1 %v6860_v31  ;;  %v6928_v31 = vld [vmem:[#allocation35 + $0x6d4] ss:$28 sps:$4 sm:$0xff]  }
 0x9af   :  { %4925 = vmatpush1.bf16.msra.mxu0 %v6863_v33  ;;  %4854 = vmatprep.subr.bf16.mxu1 %v6868_v34  ;;  %v6931_v33 = vld [vmem:[#allocation35 + $0x85c] ss:$28 sps:$4 sm:$0xff]   ;;  %v6926_v34 = vld [vmem:[#allocation35 + $0x6d0] ss:$28 sps:$4 sm:$0xff]  }
 0x9b0   :  { %4926 = vmatprep.subr.bf16.mxu0 %v6871_v36  ;;  %v6929_v36 = vld [vmem:[#allocation35 + $0x858] ss:$28 sps:$4 sm:$0xff]  }
 0x9b2   :  { %4855 = vmatpush2.bf16.msra.mxu1 %v6866_v39  ;;  %v6937_v39 = vld [vmem:[#allocation35 + $0x824] ss:$28 sps:$4 sm:$0xff]  }
 0x9b3   :  { %4927 = vmatpush1.bf16.msra.mxu0 %v6869_v41  ;;  %4856 = vmatprep.subr.bf16.mxu1 %v6874_v42  ;;  %v6935_v41 = vld [vmem:[#allocation35 + $0x820] ss:$28 sps:$4 sm:$0xff]  }
 0x9b4   :  { %4928 = vmatprep.subr.bf16.mxu0 %v6877_v44  ;;  %v6940_v42 = vld [vmem:[#allocation35 + $0x664] ss:$28 sps:$4 sm:$0xff]   ;;  %v6943_v44 = vld [vmem:[#allocation35 + $0x7ec] ss:$28 sps:$4 sm:$0xff]  }
 0x9b6   :  { %4857 = vmatpush2.bf16.msra.mxu1 %v6872_v50  ;;  %v6941_v50 = vld [vmem:[#allocation35 + $0x7e8] ss:$28 sps:$4 sm:$0xff]  }
 0x9b7   :  { %4929 = vmatpush2.bf16.msra.mxu0 %v6875_v52  ;;  %4955 = vmatprep.subr.bf16.mxu1 %v6883_v53  ;;  %v6949_v52 = vld [vmem:[#allocation35 + $0x7b4] ss:$28 sps:$4 sm:$0xff]   ;;  %v6944_v53 = vld [vmem:[#allocation35 + $0x628] ss:$28 sps:$4 sm:$0xff]  }
 0x9b8   :  { %4930 = vmatprep.subr.bf16.mxu0 %v6880_v47  ;;  %v6947_v47 = vld [vmem:[#allocation35 + $0x7b0] ss:$28 sps:$4 sm:$0xff]  }
 0x9b9   :  { %4859 = vmatmul.mubr.bf16.vlgmr.msra.gmra.mxu1 %v8348_v55 }
 0x9ba   :  { %4956 = vmatpush1.bf16.msra.mxu1 %v6881_v48  ;;  %4987 = vmatprep.mubr.bf16.mxu1 %v8311_v16  ;;  %v6955_v48 = vld [vmem:[#allocation35 + $0x77c] ss:$28 sps:$4 sm:$0xff]  }
 0x9bb   :  { %4931 = vmatpush2.bf16.msra.mxu0 %v6878_v56  ;;  %4957 = vmatprep.subr.bf16.mxu1 %v6889_v57  ;;  %v6950_v56 = vld [vmem:[#allocation35 + $0x5f0] ss:$28 sps:$4 sm:$0xff]   ;;  %v6953_v57 = vld [vmem:[#allocation35 + $0x778] ss:$28 sps:$4 sm:$0xff]  }
 0x9bc   :  { %4932 = vmatprep.subr.bf16.mxu0 %v6886_v35  ;;  %v6958_v35 = vld [vmem:[#allocation35 + $0x5bc] ss:$28 sps:$4 sm:$0xff]  }
 0x9be   :  { %4958 = vmatpush1.bf16.msra.mxu1 %v6887_v58  ;;  %v6961_v58 = vld [vmem:[#allocation35 + $0x744] ss:$28 sps:$4 sm:$0xff]  }
 0x9bf   :  { %4933 = vmatpush2.bf16.msra.mxu0 %v6884_v59  ;;  %4959 = vmatprep.subr.bf16.mxu1 %v6895_v60  ;;  %v6956_v59 = vld [vmem:[#allocation35 + $0x5b8] ss:$28 sps:$4 sm:$0xff]   ;;  %v6959_v60 = vld [vmem:[#allocation35 + $0x740] ss:$28 sps:$4 sm:$0xff]  }
 0x9c0   :  { %4934 = vmatprep.subr.bf16.mxu0 %v6892_v62  ;;  %v6964_v62 = vld [vmem:[#allocation35 + $0x584] ss:$28 sps:$4 sm:$0xff]  }
 0x9c2   :  { %4960 = vmatpush1.bf16.msra.mxu1 %v6893_v63  ;;  %v6967_v63 = vld [vmem:[#allocation35 + $0x70c] ss:$28 sps:$4 sm:$0xff]  }
 0x9c3   :  { %4935 = vmatpush2.bf16.msra.mxu0 %v6890_v2  ;;  %4961 = vmatprep.subr.bf16.mxu1 %v6901_v4  ;;  %v6962_v2 = vld [vmem:[#allocation35 + $0x580] ss:$28 sps:$4 sm:$0xff]   ;;  %v6965_v4 = vld [vmem:[#allocation35 + $0x708] ss:$28 sps:$4 sm:$0xff]  }
 0x9c4   :  { %4936 = vmatprep.subr.bf16.mxu0 %v6898_v5  ;;  %v6970_v5 = vld [vmem:[#allocation35 + $0x54c] ss:$28 sps:$4 sm:$0xff]  }
 0x9c6   :  { %4962 = vmatpush1.bf16.msra.mxu1 %v6899_v6  ;;  %v6973_v6 = vld [vmem:[#allocation35 + $0xa54] ss:$28 sps:$4 sm:$0xff]  }
 0x9c7   :  { %4937 = vmatpush2.bf16.msra.mxu0 %v6896_v7  ;;  %4963 = vmatprep.subr.bf16.mxu1 %v6907_v8  ;;  %v6968_v7 = vld [vmem:[#allocation35 + $0x548] ss:$28 sps:$4 sm:$0xff]   ;;  %v6971_v8 = vld [vmem:[#allocation35 + $0xa50] ss:$28 sps:$4 sm:$0xff]  }
 0x9c8   :  { %4938 = vmatprep.subr.bf16.mxu0 %v6904_v9  ;;  %v6979_v9 = vld [vmem:[#allocation35 + $0xa8c] ss:$28 sps:$4 sm:$0xff]  }
 0x9ca   :  { %4964 = vmatpush1.bf16.msra.mxu1 %v6905_v10  ;;  %v6976_v10 = vld [vmem:[#allocation35 + $0xa1c] ss:$28 sps:$4 sm:$0xff]  }
 0x9cb   :  { %4939 = vmatpush2.bf16.msra.mxu0 %v6902_v11  ;;  %4965 = vmatprep.subr.bf16.mxu1 %v6913_v12  ;;  %v6977_v11 = vld [vmem:[#allocation35 + $0xa88] ss:$28 sps:$4 sm:$0xff]   ;;  %v6974_v12 = vld [vmem:[#allocation35 + $0xa18] ss:$28 sps:$4 sm:$0xff]  }
 0x9cc   :  { %4940 = vmatprep.subr.bf16.mxu0 %v6910_v13  ;;  %v6985_v13 = vld [vmem:[#allocation35 + $0x19c] ss:$28 sps:$4 sm:$0xff]  }
 0x9ce   :  { %4966 = vmatpush1.bf16.msra.mxu1 %v6911_v17  ;;  %v6982_v17 = vld [vmem:[#allocation35 + $0x9e4] ss:$28 sps:$4 sm:$0xff]  }
 0x9cf   :  { %4941 = vmatpush2.bf16.msra.mxu0 %v6908_v18  ;;  %4967 = vmatprep.subr.bf16.mxu1 %v6919_v21  ;;  %v6980_v18 = vld [vmem:[#allocation35 + $0x9e0] ss:$28 sps:$4 sm:$0xff]   ;;  %v6988_v21 = vld [vmem:[#allocation35 + $0x9ac] ss:$28 sps:$4 sm:$0xff]  }
 0x9d0   :  { %4942 = vmatprep.subr.bf16.mxu0 %v6916_v22  ;;  %v6983_v22 = vld [vmem:[#allocation35 + $0x198] ss:$28 sps:$4 sm:$0xff]  }
 0x9d2   :  { %4968 = vmatpush1.bf16.msra.mxu1 %v6917_v23  ;;  %v6986_v23 = vld [vmem:[#allocation35 + $0x9a8] ss:$28 sps:$4 sm:$0xff]  }
 0x9d3   :  { %4943 = vmatpush2.bf16.msra.mxu0 %v6914_v24  ;;  %4969 = vmatprep.subr.bf16.mxu1 %v6922_v25  ;;  %v6991_v24 = vld [vmem:[#allocation35 + $0x164] ss:$28 sps:$4 sm:$0xff]   ;;  %v6994_v25 = vld [vmem:[#allocation35 + $0x974] ss:$28 sps:$4 sm:$0xff]  }
 0x9d4   :  { %4998 = vmatprep.subr.bf16.mxu0 %v6925_v26  ;;  %v6989_v26 = vld [vmem:[#allocation35 + $0x160] ss:$28 sps:$4 sm:$0xff]  }
 0x9d6   :  { %4945 = vmatmul.mubr.bf16.vlgmr.msra.gmra.mxu0 %v8313_v19  ;;  %4970 = vmatpush1.bf16.msra.mxu1 %v6920_v27  ;;  %v6992_v27 = vld [vmem:[#allocation35 + $0x970] ss:$28 sps:$4 sm:$0xff]  }
 0x9d7   :  { %4999 = vmatpush1.bf16.msra.mxu0 %v6923_v28  ;;  %5030 = vmatprep.mubr.bf16.mxu0 %v8336_v3  ;;  %v6997_v28 = vld [vmem:[#allocation35 + $0x12c] ss:$28 sps:$4 sm:$0xff]  }
 0x9d8   :  { %4971 = vmatprep.subr.bf16.mxu1 %v6928_v31  ;;  %5000 = vmatprep.subr.bf16.mxu0 %v6931_v33  ;;  %v7000_v31 = vld [vmem:[#allocation35 + $0x93c] ss:$28 sps:$4 sm:$0xff]   ;;  %v6995_v33 = vld [vmem:[#allocation35 + $0x128] ss:$28 sps:$4 sm:$0xff]  }
 0x9da   :  { %4972 = vmatpush2.bf16.msra.mxu1 %v6926_v34  ;;  %v6998_v34 = vld [vmem:[#allocation35 + $0x938] ss:$28 sps:$4 sm:$0xff]  }
 0x9db   :  { %5001 = vmatpush1.bf16.msra.mxu0 %v6929_v36  ;;  %4973 = vmatprep.subr.bf16.mxu1 %v6934_v37  ;;  %v7003_v36 = vld [vmem:[#allocation35 + $0xf4] ss:$28 sps:$4 sm:$0xff]   ;;  %v7006_v37 = vld [vmem:[#allocation35 + $0x904] ss:$28 sps:$4 sm:$0xff]  }
 0x9dc   :  { %5002 = vmatprep.subr.bf16.mxu0 %v6937_v39  ;;  %v7001_v39 = vld [vmem:[#allocation35 + $0xf0] ss:$28 sps:$4 sm:$0xff]  }
 0x9de   :  { %4974 = vmatpush2.bf16.msra.mxu1 %v6932_v40  ;;  %v7004_v40 = vld [vmem:[#allocation35 + $0x900] ss:$28 sps:$4 sm:$0xff]  }
 0x9df   :  { %5003 = vmatpush1.bf16.msra.mxu0 %v6935_v41  ;;  %4975 = vmatprep.subr.bf16.mxu1 %v6940_v42  ;;  %v7009_v41 = vld [vmem:[#allocation35 + $0xbc] ss:$28 sps:$4 sm:$0xff]   ;;  %v7012_v42 = vld [vmem:[#allocation35 + $0x8cc] ss:$28 sps:$4 sm:$0xff]  }
 0x9e0   :  { %5004 = vmatprep.subr.bf16.mxu0 %v6943_v44  ;;  %v7007_v44 = vld [vmem:[#allocation35 + $0xb8] ss:$28 sps:$4 sm:$0xff]  }
 0x9e2   :  { %4976 = vmatpush2.bf16.msra.mxu1 %v6938_v49  ;;  %v7010_v49 = vld [vmem:[#allocation35 + $0x8c8] ss:$28 sps:$4 sm:$0xff]  }
 0x9e3   :  { %5005 = vmatpush1.bf16.msra.mxu0 %v6941_v50  ;;  %4977 = vmatprep.subr.bf16.mxu1 %v6946_v51  ;;  %v7015_v50 = vld [vmem:[#allocation35 + $0x84] ss:$28 sps:$4 sm:$0xff]   ;;  %v7018_v51 = vld [vmem:[#allocation35 + $0x51c] ss:$28 sps:$4 sm:$0xff]  }
 0x9e4   :  { %5006 = vmatprep.subr.bf16.mxu0 %v6949_v52  ;;  %v7013_v52 = vld [vmem:[#allocation35 + $0x80] ss:$28 sps:$4 sm:$0xff]  }
 0x9e6   :  { %4978 = vmatpush2.bf16.msra.mxu1 %v6944_v53  ;;  %v7016_v53 = vld [vmem:[#allocation35 + $0x518] ss:$28 sps:$4 sm:$0xff]  }
 0x9e7   :  { %5007 = vmatpush1.bf16.msra.mxu0 %v6947_v47  ;;  %4979 = vmatprep.subr.bf16.mxu1 %v6952_v54  ;;  %v7021_v47 = vld [vmem:[#allocation35 + $0x4c] ss:$28 sps:$4 sm:$0xff]   ;;  %v7024_v54 = vld [vmem:[#allocation35 + $0x4e4] ss:$28 sps:$4 sm:$0xff]  }
 0x9e8   :  { %5008 = vmatprep.subr.bf16.mxu0 %v6955_v48  ;;  %v7019_v48 = vld [vmem:[#allocation35 + $0x48] ss:$28 sps:$4 sm:$0xff]  }
 0x9ea   :  { %4980 = vmatpush2.bf16.msra.mxu1 %v6950_v56  ;;  %v7022_v56 = vld [vmem:[#allocation35 + $0x4e0] ss:$28 sps:$4 sm:$0xff]  }
 0x9eb   :  { %5009 = vmatpush1.bf16.msra.mxu0 %v6953_v57  ;;  %4981 = vmatprep.subr.bf16.mxu1 %v6958_v35  ;;  %v7027_v57 = vld [vmem:[#allocation35 + $0x14] ss:$28 sps:$4 sm:$0xff]   ;;  %v7030_v35 = vld [vmem:[#allocation35 + $0x4ac] ss:$28 sps:$4 sm:$0xff]  }
 0x9ec   :  { %5010 = vmatprep.subr.bf16.mxu0 %v6961_v58  ;;  %v7025_v58 = vld [vmem:[#allocation35 + $0x10] ss:$28 sps:$4 sm:$0xff]  }
 0x9ee   :  { %4982 = vmatpush2.bf16.msra.mxu1 %v6956_v59  ;;  %v7028_v59 = vld [vmem:[#allocation35 + $0x4a8] ss:$28 sps:$4 sm:$0xff]  }
 0x9ef   :  { %5011 = vmatpush1.bf16.msra.mxu0 %v6959_v60  ;;  %4983 = vmatprep.subr.bf16.mxu1 %v6964_v62  ;;  %v7033_v60 = vld [vmem:[#allocation35 + $0x35c] ss:$28 sps:$4 sm:$0xff]   ;;  %v7036_v62 = vld [vmem:[#allocation35 + $0x474] ss:$28 sps:$4 sm:$0xff]  }
 0x9f0   :  { %5012 = vmatprep.subr.bf16.mxu0 %v6967_v63  ;;  %v7031_v63 = vld [vmem:[#allocation35 + $0x358] ss:$28 sps:$4 sm:$0xff]  }
 0x9f2   :  { %4984 = vmatpush2.bf16.msra.mxu1 %v6962_v2  ;;  %v7034_v2 = vld [vmem:[#allocation35 + $0x470] ss:$28 sps:$4 sm:$0xff]  }
 0x9f3   :  { %5013 = vmatpush1.bf16.msra.mxu0 %v6965_v4  ;;  %4985 = vmatprep.subr.bf16.mxu1 %v6970_v5  ;;  %v7039_v4 = vld [vmem:[#allocation35 + $0x324] ss:$28 sps:$4 sm:$0xff]   ;;  %v7042_v5 = vld [vmem:[#allocation35 + $0x43c] ss:$28 sps:$4 sm:$0xff]  }
 0x9f4   :  { %5014 = vmatprep.subr.bf16.mxu0 %v6973_v6  ;;  %v7037_v6 = vld [vmem:[#allocation35 + $0x320] ss:$28 sps:$4 sm:$0xff]  }
 0x9f6   :  { %4986 = vmatpush2.bf16.msra.mxu1 %v6968_v7  ;;  %v7040_v7 = vld [vmem:[#allocation35 + $0x438] ss:$28 sps:$4 sm:$0xff]  }
 0x9f7   :  { %5015 = vmatpush2.bf16.msra.mxu0 %v6971_v8  ;;  %5055 = vmatprep.subr.bf16.mxu1 %v6979_v9  ;;  %v7045_v8 = vld [vmem:[#allocation35 + $0x2ec] ss:$28 sps:$4 sm:$0xff]   ;;  %v7048_v9 = vld [vmem:[#allocation35 + $0x404] ss:$28 sps:$4 sm:$0xff]  }
 0x9f8   :  { %5016 = vmatprep.subr.bf16.mxu0 %v6976_v10  ;;  %v7043_v10 = vld [vmem:[#allocation35 + $0x2e8] ss:$28 sps:$4 sm:$0xff]  }
 0x9f9   :  { %4988 = vmatmul.mubr.bf16.vlgmr.msra.gmra.mxu1 %v8315_v20 }
 0x9fa   :  { %5056 = vmatpush1.bf16.msra.mxu1 %v6977_v11  ;;  %5073 = vmatprep.mubr.bf16.mxu1 %v7787_v38  ;;  %v7046_v11 = vld [vmem:[#allocation35 + $0x400] ss:$28 sps:$4 sm:$0xff]  }
 0x9fb   :  { %5017 = vmatpush2.bf16.msra.mxu0 %v6974_v12  ;;  %5084 = vmatprep.subr.bf16.mxu1 %v6985_v13  ;;  %v7051_v12 = vld [vmem:[#allocation35 + $0x2b4] ss:$28 sps:$4 sm:$0xff]   ;;  %v7054_v13 = vld [vmem:[#allocation35 + $0x3cc] ss:$28 sps:$4 sm:$0xff]  }
 0x9fc   :  { %5018 = vmatprep.subr.bf16.mxu0 %v6982_v17  ;;  %v7049_v17 = vld [vmem:[#allocation35 + $0x2b0] ss:$28 sps:$4 sm:$0xff]  }
 0x9ff   :  { %5019 = vmatpush2.bf16.msra.mxu0 %v6980_v18  ;;  %v7052_v18 = vld [vmem:[#allocation35 + $0x3c8] ss:$28 sps:$4 sm:$0xff]  }
 0xa00   :  { %5020 = vmatprep.subr.bf16.mxu0 %v6988_v21  ;;  %v7057_v21 = vld [vmem:[#allocation35 + $0x27c] ss:$28 sps:$4 sm:$0xff]  }
 0xa01   :  { %6076 = vmatmul.mubr.msk.bf16.vlgmr.msra.gmra.mxu1 %vm791_vm1, %v8334_v61 }
 0xa02   :  { %5085 = vmatpush1.bf16.msra.mxu1 %v6983_v22  ;;  %5116 = vmatprep.mubr.bf16.mxu1 %v8309_v15  ;;  %v7060_v22 = vld [vmem:[#allocation35 + $0x394] ss:$28 sps:$4 sm:$0xff]  }
 0xa03   :  { %5021 = vmatpush2.bf16.msra.mxu0 %v6986_v23  ;;  %5086 = vmatprep.subr.bf16.mxu1 %v6991_v24  ;;  %v7055_v23 = vld [vmem:[#allocation35 + $0x278] ss:$28 sps:$4 sm:$0xff]   ;;  %v7058_v24 = vld [vmem:[#allocation35 + $0x390] ss:$28 sps:$4 sm:$0xff]  }
 0xa04   :  { %5022 = vmatprep.subr.bf16.mxu0 %v6994_v25  ;;  %v7063_v25 = vld [vmem:[#allocation35 + $0x244] ss:$28 sps:$4 sm:$0xff]  }
 0xa06   :  { %5087 = vmatpush1.bf16.msra.mxu1 %v6989_v26  ;;  %v7066_v26 = vld [vmem:[#allocation35 + $0x6dc] ss:$28 sps:$4 sm:$0xff]  }
 0xa07   :  { %5023 = vmatpush2.bf16.msra.mxu0 %v6992_v27  ;;  %5088 = vmatprep.subr.bf16.mxu1 %v6997_v28  ;;  %v7061_v27 = vld [vmem:[#allocation35 + $0x240] ss:$28 sps:$4 sm:$0xff]   ;;  %v7064_v28 = vld [vmem:[#allocation35 + $0x6d8] ss:$28 sps:$4 sm:$0xff]  }
 0xa08   :  { %5024 = vmatprep.subr.bf16.mxu0 %v7000_v31  ;;  %v7069_v31 = vld [vmem:[#allocation35 + $0x20c] ss:$28 sps:$4 sm:$0xff]  }
 0xa0a   :  { %5089 = vmatpush1.bf16.msra.mxu1 %v6995_v33  ;;  %v7072_v33 = vld [vmem:[#allocation35 + $0x6a4] ss:$28 sps:$4 sm:$0xff]  }
 0xa0b   :  { %5025 = vmatpush2.bf16.msra.mxu0 %v6998_v34  ;;  %5090 = vmatprep.subr.bf16.mxu1 %v7003_v36  ;;  %v7067_v34 = vld [vmem:[#allocation35 + $0x208] ss:$28 sps:$4 sm:$0xff]   ;;  %v7070_v36 = vld [vmem:[#allocation35 + $0x6a0] ss:$28 sps:$4 sm:$0xff]  }
 0xa0c   :  { %5026 = vmatprep.subr.bf16.mxu0 %v7006_v37  ;;  %v7075_v37 = vld [vmem:[#allocation35 + $0x1d4] ss:$28 sps:$4 sm:$0xff]  }
 0xa0e   :  { %5091 = vmatpush1.bf16.msra.mxu1 %v7001_v39  ;;  %v7078_v39 = vld [vmem:[#allocation35 + $0x66c] ss:$28 sps:$4 sm:$0xff]  }
 0xa0f   :  { %5027 = vmatpush2.bf16.msra.mxu0 %v7004_v40  ;;  %5092 = vmatprep.subr.bf16.mxu1 %v7009_v41  ;;  %v7073_v40 = vld [vmem:[#allocation35 + $0x1d0] ss:$28 sps:$4 sm:$0xff]   ;;  %v7076_v41 = vld [vmem:[#allocation35 + $0x668] ss:$28 sps:$4 sm:$0xff]  }
 0xa10   :  { %5028 = vmatprep.subr.bf16.mxu0 %v7012_v42  ;;  %v7081_v42 = vld [vmem:[#allocation35 + $0x89c] ss:$28 sps:$4 sm:$0xff]  }
 0xa12   :  { %5093 = vmatpush1.bf16.msra.mxu1 %v7007_v44  ;;  %v7084_v44 = vld [vmem:[#allocation35 + $0x634] ss:$28 sps:$4 sm:$0xff]  }
 0xa13   :  { %5029 = vmatpush2.bf16.msra.mxu0 %v7010_v49  ;;  %5094 = vmatprep.subr.bf16.mxu1 %v7015_v50  ;;  %v7079_v49 = vld [vmem:[#allocation35 + $0x898] ss:$28 sps:$4 sm:$0xff]   ;;  %v7082_v50 = vld [vmem:[#allocation35 + $0x630] ss:$28 sps:$4 sm:$0xff]  }
 0xa14   :  { %5127 = vmatprep.subr.bf16.mxu0 %v7018_v51  ;;  %v7087_v51 = vld [vmem:[#allocation35 + $0x864] ss:$28 sps:$4 sm:$0xff]  }
 0xa16   :  { %5031 = vmatmul.mubr.bf16.vlgmr.msra.gmra.mxu0 %v8348_v55  ;;  %5095 = vmatpush1.bf16.msra.mxu1 %v7013_v52  ;;  %v7090_v52 = vld [vmem:[#allocation35 + $0x5fc] ss:$28 sps:$4 sm:$0xff]  }
 0xa17   :  { %5128 = vmatpush1.bf16.msra.mxu0 %v7016_v53  ;;  %5159 = vmatprep.mubr.bf16.mxu0 %v8311_v16  ;;  %v7085_v53 = vld [vmem:[#allocation35 + $0x860] ss:$28 sps:$4 sm:$0xff]  }
 0xa18   :  { %5096 = vmatprep.subr.bf16.mxu1 %v7021_v47  ;;  %5129 = vmatprep.subr.bf16.mxu0 %v7024_v54  ;;  %v7088_v47 = vld [vmem:[#allocation35 + $0x5f8] ss:$28 sps:$4 sm:$0xff]   ;;  %v7093_v54 = vld [vmem:[#allocation35 + $0x82c] ss:$28 sps:$4 sm:$0xff]  }
 0xa1a   :  { %5097 = vmatpush1.bf16.msra.mxu1 %v7019_v48  ;;  %v7096_v48 = vld [vmem:[#allocation35 + $0x5c4] ss:$28 sps:$4 sm:$0xff]  }
 0xa1b   :  { %5130 = vmatpush1.bf16.msra.mxu0 %v7022_v56  ;;  %5098 = vmatprep.subr.bf16.mxu1 %v7027_v57  ;;  %v7091_v56 = vld [vmem:[#allocation35 + $0x828] ss:$28 sps:$4 sm:$0xff]   ;;  %v7094_v57 = vld [vmem:[#allocation35 + $0x5c0] ss:$28 sps:$4 sm:$0xff]  }
 0xa1c   :  { %5131 = vmatprep.subr.bf16.mxu0 %v7030_v35  ;;  %v7099_v35 = vld [vmem:[#allocation35 + $0x7f4] ss:$28 sps:$4 sm:$0xff]  }
 0xa1e   :  { %5099 = vmatpush1.bf16.msra.mxu1 %v7025_v58  ;;  %v7102_v58 = vld [vmem:[#allocation35 + $0x58c] ss:$28 sps:$4 sm:$0xff]  }
 0xa1f   :  { %5132 = vmatpush1.bf16.msra.mxu0 %v7028_v59  ;;  %5100 = vmatprep.subr.bf16.mxu1 %v7033_v60  ;;  %v7097_v59 = vld [vmem:[#allocation35 + $0x7f0] ss:$28 sps:$4 sm:$0xff]   ;;  %v7100_v60 = vld [vmem:[#allocation35 + $0x588] ss:$28 sps:$4 sm:$0xff]  }
 0xa20   :  { %5133 = vmatprep.subr.bf16.mxu0 %v7036_v62  ;;  %v7105_v62 = vld [vmem:[#allocation35 + $0x7bc] ss:$28 sps:$4 sm:$0xff]  }
 0xa22   :  { %5101 = vmatpush2.bf16.msra.mxu1 %v7031_v63  ;;  %v7108_v63 = vld [vmem:[#allocation35 + $0x554] ss:$28 sps:$4 sm:$0xff]  }
 0xa23   :  { %5134 = vmatpush1.bf16.msra.mxu0 %v7034_v2  ;;  %5102 = vmatprep.subr.bf16.mxu1 %v7039_v4  ;;  %v7103_v2 = vld [vmem:[#allocation35 + $0x7b8] ss:$28 sps:$4 sm:$0xff]   ;;  %v7106_v4 = vld [vmem:[#allocation35 + $0x550] ss:$28 sps:$4 sm:$0xff]  }
 0xa24   :  { %5135 = vmatprep.subr.bf16.mxu0 %v7042_v5  ;;  %v7111_v5 = vld [vmem:[#allocation35 + $0x784] ss:$28 sps:$4 sm:$0xff]  }
 0xa26   :  { %5103 = vmatpush2.bf16.msra.mxu1 %v7037_v6  ;;  %v7114_v6 = vld [vmem:[#allocation35 + $0xa94] ss:$28 sps:$4 sm:$0xff]  }
 0xa27   :  { %5136 = vmatpush1.bf16.msra.mxu0 %v7040_v7  ;;  %5104 = vmatprep.subr.bf16.mxu1 %v7045_v8  ;;  %v7109_v7 = vld [vmem:[#allocation35 + $0x780] ss:$28 sps:$4 sm:$0xff]   ;;  %v7112_v8 = vld [vmem:[#allocation35 + $0xa90] ss:$28 sps:$4 sm:$0xff]  }
 0xa28   :  { %5137 = vmatprep.subr.bf16.mxu0 %v7048_v9  ;;  %v7117_v9 = vld [vmem:[#allocation35 + $0x74c] ss:$28 sps:$4 sm:$0xff]  }
 0xa2a   :  { %5105 = vmatpush2.bf16.msra.mxu1 %v7043_v10  ;;  %v7121_v10 = vld [vmem:[#allocation35 + $0x360] ss:$28 sps:$4 sm:$0xff]  }
 0xa2b   :  { %5138 = vmatpush1.bf16.msra.mxu0 %v7046_v11  ;;  %5106 = vmatprep.subr.bf16.mxu1 %v7051_v12  ;;  %v7115_v11 = vld [vmem:[#allocation35 + $0x748] ss:$28 sps:$4 sm:$0xff]   ;;  %v7120_v12 = vld [vmem:[#allocation35 + $0x714] ss:$28 sps:$4 sm:$0xff]  }
 0xa2c   :  { %5139 = vmatprep.subr.bf16.mxu0 %v7054_v13  ;;  %v7118_v13 = vld [vmem:[#allocation35 + $0x710] ss:$28 sps:$4 sm:$0xff]  }
 0xa2e   :  { %5107 = vmatpush2.bf16.msra.mxu1 %v7049_v17  ;;  %v7122_v17 = vld [vmem:[#allocation35 + $0x1a0] ss:$28 sps:$4 sm:$0xff]  }
 0xa2f   :  { %5140 = vmatpush1.bf16.msra.mxu0 %v7052_v18  ;;  %5108 = vmatprep.subr.bf16.mxu1 %v7057_v21  ;;  %v7125_v18 = vld [vmem:[#allocation35 + $0xa5c] ss:$28 sps:$4 sm:$0xff]   ;;  %v7126_v21 = vld [vmem:[#allocation35 + $0x328] ss:$28 sps:$4 sm:$0xff]  }
 0xa30   :  { %5141 = vmatprep.subr.bf16.mxu0 %v7060_v22  ;;  %v7123_v22 = vld [vmem:[#allocation35 + $0xa58] ss:$28 sps:$4 sm:$0xff]  }
 0xa32   :  { %5109 = vmatpush2.bf16.msra.mxu1 %v7055_v23  ;;  %v7127_v23 = vld [vmem:[#allocation35 + $0x168] ss:$28 sps:$4 sm:$0xff]  }
 0xa33   :  { %5142 = vmatpush1.bf16.msra.mxu0 %v7058_v24  ;;  %5110 = vmatprep.subr.bf16.mxu1 %v7063_v25  ;;  %v7130_v24 = vld [vmem:[#allocation35 + $0xa24] ss:$28 sps:$4 sm:$0xff]  }
 0xa34   :  { %5143 = vmatprep.subr.bf16.mxu0 %v7066_v26  ;;  %v7128_v25 = vld [vmem:[#allocation35 + $0xa20] ss:$28 sps:$4 sm:$0xff]   ;;  %v7132_v26 = vld [vmem:[#allocation35 + $0x130] ss:$28 sps:$4 sm:$0xff]  }
 0xa36   :  { %5111 = vmatpush2.bf16.msra.mxu1 %v7061_v27  ;;  %v7135_v27 = vld [vmem:[#allocation35 + $0x9ec] ss:$28 sps:$4 sm:$0xff]  }
 0xa37   :  { %5144 = vmatpush2.bf16.msra.mxu0 %v7064_v28  ;;  %5112 = vmatprep.subr.bf16.mxu1 %v7069_v31  ;;  %v7136_v28 = vld [vmem:[#allocation35 + $0x2b8] ss:$28 sps:$4 sm:$0xff]   ;;  %v7133_v31 = vld [vmem:[#allocation35 + $0x9e8] ss:$28 sps:$4 sm:$0xff]  }
 0xa38   :  { %5145 = vmatprep.subr.bf16.mxu0 %v7072_v33 }
 0xa39   :  { %v4817_v33 = vpop.f32.mrf.mxu0 }
 0xa3a   :  { %5113 = vmatpush2.bf16.msra.mxu1 %v7067_v34  ;;  %v7137_v34 = vld [vmem:[#allocation35 + $0xf8] ss:$28 sps:$4 sm:$0xff]  }
 0xa3b   :  { %5146 = vmatpush2.bf16.msra.mxu0 %v7070_v36  ;;  %5114 = vmatprep.subr.bf16.mxu1 %v7075_v37  ;;  %v7141_v36 = vld [vmem:[#allocation35 + $0x280] ss:$28 sps:$4 sm:$0xff]   ;;  %v7138_v37 = vld [vmem:[#allocation35 + $0x9b0] ss:$28 sps:$4 sm:$0xff]  }
 0xa3c   :  { %5147 = vmatprep.subr.bf16.mxu0 %v7078_v39  ;;  %v4774_v39 = vpop.f32.mrf.mxu1 }
 0xa3e   :  { %5115 = vmatpush2.bf16.msra.mxu1 %v7073_v40  ;;  %v4819_v40 = vpop.f32.mrf.mxu0 }
 0xa3f   :  { %5148 = vmatpush2.bf16.msra.mxu0 %v7076_v41  ;;  %5170 = vmatprep.subr.bf16.mxu1 %v7081_v42  ;;  %v7142_v41 = vld [vmem:[#allocation35 + $0xc0] ss:$28 sps:$4 sm:$0xff]  }
 0xa40   :  { %5149 = vmatprep.subr.bf16.mxu0 %v7084_v44  ;;  %v7145_v42 = vld [vmem:[#allocation35 + $0x97c] ss:$28 sps:$4 sm:$0xff]   ;;  %v7146_v44 = vld [vmem:[#allocation35 + $0x248] ss:$28 sps:$4 sm:$0xff]  }
 0xa41   :  { %5117 = vmatmul.mubr.bf16.vlgmr.msra.gmra.mxu1 %v8313_v19 }
 0xa42   :  { %5171 = vmatpush1.bf16.msra.mxu1 %v7079_v49  ;;  %5202 = vmatprep.mubr.bf16.mxu1 %v8336_v3  ;;  %v8368_v49 = vld [vmem:[#allocation37] sm:$0x7f] }
 0xa43   :  { %5150 = vmatpush2.bf16.msra.mxu0 %v7082_v50  ;;  %5172 = vmatprep.subr.bf16.mxu1 %v7087_v51  ;;  %v7143_v50 = vld [vmem:[#allocation35 + $0x978] ss:$28 sps:$4 sm:$0xff]   ;;  %v4776_v51 = vpop.f32.mrf.mxu1 }
 0xa44   :  { %5151 = vmatprep.subr.bf16.mxu0 %v7090_v52  ;;  %v4821_v52 = vpop.f32.mrf.mxu0 }
 0xa46   :  { %5173 = vmatpush1.bf16.msra.mxu1 %v7085_v53  ;;  %v7147_v53 = vld [vmem:[#allocation35 + $0x88] ss:$28 sps:$4 sm:$0xff]  }
 0xa47   :  { %5152 = vmatpush2.bf16.msra.mxu0 %v7088_v47  ;;  %5174 = vmatprep.subr.bf16.mxu1 %v7093_v54  ;;  %v7150_v47 = vld [vmem:[#allocation35 + $0x944] ss:$28 sps:$4 sm:$0xff]   ;;  %v2941_v54 = vrot.slane %v8368_v49, %v8083_v14 }
 0xa48   :  { %5153 = vmatprep.subr.bf16.mxu0 %v7096_v48  ;;  %v7151_v48 = vld [vmem:[#allocation35 + $0x210] ss:$28 sps:$4 sm:$0xff]   ;;  %v7153_v14 = vld [vmem:[#allocation35 + $0x908] ss:$28 sps:$4 sm:$0xff]  }
 0xa4a   :  { %5175 = vmatpush1.bf16.msra.mxu1 %v7091_v56  ;;  %v2945_v56 = vrot.slane %v8368_v49, %v8079_v1  ;;  %v7160_v1 = vld [vmem:[#allocation35 + $0x8d4] ss:$28 sps:$4 sm:$0xff]  }
 0xa4b   :  { %5154 = vmatpush2.bf16.msra.mxu0 %v7094_v57  ;;  %5176 = vmatprep.subr.bf16.mxu1 %v7099_v35  ;;  %v7148_v57 = vld [vmem:[#allocation35 + $0x940] ss:$28 sps:$4 sm:$0xff]   ;;  %v4778_v35 = vpop.f32.mrf.mxu1 }
 0xa4c   :  { %5155 = vmatprep.subr.bf16.mxu0 %v7102_v58  ;;  %v4823_v58 = vpop.f32.mrf.mxu0 }
 0xa4e   :  { %5177 = vmatpush1.bf16.msra.mxu1 %v7097_v59  ;;  %v7152_v59 = vld [vmem:[#allocation35 + $0x50] ss:$28 sps:$4 sm:$0xff]  }
 0xa4f   :  { %5156 = vmatpush2.bf16.msra.mxu0 %v7100_v60  ;;  %5178 = vmatprep.subr.bf16.mxu1 %v7105_v62  ;;  %v7155_v60 = vld [vmem:[#allocation35 + $0x90c] ss:$28 sps:$4 sm:$0xff]   ;;  %v4775_v62 = vadd.f32 %v4774_v39, %v2941_v54 }
 0xa50   :  { %5157 = vmatprep.subr.bf16.mxu0 %v7108_v63  ;;  %v7156_v63 = vld [vmem:[#allocation35 + $0x1d8] ss:$28 sps:$4 sm:$0xff]   ;;  %v7165_v39 = vld [vmem:[#allocation35 + $0x4e8] ss:$28 sps:$4 sm:$0xff]  }
 0xa52   :  { %5179 = vmatpush1.bf16.msra.mxu1 %v7103_v2 }
 0xa53   :  { %5158 = vmatpush2.bf16.msra.mxu0 %v7106_v4  ;;  %5180 = vmatprep.subr.bf16.mxu1 %v7111_v5  ;;  %v4777_v4 = vadd.f32 %v4776_v51, %v2945_v56  ;;  %v4780_v5 = vpop.f32.mrf.mxu1  ;;  %v7167_v51 = vld [vmem:[#allocation35 + $0x670] ss:$28 sps:$4 sm:$0xff]  }
 0xa54   :  { %5227 = vmatprep.subr.bf16.mxu0 %v7114_v6  ;;  %v7157_v6 = vld [vmem:[#allocation35 + $0x18] ss:$28 sps:$4 sm:$0xff]  }
 0xa56   :  { %5160 = vmatmul.mubr.bf16.vlgmr.msra.gmra.mxu0 %v8315_v20  ;;  %5181 = vmatpush1.bf16.msra.mxu1 %v7109_v7  ;;  %v4903_v2 = vpop.f32.mrf.mxu0  ;;  %v4818_v7 = vadd.f32 %v4817_v33, %v4775_v62  ;;  %v7176_v62 = vld [vmem:[#allocation35 + $0x9b8] ss:$28 sps:$4 sm:$0xff]  }
 0xa57   :  { %5182 = vmatprep.subr.bf16.mxu1 %v7117_v9  ;;  %5228 = vmatpush1.bf16.msra.mxu0 %v7112_v8  ;;  %v4779_v8 = vadd.f32 %v4778_v35, %v2941_v54  ;;  %v7161_v9 = vld [vmem:[#allocation35 + $0x6e0] ss:$28 sps:$4 sm:$0xff]   ;;  %v7169_v54 = vld [vmem:[#allocation35 + $0x4b0] ss:$28 sps:$4 sm:$0xff]   ;;  %v7171_v35 = vld [vmem:[#allocation35 + $0x638] ss:$28 sps:$4 sm:$0xff]  }
 0xa58   :  { %5245 = vmatprep.mubr.bf16.mxu0 %v7787_v38  ;;  %6219 = vmatprep.subr.bf16.mxu0 %v7121_v10  ;;  %v7131_v38 = vld [vmem:[#allocation35 + $0x2f0] ss:$28 sps:$4 sm:$0xff]   ;;  %v4905_v10 = vpop.f32.mrf.mxu0 }
 0xa5a   :  { %5183 = vmatpush1.bf16.msra.mxu1 %v7115_v11 }
 0xa5b   :  { %5184 = vmatprep.subr.bf16.mxu1 %v7120_v12  ;;  %v4820_v12 = vadd.f32 %v4819_v40, %v4777_v4  ;;  %v7168_v40 = vld [vmem:[#allocation35 + $0xa28] ss:$28 sps:$4 sm:$0xff]   ;;  %v7180_v4 = vld [vmem:[#allocation35 + $0x980] ss:$28 sps:$4 sm:$0xff]  }
 0xa5e   :  { %5185 = vmatpush1.bf16.msra.mxu1 %v7118_v13  ;;  %6077 = vmatmul.mubr.msk.bf16.vlgmr.msra.gmra.mxu0 %vm791_vm1, %v8334_v61  ;;  %v4781_v13 = vadd.f32 %v4780_v5, %v2945_v56  ;;  %v7182_v5 = vld [vmem:[#allocation35 + $0x7c0] ss:$28 sps:$4 sm:$0xff]  }
 0xa5f   :  { %6220 = vmatpush3.bf16.msra.mxu0 %v7122_v17  ;;  %5288 = vmatprep.mubr.bf16.mxu0 %v8309_v15  ;;  %v7140_v15 = vld [vmem:[#allocation35 + $0x9b4] ss:$28 sps:$4 sm:$0xff]  }
 0xa60   :  { %5186 = vmatprep.subr.bf16.mxu1 %v7125_v18  ;;  %6221 = vmatprep.subr.bf16.mxu0 %v7126_v21  ;;  %v7158_v18 = vld [vmem:[#allocation35 + $0x8d0] ss:$28 sps:$4 sm:$0xff]  }
 0xa62   :  { %5187 = vmatpush2.bf16.msra.mxu1 %v7123_v22  ;;  %v7162_v22 = vld [vmem:[#allocation35 + $0x520] ss:$28 sps:$4 sm:$0xff]  }
 0xa63   :  { %6222 = vmatpush3.bf16.msra.mxu0 %v7127_v23  ;;  %5188 = vmatprep.subr.bf16.mxu1 %v7130_v24  ;;  %v4822_v23 = vadd.f32 %v4821_v52, %v4779_v8 }
 0xa64   :  { %6223 = vmatprep.subr.bf16.mxu0 %v7131_v38 }
 0xa66   :  { %5189 = vmatpush2.bf16.msra.mxu1 %v7128_v25  ;;  %v7163_v25 = vld [vmem:[#allocation35 + $0x6a8] ss:$28 sps:$4 sm:$0xff]  }
 0xa67   :  { %6224 = vmatpush3.bf16.msra.mxu0 %v7132_v26  ;;  %5190 = vmatprep.subr.bf16.mxu1 %v7135_v27  ;;  %v7164_v26 = vld [vmem:[#allocation35 + $0xa60] ss:$28 sps:$4 sm:$0xff]   ;;  %v4907_v27 = vpop.f32.mrf.mxu0 }
 0xa68   :  { %6225 = vmatprep.subr.bf16.mxu0 %v7136_v28 }
 0xa69   :  { %v4909_v52 = vpop.f32.mrf.mxu0 }
 0xa6a   :  { %5191 = vmatpush2.bf16.msra.mxu1 %v7133_v31  ;;  %v4824_v31 = vadd.f32 %v4823_v58, %v4781_v13  ;;  %v7186_v13 = vld [vmem:[#allocation35 + $0x788] ss:$28 sps:$4 sm:$0xff]  }
 0xa6b   :  { %6226 = vmatpush3.bf16.msra.mxu0 %v7137_v34  ;;  %5192 = vmatprep.subr.bf16.mxu1 %v7140_v15 }
 0xa6c   :  { %6227 = vmatprep.subr.bf16.mxu0 %v7141_v36  ;;  %v7166_v36 = vld [vmem:[#allocation35 + $0x8a0] ss:$28 sps:$4 sm:$0xff]  }
 0xa6e   :  { %5193 = vmatpush2.bf16.msra.mxu1 %v7138_v37 }
 0xa6f   :  { %6228 = vmatpush3.bf16.msra.mxu0 %v7142_v41  ;;  %5194 = vmatprep.subr.bf16.mxu1 %v7145_v42 }
 0xa70   :  { %6229 = vmatprep.subr.bf16.mxu0 %v7146_v44 }
 0xa72   :  { %5195 = vmatpush2.bf16.msra.mxu1 %v7143_v50 }
 0xa73   :  { %6230 = vmatpush3.bf16.msra.mxu0 %v7147_v53  ;;  %5196 = vmatprep.subr.bf16.mxu1 %v7150_v47 }
 0xa74   :  { %6231 = vmatprep.subr.bf16.mxu0 %v7151_v48  ;;  %v7172_v48 = vld [vmem:[#allocation35 + $0x9f0] ss:$28 sps:$4 sm:$0xff]  }
 0xa76   :  { %5197 = vmatpush2.bf16.msra.mxu1 %v7148_v57 }
 0xa77   :  { %6232 = vmatpush3.bf16.msra.mxu0 %v7152_v59  ;;  %5198 = vmatprep.subr.bf16.mxu1 %v7155_v60  ;;  %v7174_v59 = vld [vmem:[#allocation35 + $0x830] ss:$28 sps:$4 sm:$0xff]   ;;  %v7173_v60 = vld [vmem:[#allocation35 + $0x478] ss:$28 sps:$4 sm:$0xff]  }
 0xa78   :  { %6233 = vmatprep.subr.bf16.mxu0 %v7156_v63  ;;  %v7178_v63 = vld [vmem:[#allocation35 + $0x7f8] ss:$28 sps:$4 sm:$0xff]  }
 0xa79   :  { %v4860_v11 = vpop.f32.mrf.mxu1 }
 0xa7a   :  { %v4861_v17 = vadd.f32 %v4860_v11, %v4818_v7  ;;  %5199 = vmatpush2.bf16.msra.mxu1 %v7153_v14  ;;  %v7179_v14 = vld [vmem:[#allocation35 + $0x5c8] ss:$28 sps:$4 sm:$0xff]  }
 0xa7b   :  { %6234 = vmatpush3.bf16.msra.mxu0 %v7157_v6  ;;  %v4862_v21 = vpop.f32.mrf.mxu1  ;;  %5200 = vmatprep.subr.bf16.mxu1 %v7160_v1  ;;  %v7181_v1 = vld [vmem:[#allocation35 + $0x408] ss:$28 sps:$4 sm:$0xff]  }
 0xa7c   :  { %v4904_v24 = vadd.f32 %v4903_v2, %v4861_v17  ;;  %v4863_v38 = vadd.f32 %v4862_v21, %v4820_v12  ;;  %6241 = vmatprep.subr.bf16.mxu0 %v7161_v9  ;;  %v7177_v2 = vld [vmem:[#allocation35 + $0x440] ss:$28 sps:$4 sm:$0xff]   ;;  %v7184_v7 = vld [vmem:[#allocation35 + $0x948] ss:$28 sps:$4 sm:$0xff]   ;;  %v7183_v9 = vld [vmem:[#allocation35 + $0x590] ss:$28 sps:$4 sm:$0xff]  }
 0xa7d   :  { %v4864_v28 = vpop.f32.mrf.mxu1  ;;  %v7188_v21 = vld [vmem:[#allocation35 + $0x910] ss:$28 sps:$4 sm:$0xff]  }
 0xa7e   :  { %v5420_v33 = vmax.f32 %v4904_v24, 0.0  ;;  %v4906_v34 = vadd.f32 %v4905_v10, %v4863_v38  ;;  %5289 = vmatmul.mubr.bf16.vlgmr.msra.gmra.mxu0 %v8313_v19  ;;  %v4865_v15 = vadd.f32 %v4864_v28, %v4822_v23  ;;  %5201 = vmatpush2.bf16.msra.mxu1 %v7158_v18  ;;  %v7185_v18 = vld [vmem:[#allocation35 + $0x3d0] ss:$28 sps:$4 sm:$0xff]   ;;  %v7187_v24 = vld [vmem:[#allocation35 + $0x558] ss:$28 sps:$4 sm:$0xff]  }
 0xa7f   :  { %6242 = vmatpush3.bf16.msra.mxu0 %v7162_v22  ;;  %5329 = vmatprep.mubr.bf16.mxu0 %v8311_v16  ;;  %v4866_v37 = vpop.f32.mrf.mxu1  ;;  %v7170_v16 = vld [vmem:[#allocation35 + $0x868] ss:$28 sps:$4 sm:$0xff]   ;;  %v7189_v28 = vld [vmem:[#allocation35 + $0x398] ss:$28 sps:$4 sm:$0xff]  }
 0xa80   :  { %v5434_v41 = vmul.f32 0.5, %v5420_v33  ;;  %v5421_v42 = vmax.f32 %v4906_v34, 0.0  ;;  %v4908_v44 = vadd.f32 %v4907_v27, %v4865_v15  ;;  %v4867_v50 = vadd.f32 %v4866_v37, %v4824_v31  ;;  %6243 = vmatprep.subr.bf16.mxu0 %v7163_v25  ;;  %6263 = vmatprep.subr.bf16.mxu1 %v7164_v26  ;;  %v7190_v27 = vld [vmem:[#allocation35 + $0x750] ss:$28 sps:$4 sm:$0xff]   ;;  %v7191_v31 = vld [vmem:[#allocation35 + $0x8d8] ss:$28 sps:$4 sm:$0xff]  }
 0xa81   :  { %5203 = vmatmul.mubr.bf16.vlgmr.msra.gmra.mxu1 %v8348_v55  ;;  %v7192_v34 = vld [vmem:[#allocation35 + $0x718] ss:$28 sps:$4 sm:$0xff]  }
 0xa82   :  { %7198 = vtanh.f32 %v5434_v41  ;;  %v5435_v19 = vmul.f32 0.5, %v5421_v42  ;;  %v5427_v53 = vmax.f32 %v4908_v44, 0.0  ;;  %v4910_v47 = vadd.f32 %v4909_v52, %v4867_v50  ;;  %6264 = vmatpush3.bf16.msra.mxu1 %v7166_v36  ;;  %5370 = vmatprep.mubr.bf16.mxu1 %v8336_v3  ;;  %v7175_v3 = vld [vmem:[#allocation35 + $0x600] ss:$28 sps:$4 sm:$0xff]   ;;  %v7193_v15 = vld [vmem:[#allocation35 + $0xa98] ss:$28 sps:$4 sm:$0xff]  }
 0xa83   :  { %6244 = vmatpush3.bf16.msra.mxu0 %v7165_v39  ;;  %6265 = vmatprep.subr.bf16.mxu1 %v7168_v40 }
 0xa84   :  { %7200 = vtanh.f32 %v5435_v19  ;;  %v5441_v56 = vmul.f32 0.5, %v5427_v53  ;;  %v5428_v57 = vmax.f32 %v4910_v47, 0.0  ;;  %6245 = vmatprep.subr.bf16.mxu0 %v7167_v51 }
 0xa86   :  { %7202 = vtanh.f32 %v5441_v56  ;;  %v5442_v58 = vmul.f32 0.5, %v5428_v57  ;;  %6266 = vmatpush3.bf16.msra.mxu1 %v7170_v16 }
 0xa87   :  { %6246 = vmatpush3.bf16.msra.mxu0 %v7169_v54  ;;  %6267 = vmatprep.subr.bf16.mxu1 %v7172_v48 }
 0xa88   :  { %7204 = vtanh.f32 %v5442_v58  ;;  %6247 = vmatprep.subr.bf16.mxu0 %v7171_v35 }
 0xa8a   :  { %6268 = vmatpush3.bf16.msra.mxu1 %v7174_v59 }
 0xa8b   :  { %6248 = vmatpush3.bf16.msra.mxu0 %v7173_v60  ;;  %6269 = vmatprep.subr.bf16.mxu1 %v7176_v62 }
 0xa8c   :  { %6249 = vmatprep.subr.bf16.mxu0 %v7175_v3 }
 0xa8e   :  { %6270 = vmatpush3.bf16.msra.mxu1 %v7178_v63 }
 0xa8f   :  { %v7199_v6 = vpop.eup %7198  ;;  %6250 = vmatpush3.bf16.msra.mxu0 %v7177_v2  ;;  %6271 = vmatprep.subr.bf16.mxu1 %v7180_v4 }
 0xa90   :  { %v5462_v8 = vadd.f32 1.0, %v7199_v6  ;;  %6251 = vmatprep.subr.bf16.mxu0 %v7179_v14 }
 0xa91   :  { %v7201_v10 = vpop.eup %7200 }
 0xa92   :  { %v5476_v11 = vmul.f32 0.5, %v5462_v8  ;;  %v5463_v12 = vadd.f32 1.0, %v7201_v10  ;;  %6272 = vmatpush3.bf16.msra.mxu1 %v7182_v5 }
 0xa93   :  { %v7203_v17 = vpop.eup %7202  ;;  %6252 = vmatpush3.bf16.msra.mxu0 %v7181_v1  ;;  %6273 = vmatprep.subr.bf16.mxu1 %v7184_v7 }
 0xa94   :  { %5490 = vst [vmem:[#allocation38] sm:$0xff] %v5476_v11  ;;  %v5477_v22 = vmul.f32 0.5, %v5463_v12  ;;  %v5469_v23 = vadd.f32 1.0, %v7203_v17  ;;  %6253 = vmatprep.subr.bf16.mxu0 %v7183_v9 }
 0xa95   :  { %v7205_v38 = vpop.eup %7204 }
 0xa96   :  { %5491 = vst [vmem:[#allocation38 + $0x8] sm:$0xff] %v5477_v22  ;;  %v5483_v25 = vmul.f32 0.5, %v5469_v23  ;;  %v5470_v26 = vadd.f32 1.0, %v7205_v38  ;;  %6274 = vmatpush3.bf16.msra.mxu1 %v7186_v13  ;;  %v4946_v39 = vpop.f32.mrf.mxu0 }
 0xa97   :  { %6254 = vmatpush3.bf16.msra.mxu0 %v7185_v18  ;;  %6275 = vmatprep.subr.bf16.mxu1 %v7188_v21 }
 0xa98   :  { %5497 = vst [vmem:[#allocation38 + $0x38] sm:$0xff] %v5483_v25  ;;  %v5484_v33 = vmul.f32 0.5, %v5470_v26  ;;  %6255 = vmatprep.subr.bf16.mxu0 %v7187_v24  ;;  %v4948_v41 = vpop.f32.mrf.mxu0 }
 0xa9a   :  { %5498 = vst [vmem:[#allocation38 + $0x40] sm:$0xff] %v5484_v33  ;;  %6276 = vmatpush3.bf16.msra.mxu1 %v7190_v27  ;;  %v4950_v44 = vpop.f32.mrf.mxu0 }
 0xa9b   :  { %6256 = vmatpush3.bf16.msra.mxu0 %v7189_v28  ;;  %6277 = vmatprep.subr.bf16.mxu1 %v7191_v31 }
 0xa9c   :  { %6453 = vmatprep.subr.bf16.mxu0 %v7785_v43  ;;  %v4952_v51 = vpop.f32.mrf.mxu0 }
 0xa9e   :  { %5330 = vmatmul.mubr.bf16.vlgmr.msra.gmra.mxu0 %v8315_v20  ;;  %6278 = vmatpush3.bf16.msra.mxu1 %v7192_v34  ;;  %v2949_v20 = vrot.slane %v8368_v49, %v2040_v46 }
 0xa9f   :  { %6454 = vmatpush3.bf16.msra.mxu0 %v7193_v15  ;;  %6455 = vmatprep.mubr.msk.bf16.mxu0 %vm7786_vm0, %v7785_v43  ;;  %v2953_v43 = vrot.slane %v8368_v49, %v2044_v45 }
 0xaa0   :  { %v4951_v47 = vadd.f32 %v4950_v44, %v2949_v20 }
 0xaa1   :  { %5371 = vmatmul.mubr.bf16.vlgmr.msra.gmra.mxu1 %v8348_v55  ;;  %v4947_v55 = vadd.f32 %v4946_v39, %v2949_v20  ;;  %v4949_v52 = vadd.f32 %v4948_v41, %v2953_v43  ;;  %v4953_v56 = vadd.f32 %v4952_v51, %v2953_v43 }
 0xaa6   :  { %6456 = vmatmul.mubr.msk.bf16.vlgmr.msra.gmra.mxu0 %vm791_vm1, %v8334_v61 }
 0xab9   :  { %v4989_v36 = vpop.f32.mrf.mxu1 }
 0xaba   :  { %v4990_v61 = vadd.f32 %v4989_v36, %v4947_v55 }
 0xabb   :  { %v4991_v37 = vpop.f32.mrf.mxu1 }
 0xabc   :  { %v4992_v16 = vadd.f32 %v4991_v37, %v4949_v52 }
 0xabd   :  { %v4993_v40 = vpop.f32.mrf.mxu1 }
 0xabe   :  { %v4994_v57 = vadd.f32 %v4993_v40, %v4951_v47 }
 0xabf   :  { %v4995_v42 = vpop.f32.mrf.mxu1 }
 0xac0   :  { %v4996_v60 = vadd.f32 %v4995_v42, %v4953_v56 }
 0xac1   :  { %v5075_v50 = vpop.f32.mrf.mxu1 }
 0xac3   :  { %v5077_v19 = vpop.f32.mrf.mxu1 }
 0xac5   :  { %v5079_v58 = vpop.f32.mrf.mxu1 }
 0xac7   :  { %v5081_v6 = vpop.f32.mrf.mxu1 }
 0xad6   :  { %v5032_v53 = vpop.f32.mrf.mxu0 }
 0xad7   :  { %v5033_v54 = vadd.f32 %v5032_v53, %v4990_v61 }
 0xad8   :  { %v5034_v48 = vpop.f32.mrf.mxu0 }
 0xad9   :  { %v5076_v35 = vadd.f32 %v5075_v50, %v5033_v54  ;;  %v5035_v46 = vadd.f32 %v5034_v48, %v4992_v16 }
 0xada   :  { %v5036_v59 = vpop.f32.mrf.mxu0 }
 0xadb   :  { %v5422_v62 = vmax.f32 %v5076_v35, 0.0  ;;  %v5078_v45 = vadd.f32 %v5077_v19, %v5035_v46  ;;  %v5037_v3 = vadd.f32 %v5036_v59, %v4994_v57 }
 0xadc   :  { %v5038_v63 = vpop.f32.mrf.mxu0 }
 0xadd   :  { %v5436_v2 = vmul.f32 0.5, %v5422_v62  ;;  %v5423_v4 = vmax.f32 %v5078_v45, 0.0  ;;  %v5080_v14 = vadd.f32 %v5079_v58, %v5037_v3  ;;  %v5039_v5 = vadd.f32 %v5038_v63, %v4996_v60 }
 0xadf   :  { %7206 = vtanh.f32 %v5436_v2  ;;  %v5437_v1 = vmul.f32 0.5, %v5423_v4  ;;  %v5429_v7 = vmax.f32 %v5080_v14, 0.0  ;;  %v5082_v8 = vadd.f32 %v5081_v6, %v5039_v5 }
 0xae1   :  { %7208 = vtanh.f32 %v5437_v1  ;;  %v5443_v9 = vmul.f32 0.5, %v5429_v7  ;;  %v5430_v10 = vmax.f32 %v5082_v8, 0.0 }
 0xae3   :  { %7210 = vtanh.f32 %v5443_v9  ;;  %v5444_v11 = vmul.f32 0.5, %v5430_v10 }
 0xae5   :  { %7212 = vtanh.f32 %v5444_v11 }
 0xaec   :  { %v7207_v12 = vpop.eup %7206 }
 0xaed   :  { %v5464_v13 = vadd.f32 1.0, %v7207_v12 }
 0xaee   :  { %v7209_v17 = vpop.eup %7208 }
 0xaef   :  { %v5478_v18 = vmul.f32 0.5, %v5464_v13  ;;  %v5465_v21 = vadd.f32 1.0, %v7209_v17 }
 0xaf0   :  { %v7211_v22 = vpop.eup %7210 }
 0xaf1   :  { %5492 = vst [vmem:[#allocation38 + $0x10] sm:$0xff] %v5478_v18  ;;  %v5479_v23 = vmul.f32 0.5, %v5465_v21  ;;  %v5471_v24 = vadd.f32 1.0, %v7211_v22 }
 0xaf2   :  { %v7213_v38 = vpop.eup %7212 }
 0xaf3   :  { %5493 = vst [vmem:[#allocation38 + $0x18] sm:$0xff] %v5479_v23  ;;  %v5485_v25 = vmul.f32 0.5, %v5471_v24  ;;  %v5472_v26 = vadd.f32 1.0, %v7213_v38 }
 0xaf5   :  { %5499 = vst [vmem:[#allocation38 + $0x48] sm:$0xff] %v5485_v25  ;;  %v5486_v27 = vmul.f32 0.5, %v5472_v26 }
 0xaf7   :  { %5500 = vst [vmem:[#allocation38 + $0x50] sm:$0xff] %v5486_v27 }
 0xaf8   :  { %7697 = shalt.err (!%p7694_p7)
}
 0xaf9   :  { %5525 = dma.vmem_to_hbm [thread:$0]  %s5523_s29, 16, %s8436_s25, [#allocation40]   ;;  %v2957_v37 = vrot.slane %v8368_v49, %v2048_v29  ;;  %v2961_v40 = vrot.slane %v8368_v49, %v2052_v32  ;;  %v2965_v23 = vrot.slane %v8368_v49, %v2056_v30 }
 0xafa   :  { %s7789_s25 = smov [#allocation38]  }
 0xafb   :  { %s5509_s6 = sshll.u32 %s7789_s25, 4  ;;  %s5510_s6 = int_to_ptr.vmem [resolvable:$true] %s5509_s6 }
 0xafc   :  { %s7706_s3 = scalar_lea.vmem %s5510_s6, 1792  ;;  %p7711_p9 = scmp.lt.s32.totalorder %s5510_s6, %s5510_s6 }
 0xafd   :  { %p7707_p8 = scmp.ne.s32.totalorder %s5510_s6, %s7706_s3  ;;  %p7712_p10 = scmp.lt.s32.totalorder %s7706_s3, %s7706_s3 }
 0xaff   :  { %p7713_p11 = por %p7712_p10, %p7711_p9 }
 0xb01   :  { %v5118_v33 = vpop.f32.mrf.mxu1  ;;  %p7714_p12 = pnand %p7713_p11, %p7707_p8 }
 0xb02   :  { %v5119_v42 = vadd.f32 %v5118_v33, %v2957_v37 }
 0xb03   :  { %v5120_v15 = vpop.f32.mrf.mxu1 }
 0xb04   :  { %v5121_v44 = vadd.f32 %v5120_v15, %v2961_v40 }
 0xb05   :  { %v5122_v39 = vpop.f32.mrf.mxu1 }
 0xb06   :  { %v5123_v51 = vadd.f32 %v5122_v39, %v2957_v37 }
 0xb07   :  { %v5124_v20 = vpop.f32.mrf.mxu1 }
 0xb08   :  { %v5125_v53 = vadd.f32 %v5124_v20, %v2961_v40 }
 0xb16   :  { %v5161_v28 = vpop.f32.mrf.mxu0 }
 0xb17   :  { %v5162_v43 = vadd.f32 %v5161_v28, %v5119_v42 }
 0xb18   :  { %v5163_v31 = vpop.f32.mrf.mxu0 }
 0xb19   :  { %v5164_v52 = vadd.f32 %v5163_v31, %v5121_v44 }
 0xb1a   :  { %v5165_v34 = vpop.f32.mrf.mxu0 }
 0xb1b   :  { %v5166_v47 = vadd.f32 %v5165_v34, %v5123_v51 }
 0xb1c   :  { %v5167_v36 = vpop.f32.mrf.mxu0 }
 0xb1d   :  { %v5168_v56 = vadd.f32 %v5167_v36, %v5125_v53 }
 0xb1e   :  { %v5247_v41 = vpop.f32.mrf.mxu0 }
 0xb20   :  { %v5249_v50 = vpop.f32.mrf.mxu0 }
 0xb22   :  { %v5251_v54 = vpop.f32.mrf.mxu0 }
 0xb24   :  { %v5253_v45 = vpop.f32.mrf.mxu0 }
 0xb3e   :  { %v6235_v6 = vpop.f32.mrf.mxu0 }
 0xb40   :  { %v6236_v1 = vpop.f32.mrf.mxu0 }
 0xb41   :  { %v5204_v55 = vpop.f32.mrf.mxu1  ;;  %v6237_v24 = vadd.f32 %v6236_v1, %v6235_v6 }
 0xb42   :  { %v5205_v61 = vadd.f32 %v5204_v55, %v5162_v43  ;;  %v6238_v9 = vpop.f32.mrf.mxu0 }
 0xb43   :  { %v5206_v19 = vpop.f32.mrf.mxu1  ;;  %v5291_v34 = vadd.f32 %v6237_v24, %v2965_v23 }
 0xb44   :  { %v5248_v16 = vadd.f32 %v5247_v41, %v5205_v61  ;;  %v5207_v29 = vadd.f32 %v5206_v19, %v5164_v52  ;;  %v6239_v18 = vpop.f32.mrf.mxu0 }
 0xb45   :  { %v5208_v48 = vpop.f32.mrf.mxu1  ;;  %v6240_v15 = vadd.f32 %v6239_v18, %v6238_v9 }
 0xb46   :  { %v5424_v57 = vmax.f32 %v5248_v16, 0.0  ;;  %v5250_v32 = vadd.f32 %v5249_v50, %v5207_v29  ;;  %v5209_v35 = vadd.f32 %v5208_v48, %v5166_v47 }
 0xb47   :  { %v5210_v46 = vpop.f32.mrf.mxu1  ;;  %v5294_v49 = vadd.f32 %v6240_v15, %v2965_v23 }
 0xb48   :  { %v5438_v58 = vmul.f32 0.5, %v5424_v57  ;;  %v5425_v59 = vmax.f32 %v5250_v32, 0.0  ;;  %v5252_v60 = vadd.f32 %v5251_v54, %v5209_v35  ;;  %v5211_v62 = vadd.f32 %v5210_v46, %v5168_v56 }
 0xb4a   :  { %7214 = vtanh.f32 %v5438_v58  ;;  %v5439_v3 = vmul.f32 0.5, %v5425_v59  ;;  %v5431_v63 = vmax.f32 %v5252_v60, 0.0  ;;  %v5254_v2 = vadd.f32 %v5253_v45, %v5211_v62 }
 0xb4c   :  { %7216 = vtanh.f32 %v5439_v3  ;;  %v5445_v4 = vmul.f32 0.5, %v5431_v63  ;;  %v5432_v14 = vmax.f32 %v5254_v2, 0.0 }
 0xb4e   :  { %7218 = vtanh.f32 %v5445_v4  ;;  %v5446_v5 = vmul.f32 0.5, %v5432_v14 }
 0xb50   :  { %7220 = vtanh.f32 %v5446_v5 }
 0xb57   :  { %v7215_v7 = vpop.eup %7214 }
 0xb58   :  { %v5466_v8 = vadd.f32 1.0, %v7215_v7 }
 0xb59   :  { %v7217_v10 = vpop.eup %7216 }
 0xb5a   :  { %v5480_v11 = vmul.f32 0.5, %v5466_v8  ;;  %v5467_v12 = vadd.f32 1.0, %v7217_v10 }
 0xb5b   :  { %v7219_v13 = vpop.eup %7218 }
 0xb5c   :  { %5494 = vst [vmem:[#allocation38 + $0x20] sm:$0xff] %v5480_v11  ;;  %v5481_v17 = vmul.f32 0.5, %v5467_v12  ;;  %v5473_v21 = vadd.f32 1.0, %v7219_v13 }
 0xb5d   :  { %v7221_v22 = vpop.eup %7220 }
 0xb5e   :  { %5495 = vst [vmem:[#allocation38 + $0x28] sm:$0xff] %v5481_v17  ;;  %v5487_v38 = vmul.f32 0.5, %v5473_v21  ;;  %v5474_v25 = vadd.f32 1.0, %v7221_v22  ;;  %v6257_v26 = vpop.f32.mrf.mxu0 }
 0xb60   :  { %5501 = vst [vmem:[#allocation38 + $0x58] sm:$0xff] %v5487_v38  ;;  %v5488_v27 = vmul.f32 0.5, %v5474_v25  ;;  %v6258_v28 = vpop.f32.mrf.mxu0 }
 0xb61   :  { %v6259_v31 = vadd.f32 %v6258_v28, %v6257_v26  ;;  %v6279_v33 = vpop.f32.mrf.mxu1 }
 0xb62   :  { %5502 = vst [vmem:[#allocation38 + $0x60] sm:$0xff] %v5488_v27  ;;  %v6260_v36 = vpop.f32.mrf.mxu0 }
 0xb63   :  { %v6280_v37 = vpop.f32.mrf.mxu1  ;;  %v5332_v39 = vadd.f32 %v6259_v31, %v5291_v34 }
 0xb64   :  { %v6261_v40 = vpop.f32.mrf.mxu0  ;;  %v6281_v0 = vadd.f32 %v6280_v37, %v6279_v33 }
 0xb65   :  { %v6262_v41 = vadd.f32 %v6261_v40, %v6260_v36  ;;  %v6282_v30 = vpop.f32.mrf.mxu1 }
 0xb66   :  { %v5373_v42 = vadd.f32 %v6281_v0, %v5332_v39  ;;  %v5413_v20 = vpop.f32.mrf.mxu0 }
 0xb67   :  { %v6283_v44 = vpop.f32.mrf.mxu1  ;;  %v5335_v43 = vadd.f32 %v6262_v41, %v5294_v49 }
 0xb68   :  { %v5414_v50 = vadd.f32 %v5413_v20, %v5373_v42  ;;  %v6284_v55 = vadd.f32 %v6283_v44, %v6282_v30  ;;  %v6457_v51 = vpop.f32.mrf.mxu0 }
 0xb6a   :  { %v5426_v52 = vmax.f32 %v5414_v50, 0.0  ;;  %v5376_v61 = vadd.f32 %v6284_v55, %v5335_v43  ;;  %v5416_v19 = vpop.f32.mrf.mxu0 }
 0xb6c   :  { %v5440_v53 = vmul.f32 0.5, %v5426_v52  ;;  %v5417_v47 = vadd.f32 %v5416_v19, %v5376_v61  ;;  %v6458_v16 = vpop.f32.mrf.mxu0 }
 0xb6e   :  { %7222 = vtanh.f32 %v5440_v53  ;;  %v5433_v29 = vmax.f32 %v5417_v47, 0.0 }
 0xb70   :  { %v5447_v54 = vmul.f32 0.5, %v5433_v29 }
 0xb72   :  { %7224 = vtanh.f32 %v5447_v54 }
 0xb7b   :  { %v7223_v48 = vpop.eup %7222 }
 0xb7c   :  { %v5468_v56 = vadd.f32 1.0, %v7223_v48 }
 0xb7e   :  { %v5482_v57 = vmul.f32 0.5, %v5468_v56 }
 0xb7f   :  { %v7225_v32 = vpop.eup %7224 }
 0xb80   :  { %5496 = vst.msk [vmem:[#allocation38 + $0x30] sm:$0xff] %vm791_vm1, %v5482_v57  ;;  %v5475_v35 = vadd.f32 1.0, %v7225_v32 }
 0xb82   :  { %v5489_v46 = vmul.f32 0.5, %v5475_v35 }
 0xb84   :  { %5503 = vst.msk [vmem:[#allocation38 + $0x68] sm:$0xff] %vm791_vm1, %v5489_v46 }
 0xb85   :  { %7717 = shalt.err (!%p7714_p12)
}
 0xb86   :  { %5515 = dma.vmem_to_hbm [thread:$0]  %s5510_s6, 1792, %s8435_s24, [#allocation4], %s7770_s19, %s7770_s19, %s7771_s27  }
 0xb87   :  { %7750 = dma.done.wait [#allocation4], 1792  }
 0xb88   :  { %7751 = vsyncadd [#allocation4], 4294965504 }
 0xb89   :  { %7752 = dma.done.wait [#allocation40], 16  }
 0xb8a   :  { %7753 = vsyncadd [#allocation40], 4294967280 }
 0xb8b   :  { %5532 = vsyncpa [#allocation3], 1 }
 0xb8c   :  { %5533 = vsyncpa [#allocation6], 1 }
 0xb8d   :  { %5534 = vsyncpa [#allocation9], 1 }
 0xb8e   :  { %5535 = vsyncpa [#allocation12], 1 }
 0xb8f   :  { %5536 = vsyncpa [#allocation15], 1 }
 0xb90   :  { %5537 = vsyncpa [#allocation18], 1 }
 0xb91   :  { %5538 = vsyncpa [#allocation21], 1 }
 0xb92   :  { %5539 = vsyncpa [#allocation24], 1 }
 0xb93   :  { %5540 = vsyncpa [#allocation27], 1 }
 0xb94   :  { %5541 = vsyncpa [#allocation30], 1 }
 0xb95   :  { %5542 = vsyncpa [#allocation33], 1 }
 0xb96   :  { %5543 = vsyncpa [#allocation36], 1 }
 0xb97   :  { %5544 = vsyncpa [#allocation4], 1 }
 0xb98   :  { %5545 = vsyncpa [#allocation40], 1 }

</bundles_post_ra>
